<compile_context>
chip_gen: v5e
topology: v5e:2x2
jax: 0.10.0
libtpu: 0.0.40
codegen_flags: <defaults>
</compile_context>

<pallas_src>
import jax
import jax.numpy as jnp
from jax import lax
from jax.experimental import pallas as pl
from jax.experimental.pallas import tpu as pltpu


def _double_conv_kernel(xp_ref, k1_ref, w1_ref, s1_ref, b1_ref,
                        k2_ref, w2_ref, s2_ref, b2_ref, o_ref, pad_ref):
    # xp_ref : (H+2, W+2, Cin)  pre-padded input slab for this batch element
    # k1_ref : (9, Cin)   depthwise-1 taps      w1_ref : (Cin, Cout)  pointwise-1
    # k2_ref : (9, Cout)  depthwise-2 taps      w2_ref : (Cout, Cout) pointwise-2
    # s*/b*  : (1, Cout)  folded BN scale/shift
    # o_ref  : (H, W, Cout)
    # pad_ref: (H+2, W+2, Cout) VMEM scratch for padding the intermediate
    Hp, Wp, Cin = xp_ref.shape
    H, W = Hp - 2, Wp - 2
    Cout = w1_ref.shape[1]

    # ---- depthwise 3x3 #1: 9 shifted taps on the pre-padded input (VPU) -------
    k1 = k1_ref[...]                                       # (9, Cin)
    acc = jnp.zeros((H, W, Cin), jnp.float32)
    for i in range(3):
        for j in range(3):
            acc = acc + xp_ref[i:i + H, j:j + W, :] * k1[3 * i + j][None, None, :]

    # ---- pointwise 1x1 #1 (MXU) + folded BN1 + ReLU ----------------------------
    h = jnp.dot(acc.reshape(H * W, Cin), w1_ref[...],
                preferred_element_type=jnp.float32)        # (H*W, Cout)
    h = jnp.maximum(h * s1_ref[...] + b1_ref[...], 0.0)

    # ---- zero-pad the intermediate into VMEM scratch for depthwise #2 ---------
    pad_ref[...] = jnp.zeros_like(pad_ref)
    pad_ref[1:H + 1, 1:W + 1, :] = h.reshape(H, W, Cout)

    # ---- depthwise 3x3 #2 ------------------------------------------------------
    k2 = k2_ref[...]                                       # (9, Cout)
    acc2 = jnp.zeros((H, W, Cout), jnp.float32)
    for i in range(3):
        for j in range(3):
            acc2 = acc2 + pad_ref[i:i + H, j:j + W, :] * k2[3 * i + j][None, None, :]

    # ---- pointwise 1x1 #2 (MXU) + folded BN2 + ReLU ----------------------------
    y = jnp.dot(acc2.reshape(H * W, Cout), w2_ref[...],
                preferred_element_type=jnp.float32)        # (H*W, Cout)
    y = jnp.maximum(y * s2_ref[...] + b2_ref[...], 0.0)

    o_ref[...] = y.reshape(H, W, Cout)


def inconv_forward(x, w_dw1, w_pw1, bn1, w_dw2, w_pw2, bn2, eps=1e-5):
    """x: (B, Cin, H, W) f32; weights in PyTorch layouts:
       w_dw1 (Cin,1,3,3), w_pw1 (Cout,Cin,1,1), w_dw2 (Cout,1,3,3), w_pw2 (Cout,Cout,1,1);
       bn* = (gamma, beta, running_mean, running_var), each (Cout,).
       Returns (B, Cout, H, W) f32."""
    g1, be1, m1, v1 = bn1
    g2, be2, m2, v2 = bn2
    B, Cin, H, W = x.shape
    Cout = w_pw1.shape[0]
    Hp, Wp = H + 2, W + 2

    # Fold BatchNorm (inference) into per-channel scale/shift (done once, in XLA).
    s1 = g1 / jnp.sqrt(v1 + eps)
    b1 = be1 - m1 * s1
    s2 = g2 / jnp.sqrt(v2 + eps)
    b2 = be2 - m2 * s2

    # Channel-last layout, spatially pre-padded once in the wrapper.
    xp = jnp.pad(jnp.transpose(x, (0, 2, 3, 1)),
                 ((0, 0), (1, 1), (1, 1), (0, 0)))               # (B, H+2, W+2, Cin)

    # Pre-arrange weights so the kernel body does zero transposes.
    k1 = jnp.transpose(w_dw1[:, 0], (1, 2, 0)).reshape(9, Cin)    # (9, Cin)
    w1 = jnp.transpose(w_pw1[:, :, 0, 0], (1, 0))                 # (Cin, Cout)
    k2 = jnp.transpose(w_dw2[:, 0], (1, 2, 0)).reshape(9, Cout)   # (9, Cout)
    w2 = jnp.transpose(w_pw2[:, :, 0, 0], (1, 0))                 # (Cout, Cout)

    cost = pl.CostEstimate(
        flops=int(B * H * W * (18 * Cin + 2 * Cin * Cout + 18 * Cout + 2 * Cout * Cout)),
        transcendentals=0,
        bytes_accessed=int(4 * (B * Hp * Wp * Cin + B * H * W * Cout
                                + 9 * Cin + Cin * Cout + 9 * Cout + Cout * Cout
                                + 4 * Cout)),
    )

    out = pl.pallas_call(
        _double_conv_kernel,
        out_shape=jax.ShapeDtypeStruct((B, H, W, Cout), jnp.float32),
        grid_spec=pltpu.PrefetchScalarGridSpec(
            num_scalar_prefetch=0,
            grid=(B,),
            in_specs=[
                pl.BlockSpec((None, Hp, Wp, Cin), lambda b: (b, 0, 0, 0)),  # per-batch slab
                pl.BlockSpec((9, Cin), lambda b: (0, 0)),                   # dw1 taps (resident)
                pl.BlockSpec((Cin, Cout), lambda b: (0, 0)),                # pw1 (resident)
                pl.BlockSpec((1, Cout), lambda b: (0, 0)),                  # BN1 scale
                pl.BlockSpec((1, Cout), lambda b: (0, 0)),                  # BN1 shift
                pl.BlockSpec((9, Cout), lambda b: (0, 0)),                  # dw2 taps
                pl.BlockSpec((Cout, Cout), lambda b: (0, 0)),               # pw2
                pl.BlockSpec((1, Cout), lambda b: (0, 0)),                  # BN2 scale
                pl.BlockSpec((1, Cout), lambda b: (0, 0)),                  # BN2 shift
            ],
            out_specs=pl.BlockSpec((None, H, W, Cout), lambda b: (b, 0, 0, 0)),
            scratch_shapes=[pltpu.VMEM((Hp, Wp, Cout), jnp.float32)],
        ),
        compiler_params=pltpu.CompilerParams(
            dimension_semantics=("parallel",),
            vmem_limit_bytes=32 * 1024 * 1024,
        ),
        cost_estimate=cost,
    )(xp, k1, w1, s1.reshape(1, Cout), b1.reshape(1, Cout),
      k2, w2, s2.reshape(1, Cout), b2.reshape(1, Cout))

    return jnp.transpose(out, (0, 3, 1, 2))                      # back to NCHW


def _reference(x, w_dw1, w_pw1, bn1, w_dw2, w_pw2, bn2, eps=1e-5):
    # Pure-JAX reference of the PyTorch forward (eval-mode BN) for a sanity check.
    dn = ("NCHW", "OIHW", "NCHW")

    def bn_relu(y, params):
        g, be, m, v = params
        yn = (g[None, :, None, None] * (y - m[None, :, None, None])
              / jnp.sqrt(v + eps)[None, :, None, None] + be[None, :, None, None])
        return jnp.maximum(yn, 0.0)

    y = lax.conv_general_dilated(x, w_dw1, (1, 1), ((1, 1), (1, 1)),
                                 dimension_numbers=dn, feature_group_count=x.shape[1])
    y = lax.conv_general_dilated(y, w_pw1, (1, 1), "VALID", dimension_numbers=dn)
    y = bn_relu(y, bn1)
    y = lax.conv_general_dilated(y, w_dw2, (1, 1), ((1, 1), (1, 1)),
                                 dimension_numbers=dn, feature_group_count=y.shape[1])
    y = lax.conv_general_dilated(y, w_pw2, (1, 1), "VALID", dimension_numbers=dn)
    y = bn_relu(y, bn2)
    return y


if __name__ == "__main__":
    key = jax.random.PRNGKey(0)
    ks = jax.random.split(key, 13)

    B, Cin, H, W = 2, 4, 16, 16
    Cout = 8

    x = jax.random.normal(ks[0], (B, Cin, H, W), dtype=jnp.float32)

    # Deterministic synthetic weights / BN stats (not a checkpoint).
    w_dw1 = jax.random.normal(ks[1], (Cin, 1, 3, 3), jnp.float32) * (2.0 / 9.0) ** 0.5
    w_pw1 = jax.random.normal(ks[2], (Cout, Cin, 1, 1), jnp.float32) * (2.0 / Cin) ** 0.5
    bn1 = (1.0 + 0.1 * jax.random.normal(ks[3], (Cout,), jnp.float32),
           0.1 * jax.random.normal(ks[4], (Cout,), jnp.float32),
           0.1 * jax.random.normal(ks[5], (Cout,), jnp.float32),
           jnp.abs(jax.random.normal(ks[6], (Cout,), jnp.float32)) + 0.5)

    w_dw2 = jax.random.normal(ks[7], (Cout, 1, 3, 3), jnp.float32) * (2.0 / 9.0) ** 0.5
    w_pw2 = jax.random.normal(ks[8], (Cout, Cout, 1, 1), jnp.float32) * (2.0 / Cout) ** 0.5
    bn2 = (1.0 + 0.1 * jax.random.normal(ks[9], (Cout,), jnp.float32),
           0.1 * jax.random.normal(ks[10], (Cout,), jnp.float32),
           0.1 * jax.random.normal(ks[11], (Cout,), jnp.float32),
           jnp.abs(jax.random.normal(ks[12], (Cout,), jnp.float32)) + 0.5)

    out = inconv_forward(x, w_dw1, w_pw1, bn1, w_dw2, w_pw2, bn2)
    jax.block_until_ready(out)

    ref = _reference(x, w_dw1, w_pw1, bn1, w_dw2, w_pw2, bn2)
    assert out.shape == (B, Cout, H, W)
    assert jnp.allclose(out, ref, atol=2e-4, rtol=2e-4), \
        float(jnp.max(jnp.abs(out - ref)))

    print("KERNEL_OK")
</pallas_src>

<mosaic_0001>
module attributes {stable_mosaic.version = 11 : i64} {
  func.func @_double_conv_kernel(%arg0: i32, %arg1: memref<1x18x18x4xf32, #tpu.memory_space<vmem>>, %arg2: memref<9x4xf32, #tpu.memory_space<vmem>>, %arg3: memref<4x8xf32, #tpu.memory_space<vmem>>, %arg4: memref<1x8xf32, #tpu.memory_space<vmem>>, %arg5: memref<1x8xf32, #tpu.memory_space<vmem>>, %arg6: memref<9x8xf32, #tpu.memory_space<vmem>>, %arg7: memref<8x8xf32, #tpu.memory_space<vmem>>, %arg8: memref<1x8xf32, #tpu.memory_space<vmem>>, %arg9: memref<1x8xf32, #tpu.memory_space<vmem>>, %arg10: memref<1x16x16x8xf32, #tpu.memory_space<vmem>>, %arg11: memref<18x18x8xf32, #tpu.memory_space<vmem>>) attributes {dimension_semantics = [#tpu.dimension_semantics<parallel>], iteration_bounds = array<i64: 2>, scalar_prefetch = 0 : i64, scratch_operands = 1 : i64, tpu.core_type = #tpu.core_type<tc>, window_params = [{transform_indices = @transform_0, window_bounds = array<i64: 1, 18, 18, 4>}, {pipeline_mode = #tpu.pipeline_mode<synchronous>, transform_indices = @transform_1, window_bounds = array<i64: 9, 4>}, {pipeline_mode = #tpu.pipeline_mode<synchronous>, transform_indices = @transform_2, window_bounds = array<i64: 4, 8>}, {pipeline_mode = #tpu.pipeline_mode<synchronous>, transform_indices = @transform_3, window_bounds = array<i64: 1, 8>}, {pipeline_mode = #tpu.pipeline_mode<synchronous>, transform_indices = @transform_4, window_bounds = array<i64: 1, 8>}, {pipeline_mode = #tpu.pipeline_mode<synchronous>, transform_indices = @transform_5, window_bounds = array<i64: 9, 8>}, {pipeline_mode = #tpu.pipeline_mode<synchronous>, transform_indices = @transform_6, window_bounds = array<i64: 8, 8>}, {pipeline_mode = #tpu.pipeline_mode<synchronous>, transform_indices = @transform_7, window_bounds = array<i64: 1, 8>}, {pipeline_mode = #tpu.pipeline_mode<synchronous>, transform_indices = @transform_8, window_bounds = array<i64: 1, 8>}, {transform_indices = @transform_9, window_bounds = array<i64: 1, 16, 16, 8>}]} {
    %c0 = arith.constant 0 : index
    %c0_0 = arith.constant 0 : index
    %0 = vector.load %arg2[%c0, %c0_0] : memref<9x4xf32, #tpu.memory_space<vmem>>, vector<9x4xf32>
    %cst = arith.constant 0.000000e+00 : f32
    %1 = vector.broadcast %cst : f32 to vector<16x16x4xf32>
    %c0_1 = arith.constant 0 : index
    %c0_2 = arith.constant 0 : index
    %c0_3 = arith.constant 0 : index
    %c0_4 = arith.constant 0 : index
    %2 = vector.load %arg1[%c0_1, %c0_2, %c0_3, %c0_4] : memref<1x18x18x4xf32, #tpu.memory_space<vmem>>, vector<1x16x16x4xf32>
    %3 = vector.shape_cast %2 : vector<1x16x16x4xf32> to vector<16x16x4xf32>
    %4 = vector.extract_strided_slice %0 {offsets = [0, 0], sizes = [1, 4], strides = [1, 1]} : vector<9x4xf32> to vector<1x4xf32>
    %5 = vector.shape_cast %4 : vector<1x4xf32> to vector<4xf32>
    %6 = vector.shape_cast %5 : vector<4xf32> to vector<1x1x4xf32>
    %7 = vector.broadcast %6 : vector<1x1x4xf32> to vector<16x16x4xf32>
    %8 = arith.mulf %3, %7 : vector<16x16x4xf32>
    %9 = arith.addf %1, %8 : vector<16x16x4xf32>
    %c0_5 = arith.constant 0 : index
    %c0_6 = arith.constant 0 : index
    %c1 = arith.constant 1 : index
    %c0_7 = arith.constant 0 : index
    %10 = vector.load %arg1[%c0_5, %c0_6, %c1, %c0_7] : memref<1x18x18x4xf32, #tpu.memory_space<vmem>>, vector<1x16x16x4xf32>
    %11 = vector.shape_cast %10 : vector<1x16x16x4xf32> to vector<16x16x4xf32>
    %12 = vector.extract_strided_slice %0 {offsets = [1, 0], sizes = [1, 4], strides = [1, 1]} : vector<9x4xf32> to vector<1x4xf32>
    %13 = vector.shape_cast %12 : vector<1x4xf32> to vector<4xf32>
    %14 = vector.shape_cast %13 : vector<4xf32> to vector<1x1x4xf32>
    %15 = vector.broadcast %14 : vector<1x1x4xf32> to vector<16x16x4xf32>
    %16 = arith.mulf %11, %15 : vector<16x16x4xf32>
    %17 = arith.addf %9, %16 : vector<16x16x4xf32>
    %c0_8 = arith.constant 0 : index
    %c0_9 = arith.constant 0 : index
    %c2 = arith.constant 2 : index
    %c0_10 = arith.constant 0 : index
    %18 = vector.load %arg1[%c0_8, %c0_9, %c2, %c0_10] : memref<1x18x18x4xf32, #tpu.memory_space<vmem>>, vector<1x16x16x4xf32>
    %19 = vector.shape_cast %18 : vector<1x16x16x4xf32> to vector<16x16x4xf32>
    %20 = vector.extract_strided_slice %0 {offsets = [2, 0], sizes = [1, 4], strides = [1, 1]} : vector<9x4xf32> to vector<1x4xf32>
    %21 = vector.shape_cast %20 : vector<1x4xf32> to vector<4xf32>
    %22 = vector.shape_cast %21 : vector<4xf32> to vector<1x1x4xf32>
    %23 = vector.broadcast %22 : vector<1x1x4xf32> to vector<16x16x4xf32>
    %24 = arith.mulf %19, %23 : vector<16x16x4xf32>
    %25 = arith.addf %17, %24 : vector<16x16x4xf32>
    %c0_11 = arith.constant 0 : index
    %c1_12 = arith.constant 1 : index
    %c0_13 = arith.constant 0 : index
    %c0_14 = arith.constant 0 : index
    %26 = vector.load %arg1[%c0_11, %c1_12, %c0_13, %c0_14] : memref<1x18x18x4xf32, #tpu.memory_space<vmem>>, vector<1x16x16x4xf32>
    %27 = vector.shape_cast %26 : vector<1x16x16x4xf32> to vector<16x16x4xf32>
    %28 = vector.extract_strided_slice %0 {offsets = [3, 0], sizes = [1, 4], strides = [1, 1]} : vector<9x4xf32> to vector<1x4xf32>
    %29 = vector.shape_cast %28 : vector<1x4xf32> to vector<4xf32>
    %30 = vector.shape_cast %29 : vector<4xf32> to vector<1x1x4xf32>
    %31 = vector.broadcast %30 : vector<1x1x4xf32> to vector<16x16x4xf32>
    %32 = arith.mulf %27, %31 : vector<16x16x4xf32>
    %33 = arith.addf %25, %32 : vector<16x16x4xf32>
    %c0_15 = arith.constant 0 : index
    %c1_16 = arith.constant 1 : index
    %c1_17 = arith.constant 1 : index
    %c0_18 = arith.constant 0 : index
    %34 = vector.load %arg1[%c0_15, %c1_16, %c1_17, %c0_18] : memref<1x18x18x4xf32, #tpu.memory_space<vmem>>, vector<1x16x16x4xf32>
    %35 = vector.shape_cast %34 : vector<1x16x16x4xf32> to vector<16x16x4xf32>
    %36 = vector.extract_strided_slice %0 {offsets = [4, 0], sizes = [1, 4], strides = [1, 1]} : vector<9x4xf32> to vector<1x4xf32>
    %37 = vector.shape_cast %36 : vector<1x4xf32> to vector<4xf32>
    %38 = vector.shape_cast %37 : vector<4xf32> to vector<1x1x4xf32>
    %39 = vector.broadcast %38 : vector<1x1x4xf32> to vector<16x16x4xf32>
    %40 = arith.mulf %35, %39 : vector<16x16x4xf32>
    %41 = arith.addf %33, %40 : vector<16x16x4xf32>
    %c0_19 = arith.constant 0 : index
    %c1_20 = arith.constant 1 : index
    %c2_21 = arith.constant 2 : index
    %c0_22 = arith.constant 0 : index
    %42 = vector.load %arg1[%c0_19, %c1_20, %c2_21, %c0_22] : memref<1x18x18x4xf32, #tpu.memory_space<vmem>>, vector<1x16x16x4xf32>
    %43 = vector.shape_cast %42 : vector<1x16x16x4xf32> to vector<16x16x4xf32>
    %44 = vector.extract_strided_slice %0 {offsets = [5, 0], sizes = [1, 4], strides = [1, 1]} : vector<9x4xf32> to vector<1x4xf32>
    %45 = vector.shape_cast %44 : vector<1x4xf32> to vector<4xf32>
    %46 = vector.shape_cast %45 : vector<4xf32> to vector<1x1x4xf32>
    %47 = vector.broadcast %46 : vector<1x1x4xf32> to vector<16x16x4xf32>
    %48 = arith.mulf %43, %47 : vector<16x16x4xf32>
    %49 = arith.addf %41, %48 : vector<16x16x4xf32>
    %c0_23 = arith.constant 0 : index
    %c2_24 = arith.constant 2 : index
    %c0_25 = arith.constant 0 : index
    %c0_26 = arith.constant 0 : index
    %50 = vector.load %arg1[%c0_23, %c2_24, %c0_25, %c0_26] : memref<1x18x18x4xf32, #tpu.memory_space<vmem>>, vector<1x16x16x4xf32>
    %51 = vector.shape_cast %50 : vector<1x16x16x4xf32> to vector<16x16x4xf32>
    %52 = vector.extract_strided_slice %0 {offsets = [6, 0], sizes = [1, 4], strides = [1, 1]} : vector<9x4xf32> to vector<1x4xf32>
    %53 = vector.shape_cast %52 : vector<1x4xf32> to vector<4xf32>
    %54 = vector.shape_cast %53 : vector<4xf32> to vector<1x1x4xf32>
    %55 = vector.broadcast %54 : vector<1x1x4xf32> to vector<16x16x4xf32>
    %56 = arith.mulf %51, %55 : vector<16x16x4xf32>
    %57 = arith.addf %49, %56 : vector<16x16x4xf32>
    %c0_27 = arith.constant 0 : index
    %c2_28 = arith.constant 2 : index
    %c1_29 = arith.constant 1 : index
    %c0_30 = arith.constant 0 : index
    %58 = vector.load %arg1[%c0_27, %c2_28, %c1_29, %c0_30] : memref<1x18x18x4xf32, #tpu.memory_space<vmem>>, vector<1x16x16x4xf32>
    %59 = vector.shape_cast %58 : vector<1x16x16x4xf32> to vector<16x16x4xf32>
    %60 = vector.extract_strided_slice %0 {offsets = [7, 0], sizes = [1, 4], strides = [1, 1]} : vector<9x4xf32> to vector<1x4xf32>
    %61 = vector.shape_cast %60 : vector<1x4xf32> to vector<4xf32>
    %62 = vector.shape_cast %61 : vector<4xf32> to vector<1x1x4xf32>
    %63 = vector.broadcast %62 : vector<1x1x4xf32> to vector<16x16x4xf32>
    %64 = arith.mulf %59, %63 : vector<16x16x4xf32>
    %65 = arith.addf %57, %64 : vector<16x16x4xf32>
    %c0_31 = arith.constant 0 : index
    %c2_32 = arith.constant 2 : index
    %c2_33 = arith.constant 2 : index
    %c0_34 = arith.constant 0 : index
    %66 = vector.load %arg1[%c0_31, %c2_32, %c2_33, %c0_34] : memref<1x18x18x4xf32, #tpu.memory_space<vmem>>, vector<1x16x16x4xf32>
    %67 = vector.shape_cast %66 : vector<1x16x16x4xf32> to vector<16x16x4xf32>
    %68 = vector.extract_strided_slice %0 {offsets = [8, 0], sizes = [1, 4], strides = [1, 1]} : vector<9x4xf32> to vector<1x4xf32>
    %69 = vector.shape_cast %68 : vector<1x4xf32> to vector<4xf32>
    %70 = vector.shape_cast %69 : vector<4xf32> to vector<1x1x4xf32>
    %71 = vector.broadcast %70 : vector<1x1x4xf32> to vector<16x16x4xf32>
    %72 = arith.mulf %67, %71 : vector<16x16x4xf32>
    %73 = arith.addf %65, %72 : vector<16x16x4xf32>
    %74 = vector.shape_cast %73 : vector<16x16x4xf32> to vector<256x4xf32>
    %c0_35 = arith.constant 0 : index
    %c0_36 = arith.constant 0 : index
    %75 = vector.load %arg3[%c0_35, %c0_36] : memref<4x8xf32, #tpu.memory_space<vmem>>, vector<4x8xf32>
    %cst_37 = arith.constant dense<0.000000e+00> : vector<256x8xf32>
    %76 = tpu.matmul %74, %75, %cst_37 {dimension_numbers = #tpu.dot_dimension_numbers<[1], [0], [0], [1], [0, 0, 1, 1], [], []>} : vector<256x4xf32>, vector<4x8xf32>, vector<256x8xf32> -> vector<256x8xf32>
    %c0_38 = arith.constant 0 : index
    %c0_39 = arith.constant 0 : index
    %77 = vector.load %arg4[%c0_38, %c0_39] : memref<1x8xf32, #tpu.memory_space<vmem>>, vector<1x8xf32>
    %78 = vector.broadcast %77 : vector<1x8xf32> to vector<256x8xf32>
    %79 = arith.mulf %76, %78 : vector<256x8xf32>
    %c0_40 = arith.constant 0 : index
    %c0_41 = arith.constant 0 : index
    %80 = vector.load %arg5[%c0_40, %c0_41] : memref<1x8xf32, #tpu.memory_space<vmem>>, vector<1x8xf32>
    %81 = vector.broadcast %80 : vector<1x8xf32> to vector<256x8xf32>
    %82 = arith.addf %79, %81 : vector<256x8xf32>
    %cst_42 = arith.constant 0.000000e+00 : f32
    %83 = vector.broadcast %cst_42 : f32 to vector<256x8xf32>
    %84 = arith.maximumf %82, %83 : vector<256x8xf32>
    %cst_43 = arith.constant 0.000000e+00 : f32
    %85 = vector.broadcast %cst_43 : f32 to vector<18x18x8xf32>
    %c0_44 = arith.constant 0 : index
    %c0_45 = arith.constant 0 : index
    %c0_46 = arith.constant 0 : index
    %86 = vector.load %arg11[%c0_44, %c0_45, %c0_46] : memref<18x18x8xf32, #tpu.memory_space<vmem>>, vector<18x18x8xf32>
    tpu.vector_store %arg11[%c0_44, %c0_45, %c0_46], %85 {strides = array<i32>} : memref<18x18x8xf32, #tpu.memory_space<vmem>>, vector<18x18x8xf32>,
    %87 = vector.shape_cast %84 : vector<256x8xf32> to vector<16x16x8xf32>
    %c1_47 = arith.constant 1 : index
    %c1_48 = arith.constant 1 : index
    %c0_49 = arith.constant 0 : index
    %88 = vector.load %arg11[%c1_47, %c1_48, %c0_49] : memref<18x18x8xf32, #tpu.memory_space<vmem>>, vector<16x16x8xf32>
    tpu.vector_store %arg11[%c1_47, %c1_48, %c0_49], %87 {strides = array<i32>} : memref<18x18x8xf32, #tpu.memory_space<vmem>>, vector<16x16x8xf32>,
    %c0_50 = arith.constant 0 : index
    %c0_51 = arith.constant 0 : index
    %89 = vector.load %arg6[%c0_50, %c0_51] : memref<9x8xf32, #tpu.memory_space<vmem>>, vector<9x8xf32>
    %cst_52 = arith.constant 0.000000e+00 : f32
    %90 = vector.broadcast %cst_52 : f32 to vector<16x16x8xf32>
    %c0_53 = arith.constant 0 : index
    %c0_54 = arith.constant 0 : index
    %c0_55 = arith.constant 0 : index
    %91 = vector.load %arg11[%c0_53, %c0_54, %c0_55] : memref<18x18x8xf32, #tpu.memory_space<vmem>>, vector<16x16x8xf32>
    %92 = vector.extract_strided_slice %89 {offsets = [0, 0], sizes = [1, 8], strides = [1, 1]} : vector<9x8xf32> to vector<1x8xf32>
    %93 = vector.shape_cast %92 : vector<1x8xf32> to vector<8xf32>
    %94 = vector.shape_cast %93 : vector<8xf32> to vector<1x1x8xf32>
    %95 = vector.broadcast %94 : vector<1x1x8xf32> to vector<16x16x8xf32>
    %96 = arith.mulf %91, %95 : vector<16x16x8xf32>
    %97 = arith.addf %90, %96 : vector<16x16x8xf32>
    %c0_56 = arith.constant 0 : index
    %c1_57 = arith.constant 1 : index
    %c0_58 = arith.constant 0 : index
    %98 = vector.load %arg11[%c0_56, %c1_57, %c0_58] : memref<18x18x8xf32, #tpu.memory_space<vmem>>, vector<16x16x8xf32>
    %99 = vector.extract_strided_slice %89 {offsets = [1, 0], sizes = [1, 8], strides = [1, 1]} : vector<9x8xf32> to vector<1x8xf32>
    %100 = vector.shape_cast %99 : vector<1x8xf32> to vector<8xf32>
    %101 = vector.shape_cast %100 : vector<8xf32> to vector<1x1x8xf32>
    %102 = vector.broadcast %101 : vector<1x1x8xf32> to vector<16x16x8xf32>
    %103 = arith.mulf %98, %102 : vector<16x16x8xf32>
    %104 = arith.addf %97, %103 : vector<16x16x8xf32>
    %c0_59 = arith.constant 0 : index
    %c2_60 = arith.constant 2 : index
    %c0_61 = arith.constant 0 : index
    %105 = vector.load %arg11[%c0_59, %c2_60, %c0_61] : memref<18x18x8xf32, #tpu.memory_space<vmem>>, vector<16x16x8xf32>
    %106 = vector.extract_strided_slice %89 {offsets = [2, 0], sizes = [1, 8], strides = [1, 1]} : vector<9x8xf32> to vector<1x8xf32>
    %107 = vector.shape_cast %106 : vector<1x8xf32> to vector<8xf32>
    %108 = vector.shape_cast %107 : vector<8xf32> to vector<1x1x8xf32>
    %109 = vector.broadcast %108 : vector<1x1x8xf32> to vector<16x16x8xf32>
    %110 = arith.mulf %105, %109 : vector<16x16x8xf32>
    %111 = arith.addf %104, %110 : vector<16x16x8xf32>
    %c1_62 = arith.constant 1 : index
    %c0_63 = arith.constant 0 : index
    %c0_64 = arith.constant 0 : index
    %112 = vector.load %arg11[%c1_62, %c0_63, %c0_64] : memref<18x18x8xf32, #tpu.memory_space<vmem>>, vector<16x16x8xf32>
    %113 = vector.extract_strided_slice %89 {offsets = [3, 0], sizes = [1, 8], strides = [1, 1]} : vector<9x8xf32> to vector<1x8xf32>
    %114 = vector.shape_cast %113 : vector<1x8xf32> to vector<8xf32>
    %115 = vector.shape_cast %114 : vector<8xf32> to vector<1x1x8xf32>
    %116 = vector.broadcast %115 : vector<1x1x8xf32> to vector<16x16x8xf32>
    %117 = arith.mulf %112, %116 : vector<16x16x8xf32>
    %118 = arith.addf %111, %117 : vector<16x16x8xf32>
    %c1_65 = arith.constant 1 : index
    %c1_66 = arith.constant 1 : index
    %c0_67 = arith.constant 0 : index
    %119 = vector.load %arg11[%c1_65, %c1_66, %c0_67] : memref<18x18x8xf32, #tpu.memory_space<vmem>>, vector<16x16x8xf32>
    %120 = vector.extract_strided_slice %89 {offsets = [4, 0], sizes = [1, 8], strides = [1, 1]} : vector<9x8xf32> to vector<1x8xf32>
    %121 = vector.shape_cast %120 : vector<1x8xf32> to vector<8xf32>
    %122 = vector.shape_cast %121 : vector<8xf32> to vector<1x1x8xf32>
    %123 = vector.broadcast %122 : vector<1x1x8xf32> to vector<16x16x8xf32>
    %124 = arith.mulf %119, %123 : vector<16x16x8xf32>
    %125 = arith.addf %118, %124 : vector<16x16x8xf32>
    %c1_68 = arith.constant 1 : index
    %c2_69 = arith.constant 2 : index
    %c0_70 = arith.constant 0 : index
    %126 = vector.load %arg11[%c1_68, %c2_69, %c0_70] : memref<18x18x8xf32, #tpu.memory_space<vmem>>, vector<16x16x8xf32>
    %127 = vector.extract_strided_slice %89 {offsets = [5, 0], sizes = [1, 8], strides = [1, 1]} : vector<9x8xf32> to vector<1x8xf32>
    %128 = vector.shape_cast %127 : vector<1x8xf32> to vector<8xf32>
    %129 = vector.shape_cast %128 : vector<8xf32> to vector<1x1x8xf32>
    %130 = vector.broadcast %129 : vector<1x1x8xf32> to vector<16x16x8xf32>
    %131 = arith.mulf %126, %130 : vector<16x16x8xf32>
    %132 = arith.addf %125, %131 : vector<16x16x8xf32>
    %c2_71 = arith.constant 2 : index
    %c0_72 = arith.constant 0 : index
    %c0_73 = arith.constant 0 : index
    %133 = vector.load %arg11[%c2_71, %c0_72, %c0_73] : memref<18x18x8xf32, #tpu.memory_space<vmem>>, vector<16x16x8xf32>
    %134 = vector.extract_strided_slice %89 {offsets = [6, 0], sizes = [1, 8], strides = [1, 1]} : vector<9x8xf32> to vector<1x8xf32>
    %135 = vector.shape_cast %134 : vector<1x8xf32> to vector<8xf32>
    %136 = vector.shape_cast %135 : vector<8xf32> to vector<1x1x8xf32>
    %137 = vector.broadcast %136 : vector<1x1x8xf32> to vector<16x16x8xf32>
    %138 = arith.mulf %133, %137 : vector<16x16x8xf32>
    %139 = arith.addf %132, %138 : vector<16x16x8xf32>
    %c2_74 = arith.constant 2 : index
    %c1_75 = arith.constant 1 : index
    %c0_76 = arith.constant 0 : index
    %140 = vector.load %arg11[%c2_74, %c1_75, %c0_76] : memref<18x18x8xf32, #tpu.memory_space<vmem>>, vector<16x16x8xf32>
    %141 = vector.extract_strided_slice %89 {offsets = [7, 0], sizes = [1, 8], strides = [1, 1]} : vector<9x8xf32> to vector<1x8xf32>
    %142 = vector.shape_cast %141 : vector<1x8xf32> to vector<8xf32>
    %143 = vector.shape_cast %142 : vector<8xf32> to vector<1x1x8xf32>
    %144 = vector.broadcast %143 : vector<1x1x8xf32> to vector<16x16x8xf32>
    %145 = arith.mulf %140, %144 : vector<16x16x8xf32>
    %146 = arith.addf %139, %145 : vector<16x16x8xf32>
    %c2_77 = arith.constant 2 : index
    %c2_78 = arith.constant 2 : index
    %c0_79 = arith.constant 0 : index
    %147 = vector.load %arg11[%c2_77, %c2_78, %c0_79] : memref<18x18x8xf32, #tpu.memory_space<vmem>>, vector<16x16x8xf32>
    %148 = vector.extract_strided_slice %89 {offsets = [8, 0], sizes = [1, 8], strides = [1, 1]} : vector<9x8xf32> to vector<1x8xf32>
    %149 = vector.shape_cast %148 : vector<1x8xf32> to vector<8xf32>
    %150 = vector.shape_cast %149 : vector<8xf32> to vector<1x1x8xf32>
    %151 = vector.broadcast %150 : vector<1x1x8xf32> to vector<16x16x8xf32>
    %152 = arith.mulf %147, %151 : vector<16x16x8xf32>
    %153 = arith.addf %146, %152 : vector<16x16x8xf32>
    %154 = vector.shape_cast %153 : vector<16x16x8xf32> to vector<256x8xf32>
    %c0_80 = arith.constant 0 : index
    %c0_81 = arith.constant 0 : index
    %155 = vector.load %arg7[%c0_80, %c0_81] : memref<8x8xf32, #tpu.memory_space<vmem>>, vector<8x8xf32>
    %cst_82 = arith.constant dense<0.000000e+00> : vector<256x8xf32>
    %156 = tpu.matmul %154, %155, %cst_82 {dimension_numbers = #tpu.dot_dimension_numbers<[1], [0], [0], [1], [0, 0, 1, 1], [], []>} : vector<256x8xf32>, vector<8x8xf32>, vector<256x8xf32> -> vector<256x8xf32>
    %c0_83 = arith.constant 0 : index
    %c0_84 = arith.constant 0 : index
    %157 = vector.load %arg8[%c0_83, %c0_84] : memref<1x8xf32, #tpu.memory_space<vmem>>, vector<1x8xf32>
    %158 = vector.broadcast %157 : vector<1x8xf32> to vector<256x8xf32>
    %159 = arith.mulf %156, %158 : vector<256x8xf32>
    %c0_85 = arith.constant 0 : index
    %c0_86 = arith.constant 0 : index
    %160 = vector.load %arg9[%c0_85, %c0_86] : memref<1x8xf32, #tpu.memory_space<vmem>>, vector<1x8xf32>
    %161 = vector.broadcast %160 : vector<1x8xf32> to vector<256x8xf32>
    %162 = arith.addf %159, %161 : vector<256x8xf32>
    %cst_87 = arith.constant 0.000000e+00 : f32
    %163 = vector.broadcast %cst_87 : f32 to vector<256x8xf32>
    %164 = arith.maximumf %162, %163 : vector<256x8xf32>
    %165 = vector.shape_cast %164 : vector<256x8xf32> to vector<16x16x8xf32>
    %c0_88 = arith.constant 0 : index
    %c0_89 = arith.constant 0 : index
    %c0_90 = arith.constant 0 : index
    %c0_91 = arith.constant 0 : index
    %166 = vector.load %arg10[%c0_88, %c0_89, %c0_90, %c0_91] : memref<1x16x16x8xf32, #tpu.memory_space<vmem>>, vector<1x16x16x8xf32>
    %167 = vector.shape_cast %166 : vector<1x16x16x8xf32> to vector<16x16x8xf32>
    %168 = vector.shape_cast %165 : vector<16x16x8xf32> to vector<1x16x16x8xf32>
    tpu.vector_store %arg10[%c0_88, %c0_89, %c0_90, %c0_91], %168 {strides = array<i32>} : memref<1x16x16x8xf32, #tpu.memory_space<vmem>>, vector<1x16x16x8xf32>,
    return
  }
  func.func @transform_0(%arg0: i32) -> (i32, i32, i32, i32) {
    %c0_i32 = arith.constant 0 : i32
    %c0_i32_0 = arith.constant 0 : i32
    %c0_i32_1 = arith.constant 0 : i32
    %c0_i32_2 = arith.constant 0 : i32
    return %arg0, %c0_i32, %c0_i32_0, %c0_i32_1 : i32, i32, i32, i32
  }
  func.func @transform_1(%arg0: i32) -> (i32, i32) {
    %c0_i32 = arith.constant 0 : i32
    %c0_i32_0 = arith.constant 0 : i32
    %c0_i32_1 = arith.constant 0 : i32
    return %c0_i32, %c0_i32_0 : i32, i32
  }
  func.func @transform_2(%arg0: i32) -> (i32, i32) {
    %c0_i32 = arith.constant 0 : i32
    %c0_i32_0 = arith.constant 0 : i32
    %c0_i32_1 = arith.constant 0 : i32
    return %c0_i32, %c0_i32_0 : i32, i32
  }
  func.func @transform_3(%arg0: i32) -> (i32, i32) {
    %c0_i32 = arith.constant 0 : i32
    %c0_i32_0 = arith.constant 0 : i32
    %c0_i32_1 = arith.constant 0 : i32
    return %c0_i32, %c0_i32_0 : i32, i32
  }
  func.func @transform_4(%arg0: i32) -> (i32, i32) {
    %c0_i32 = arith.constant 0 : i32
    %c0_i32_0 = arith.constant 0 : i32
    %c0_i32_1 = arith.constant 0 : i32
    return %c0_i32, %c0_i32_0 : i32, i32
  }
  func.func @transform_5(%arg0: i32) -> (i32, i32) {
    %c0_i32 = arith.constant 0 : i32
    %c0_i32_0 = arith.constant 0 : i32
    %c0_i32_1 = arith.constant 0 : i32
    return %c0_i32, %c0_i32_0 : i32, i32
  }
  func.func @transform_6(%arg0: i32) -> (i32, i32) {
    %c0_i32 = arith.constant 0 : i32
    %c0_i32_0 = arith.constant 0 : i32
    %c0_i32_1 = arith.constant 0 : i32
    return %c0_i32, %c0_i32_0 : i32, i32
  }
  func.func @transform_7(%arg0: i32) -> (i32, i32) {
    %c0_i32 = arith.constant 0 : i32
    %c0_i32_0 = arith.constant 0 : i32
    %c0_i32_1 = arith.constant 0 : i32
    return %c0_i32, %c0_i32_0 : i32, i32
  }
  func.func @transform_8(%arg0: i32) -> (i32, i32) {
    %c0_i32 = arith.constant 0 : i32
    %c0_i32_0 = arith.constant 0 : i32
    %c0_i32_1 = arith.constant 0 : i32
    return %c0_i32, %c0_i32_0 : i32, i32
  }
  func.func @transform_9(%arg0: i32) -> (i32, i32, i32, i32) {
    %c0_i32 = arith.constant 0 : i32
    %c0_i32_0 = arith.constant 0 : i32
    %c0_i32_1 = arith.constant 0 : i32
    %c0_i32_2 = arith.constant 0 : i32
    return %arg0, %c0_i32, %c0_i32_0, %c0_i32_1 : i32, i32, i32, i32
  }
}

</mosaic_0001>

<bundles_post_ra>
// kernel: tpu_custom_call.1
= control target key start
LH: loop header
LB: loop body
LE: loop exit
PB: predicated region body
PF: predicated region fallthrough
CT: control target
= control target key end

     0   :  { %s3244_s30 = smov 0   ;;  %s4946_s0 = inlined_call_operand.vmem [shape: f32[2,18,18,4], index: 0, kind: input, shape index: {}]   ;;  %s4947_s1 = inlined_call_operand.vmem [shape: f32[9,4], index: 1, kind: input, shape index: {}]   ;;  %s4948_s2 = inlined_call_operand.vmem [shape: f32[4,8], index: 2, kind: input, shape index: {}]   ;;  %s4949_s3 = inlined_call_operand.vmem [shape: f32[1,8], index: 3, kind: input, shape index: {}]   ;;  %s4950_s4 = inlined_call_operand.vmem [shape: f32[1,8], index: 4, kind: input, shape index: {}]   ;;  %s4951_s5 = inlined_call_operand.vmem [shape: f32[9,8], index: 5, kind: input, shape index: {}]   ;;  %s4952_s6 = inlined_call_operand.vmem [shape: f32[8,8], index: 6, kind: input, shape index: {}]   ;;  %s4953_s7 = inlined_call_operand.vmem [shape: f32[1,8], index: 7, kind: input, shape index: {}]   ;;  %s4954_s8 = inlined_call_operand.vmem [shape: f32[1,8], index: 8, kind: input, shape index: {}]   ;;  %s4955_s9 = inlined_call_operand.vmem [shape: f32[2,16,16,8], index: 9, kind: output, shape index: {}]  }
   0x1 LB: > { %s2895_s10 = sadd.s32 4294967295, %s3191_s30   ;;  %p2899_p0 = scmp.ge.s32.totalorder %s3191_s30, 1  ;;  %s3191_s30 = sphi %s3244_s30, %s19_s30  }
   0x2   : > { %p287_p1 = scmp.lt.s32.totalorder %s3191_s30, 3 }
   0x4   : > { %p288_p2 = pnand %p2899_p0, %p287_p1 }
   0x6   : > { %291 = sbr.rel (%p288_p2) target bundleno = 572 (0x23c), region = 56 }
   0xb   : > { %v1210_v0 = vld [vmem:[%s4948_s2] sm:$0xf]  ;;  %vm1308_vm0 = vcmask 1043456   ;;  %p323_p3 = scmp.lt.s32.totalorder %s2895_s10, 1  ;;  %v3315_v47 = vld [vmem:[%s4947_s1 + $0x8] ss:$0 sm:$0xff] }
   0xc   : > { %v333_v1 = vld [vmem:[%s4947_s1] sm:$0xff]  ;;  %3095 = vmatpush.msk.msra.mxu0 %vm1308_vm0, %v1210_v0  ;;  %3163 = vmatpush.msk.msra.mxu2 %vm1308_vm0, %v1210_v0  ;;  %vm1211_vm1 = vcmask 31744   ;;  %vm1529_vm2 = vcmask 64512   ;;  %vm1532_vm3 = vcmask 58368  }
   0xd   : > { %s4963_s10 = smov (!%p323_p3, %s2895_s10), 1  ;;  %v3260_v2 = vperm.slane %v333_v1, 0  ;;  %v3262_v3 = vperm.slane %v333_v1, 1  ;;  %v3265_v4 = vperm.slane %v333_v1, 2  ;;  %v3272_v5 = vperm.slane %v333_v1, 3 }
   0xe   : > { %s3165_s15 = smul.u32 432, %s4963_s10  ;;  %v3281_v13 = vperm.slane %v333_v1, 4  ;;  %v3285_v16 = vperm.slane %v333_v1, 5  ;;  %v3298_v30 = vperm.slane %v333_v1, 6  ;;  %v3303_v34 = vperm.slane %v333_v1, 7  ;;  %s3162_s24 = sshll.u32 %s4963_s10, 8 }
   0xf   : > { %s4705_s27 = scalar_lea.vmem %s4955_s9, %s3162_s24 }
  0x10   : > { %s3270_s18 = scalar_lea.vmem %s4946_s0, %s3165_s15 }
  0x11   : > { %v335_v6 = vld [vmem:[%s3270_s18] sm:$0xff]  ;;  %v2903_v12 = vld [vmem:[%s3270_s18 + $0x18] sm:$0xff]  ;;  %v336_v19 = vld [vmem:[%s3270_s18 + $0x8] sm:$0xff] }
  0x12   : > { %v432_v7 = vld [vmem:[%s3270_s18 + $0x1] sm:$0xff]  ;;  %v368_v9 = vmul.f32 %v3260_v2, %v335_v6  ;;  %v2935_v14 = vld [vmem:[%s3270_s18 + $0x19] sm:$0xff]  ;;  %v660_v18 = vmul.f32 %v2903_v12, %v3272_v5  ;;  %v433_v20 = vld [vmem:[%s3270_s18 + $0x9] sm:$0xff]  ;;  %v370_v22 = vmul.f32 %v2903_v12, %v3260_v2  ;;  %v369_v23 = vmul.f32 %v3260_v2, %v336_v19 }
  0x13   : > { %v529_v8 = vld [vmem:[%s3270_s18 + $0x2] sm:$0xff]  ;;  %v465_v10 = vmul.f32 %v3262_v3, %v432_v7  ;;  %v2967_v15 = vld [vmem:[%s3270_s18 + $0x1a] sm:$0xff]  ;;  %v530_v21 = vld [vmem:[%s3270_s18 + $0xa] sm:$0xff]  ;;  %v466_v24 = vmul.f32 %v3262_v3, %v433_v20  ;;  %v467_v27 = vmul.f32 %v2935_v14, %v3262_v3  ;;  %v757_v29 = vmul.f32 %v2935_v14, %v3281_v13 }
  0x14   : > { %v562_v11 = vmul.f32 %v3265_v4, %v529_v8  ;;  %v563_v25 = vmul.f32 %v3265_v4, %v530_v21  ;;  %v2904_v26 = vld [vmem:[%s3270_s18 + $0x20] sm:$0xff]  ;;  %v854_v32 = vmul.f32 %v2967_v15, %v3285_v16  ;;  %v2999_v33 = vld [vmem:[%s3270_s18 + $0x30] sm:$0xff]  ;;  %v564_v40 = vmul.f32 %v2967_v15, %v3265_v4  ;;  %v3000_v49 = vld [vmem:[%s3270_s18 + $0x38] sm:$0xff] }
  0x15   : > { %v497_v17 = vadd.f32 %v465_v10, %v368_v9  ;;  %v2936_v31 = vld [vmem:[%s3270_s18 + $0x21] sm:$0xff]  ;;  %v498_v35 = vadd.f32 %v466_v24, %v369_v23  ;;  %v661_v36 = vmul.f32 %v2904_v26, %v3272_v5  ;;  %v499_v39 = vadd.f32 %v467_v27, %v370_v22  ;;  %v3031_v42 = vld [vmem:[%s3270_s18 + $0x31] sm:$0xff]  ;;  %v3032_v53 = vld [vmem:[%s3270_s18 + $0x39] sm:$0xff] }
  0x16   : > { %v2968_v37 = vld [vmem:[%s3270_s18 + $0x22] sm:$0xff]  ;;  %v662_v41 = vmul.f32 %v2999_v33, %v3272_v5  ;;  %v758_v44 = vmul.f32 %v2936_v31, %v3281_v13  ;;  %v952_v46 = vmul.f32 %v2999_v33, %v3298_v30  ;;  %v3063_v51 = vld [vmem:[%s3270_s18 + $0x32] sm:$0xff]  ;;  %v759_v54 = vmul.f32 %v3031_v42, %v3281_v13  ;;  %v3064_v14 = vld [vmem:[%s3270_s18 + $0x3a] sm:$0xff] }
  0x17   : > { %v594_v28 = vadd.f32 %v562_v11, %v497_v17  ;;  %v595_v43 = vadd.f32 %v563_v25, %v498_v35  ;;  %v855_v48 = vmul.f32 %v2968_v37, %v3285_v16  ;;  %v596_v50 = vadd.f32 %v564_v40, %v499_v39  ;;  %v3001_v15 = vld [vmem:[%s3270_s18 + $0x48] sm:$0xff]  ;;  %v3002_v40 = vld [vmem:[%s3270_s18 + $0x50] sm:$0xff] }
  0x18   : > { %v371_v55 = vmul.f32 %v2904_v26, %v3260_v2  ;;  %v468_v56 = vmul.f32 %v2936_v31, %v3262_v3  ;;  %v1049_v58 = vmul.f32 %v3031_v42, %v3303_v34  ;;  %v565_v60 = vmul.f32 %v2968_v37, %v3265_v4 }
  0x19   : > { %v692_v38 = vadd.f32 %v660_v18, %v594_v28  ;;  %v693_v52 = vadd.f32 %v661_v36, %v595_v43  ;;  %v694_v59 = vadd.f32 %v662_v41, %v596_v50  ;;  %v953_v62 = vmul.f32 %v3000_v49, %v3298_v30  ;;  %v3033_v28 = vld [vmem:[%s3270_s18 + $0x49] sm:$0xff] }
  0x1a   : > { %v500_v63 = vadd.f32 %v468_v56, %v371_v55  ;;  %v1146_v1 = vmul.f32 %v3315_v47, %v3063_v51  ;;  %v1050_v6 = vmul.f32 %v3032_v53, %v3303_v34  ;;  %v856_v7 = vmul.f32 %v3063_v51, %v3285_v16  ;;  %v3066_v55 = vld [vmem:[%s3270_s18 + $0x52] sm:$0xff] }
  0x1b   : > { %v789_v45 = vadd.f32 %v757_v29, %v692_v38  ;;  %v790_v61 = vadd.f32 %v758_v44, %v693_v52  ;;  %v791_v9 = vadd.f32 %v759_v54, %v694_v59  ;;  %v372_v10 = vmul.f32 %v2999_v33, %v3260_v2  ;;  %v3065_v38 = vld [vmem:[%s3270_s18 + $0x4a] sm:$0xff] }
  0x1c   : > { %v469_v11 = vmul.f32 %v3031_v42, %v3262_v3  ;;  %v597_v17 = vadd.f32 %v565_v60, %v500_v63  ;;  %v663_v18 = vmul.f32 %v3000_v49, %v3272_v5  ;;  %v566_v19 = vmul.f32 %v3063_v51, %v3265_v4  ;;  %v3034_v54 = vld [vmem:[%s3270_s18 + $0x51] sm:$0xff]  ;;  %v3003_v60 = vld [vmem:[%s3270_s18 + $0x60] sm:$0xff] }
  0x1d   : > { %v886_v57 = vadd.f32 %v854_v32, %v789_v45  ;;  %v887_v8 = vadd.f32 %v855_v48, %v790_v61  ;;  %v1147_v23 = vmul.f32 %v3315_v47, %v3064_v14  ;;  %v888_v24 = vadd.f32 %v856_v7, %v791_v9 }
  0x1e   : > { %v501_v21 = vadd.f32 %v469_v11, %v372_v10  ;;  %v954_v25 = vmul.f32 %v3001_v15, %v3298_v30  ;;  %v760_v26 = vmul.f32 %v3032_v53, %v3281_v13  ;;  %v695_v29 = vadd.f32 %v663_v18, %v597_v17  ;;  %v3035_v17 = vld [vmem:[%s3270_s18 + $0x61] sm:$0xff] }
  0x1f   : > { %v984_v0 = vadd.f32 %v952_v46, %v886_v57  ;;  %v985_v20 = vadd.f32 %v953_v62, %v887_v8  ;;  %v664_v32 = vmul.f32 %v3001_v15, %v3272_v5  ;;  %v373_v33 = vmul.f32 %v3000_v49, %v3260_v2  ;;  %v3004_v8 = vld [vmem:[%s3270_s18 + $0x68] sm:$0xff] }
  0x20   : > { %v598_v31 = vadd.f32 %v566_v19, %v501_v21  ;;  %v470_v35 = vmul.f32 %v3032_v53, %v3262_v3  ;;  %v986_v36 = vadd.f32 %v954_v25, %v888_v24  ;;  %v1051_v37 = vmul.f32 %v3033_v28, %v3303_v34  ;;  %v3036_v25 = vld [vmem:[%s3270_s18 + $0x69] sm:$0xff] }
  0x21   : > { %v1081_v12 = vadd.f32 %v1049_v58, %v984_v0  ;;  %v1082_v27 = vadd.f32 %v1050_v6, %v985_v20  ;;  %v857_v39 = vmul.f32 %v3064_v14, %v3285_v16  ;;  %v761_v41 = vmul.f32 %v3033_v28, %v3281_v13 }
  0x22   : > { %v792_v43 = vadd.f32 %v760_v26, %v695_v29  ;;  %v696_v44 = vadd.f32 %v664_v32, %v598_v31  ;;  %v374_v45 = vmul.f32 %v3001_v15, %v3260_v2  ;;  %v502_v46 = vadd.f32 %v470_v35, %v373_v33 }
  0x23   : > { %v1178_v22 = vadd.f32 %v1146_v1, %v1081_v12  ;;  %v1179_v42 = vadd.f32 %v1147_v23, %v1082_v27  ;;  %v567_v48 = vmul.f32 %v3064_v14, %v3265_v4  ;;  %v471_v49 = vmul.f32 %v3033_v28, %v3262_v3  ;;  %v3067_v28 = vld [vmem:[%s3270_s18 + $0x62] sm:$0xff] }
  0x24   : > { %v568_v50 = vmul.f32 %v3065_v38, %v3265_v4  ;;  %v1148_v51 = vmul.f32 %v3315_v47, %v3065_v38  ;;  %v955_v52 = vmul.f32 %v3002_v40, %v3298_v30  ;;  %v1083_v53 = vadd.f32 %v1051_v37, %v986_v36 }
  0x25   : > { %3096 = vmatmul.msk.f32.vlgmr.msra.gmra.mxu0 %vm1211_vm1, %v1178_v22  ;;  %v858_v56 = vmul.f32 %v3065_v38, %v3285_v16  ;;  %v503_v57 = vadd.f32 %v471_v49, %v374_v45  ;;  %v375_v58 = vmul.f32 %v3002_v40, %v3260_v2  ;;  %v889_v59 = vadd.f32 %v857_v39, %v792_v43  ;;  %v3068_v43 = vld [vmem:[%s3270_s18 + $0x6a] sm:$0xff] }
  0x26   : > { %v665_v61 = vmul.f32 %v3002_v40, %v3272_v5  ;;  %v472_v62 = vmul.f32 %v3034_v54, %v3262_v3  ;;  %v569_v63 = vmul.f32 %v3066_v55, %v3265_v4  ;;  %v793_v0 = vadd.f32 %v761_v41, %v696_v44  ;;  %v3384_v41 = vld [vmem:[%s3270_s18 + $0x78] sm:$0xff] }
  0x27   : > { %v599_v1 = vadd.f32 %v567_v48, %v502_v46  ;;  %v600_v6 = vadd.f32 %v568_v50, %v503_v57  ;;  %v666_v7 = vmul.f32 %v3003_v60, %v3272_v5  ;;  %v1052_v10 = vmul.f32 %v3034_v54, %v3303_v34  ;;  %v3391_v46 = vld [vmem:[%s3270_s18 + $0x79] sm:$0xff] }
  0x28   : > { %v504_v9 = vadd.f32 %v472_v62, %v375_v58  ;;  %v956_v11 = vmul.f32 %v3003_v60, %v3298_v30  ;;  %v667_v12 = vmul.f32 %v3004_v8, %v3272_v5  ;;  %v1180_v14 = vadd.f32 %v1148_v51, %v1083_v53  ;;  %v3395_v50 = vld [vmem:[%s3270_s18 + $0x80] sm:$0xff] }
  0x29   : > { %v987_v15 = vadd.f32 %v955_v52, %v889_v59  ;;  %v762_v18 = vmul.f32 %v3034_v54, %v3281_v13  ;;  %v890_v20 = vadd.f32 %v858_v56, %v793_v0  ;;  %v697_v21 = vadd.f32 %v665_v61, %v599_v1  ;;  %v3403_v59 = vld [vmem:[%s3270_s18 + $0x7a] sm:$0xff] }
  0x2a   : > { %v601_v19 = vadd.f32 %v569_v63, %v504_v9  ;;  %v698_v22 = vadd.f32 %v666_v7, %v600_v6  ;;  %v763_v23 = vmul.f32 %v3035_v17, %v3281_v13  ;;  %v1149_v24 = vmul.f32 %v3315_v47, %v3066_v55  ;;  %v3406_v61 = vld [vmem:[%s3270_s18 + $0xc0] sm:$0xff] }
  0x2b   : > { %v376_v26 = vmul.f32 %v3003_v60, %v3260_v2  ;;  %v1053_v27 = vmul.f32 %v3035_v17, %v3303_v34  ;;  %v764_v31 = vmul.f32 %v3036_v25, %v3281_v13  ;;  %v473_v32 = vmul.f32 %v3035_v17, %v3262_v3  ;;  %v3409_v62 = vld [vmem:[%s3270_s18 + $0xc1] sm:$0xff] }
  0x2c   : > { %v699_v29 = vadd.f32 %v667_v12, %v601_v19  ;;  %v1084_v33 = vadd.f32 %v1052_v10, %v987_v15  ;;  %v859_v35 = vmul.f32 %v3066_v55, %v3285_v16  ;;  %v860_v36 = vmul.f32 %v3067_v28, %v3285_v16  ;;  %v3418_v10 = vld [vmem:[%s3270_s18 + $0x90] sm:$0xff]  ;;  %v3430_v15 = vld [vmem:[%s3270_s18 + $0x81] sm:$0xff] }
  0x2d   : > { %3097 = vmatmul.msk.f32.gmra.mxu0 %vm1211_vm1, %v1179_v42  ;;  %v570_v37 = vmul.f32 %v3067_v28, %v3265_v4  ;;  %v988_v38 = vadd.f32 %v956_v11, %v890_v20  ;;  %v794_v39 = vadd.f32 %v762_v18, %v697_v21  ;;  %v795_v40 = vadd.f32 %v763_v23, %v698_v22  ;;  %v3438_v23 = vld [vmem:[%s3270_s18 + $0x91] sm:$0xff] }
  0x2e   : > { %v505_v42 = vadd.f32 %v473_v32, %v376_v26  ;;  %v668_v44 = vmul.f32 %v3384_v41, %v3272_v5  ;;  %v1150_v45 = vmul.f32 %v3315_v47, %v3067_v28  ;;  %v796_v48 = vadd.f32 %v764_v31, %v699_v29  ;;  %v3441_v26 = vld [vmem:[%s3270_s18 + $0xd8] sm:$0xff] }
  0x2f   : > { %v861_v49 = vmul.f32 %v3068_v43, %v3285_v16  ;;  %v1181_v52 = vadd.f32 %v1149_v24, %v1084_v33  ;;  %v957_v53 = vmul.f32 %v3004_v8, %v3298_v30  ;;  %v958_v54 = vmul.f32 %v3384_v41, %v3298_v30 }
  0x30   : > { %v602_v51 = vadd.f32 %v570_v37, %v505_v42  ;;  %v765_v55 = vmul.f32 %v3391_v46, %v3281_v13  ;;  %v1085_v56 = vadd.f32 %v1053_v27, %v988_v38  ;;  %v891_v57 = vadd.f32 %v859_v35, %v794_v39  ;;  %v3455_v37 = vld [vmem:[%s3270_s18 + $0xd9] sm:$0xff] }
  0x31   : > { %v892_v58 = vadd.f32 %v860_v36, %v795_v40  ;;  %v959_v63 = vmul.f32 %v3395_v50, %v3298_v30  ;;  %v862_v0 = vmul.f32 %v3403_v59, %v3285_v16  ;;  %v377_v1 = vmul.f32 %v3004_v8, %v3260_v2  ;;  %v3452_v36 = vld [vmem:[%s3270_s18 + $0x82] sm:$0xff] }
  0x32   : > { %v700_v60 = vadd.f32 %v668_v44, %v602_v51  ;;  %v474_v6 = vmul.f32 %v3036_v25, %v3262_v3  ;;  %v893_v7 = vadd.f32 %v861_v49, %v796_v48  ;;  %v384_v11 = vmul.f32 %v3260_v2, %v3406_v61  ;;  %v3465_v48 = vld [vmem:[%s3270_s18 + $0x92] sm:$0xff] }
  0x33   : > { %v481_v12 = vmul.f32 %v3262_v3, %v3409_v62  ;;  %v1054_v8 = vmul.f32 %v3036_v25, %v3303_v34  ;;  %v960_v17 = vmul.f32 %v3418_v10, %v3298_v30  ;;  %v571_v19 = vmul.f32 %v3068_v43, %v3265_v4 }
  0x34   : > { %v797_v9 = vadd.f32 %v765_v55, %v700_v60  ;;  %v506_v18 = vadd.f32 %v474_v6, %v377_v1  ;;  %v989_v20 = vadd.f32 %v957_v53, %v891_v57  ;;  %v1055_v21 = vmul.f32 %v3391_v46, %v3303_v34  ;;  %v3480_v60 = vld [vmem:[%s3270_s18 + $0xf0] sm:$0xff] }
  0x35   : > { %3098 = vmatmul.msk.f32.gmra.mxu0 %vm1211_vm1, %v1180_v14  ;;  %v3425_v14 = vld [vmem:[%s3270_s18 + $0xc2] sm:$0xff]  ;;  %v513_v24 = vadd.f32 %v481_v12, %v384_v11  ;;  %v669_v27 = vmul.f32 %v3395_v50, %v3272_v5  ;;  %v676_v29 = vmul.f32 %v3441_v26, %v3272_v5  ;;  %v1182_v31 = vadd.f32 %v1150_v45, %v1085_v56  ;;  %v3495_v12 = vld [vmem:[%s3270_s18 + $0xca] sm:$0xff] }
  0x36   : > { %v894_v22 = vadd.f32 %v862_v0, %v797_v9  ;;  %v603_v25 = vadd.f32 %v571_v19, %v506_v18  ;;  %v578_v28 = vmul.f32 %v3265_v4, %v3425_v14  ;;  %v990_v32 = vadd.f32 %v958_v54, %v892_v58  ;;  %v3477_v56 = vld [vmem:[%s3270_s18 + $0xc8] sm:$0xff] }
  0x37   : > { %v991_v33 = vadd.f32 %v959_v63, %v893_v7  ;;  %v1056_v35 = vmul.f32 %v3430_v15, %v3303_v34  ;;  %v1057_v39 = vmul.f32 %v3438_v23, %v3303_v34  ;;  %v773_v42 = vmul.f32 %v3455_v37, %v3281_v13  ;;  %v3492_v11 = vld [vmem:[%s3270_s18 + $0xc9] sm:$0xff] }
  0x38   : > { %v992_v38 = vadd.f32 %v960_v17, %v894_v22  ;;  %v610_v40 = vadd.f32 %v578_v28, %v513_v24  ;;  %v1151_v44 = vmul.f32 %v3315_v47, %v3068_v43  ;;  %v1152_v45 = vmul.f32 %v3315_v47, %v3403_v59  ;;  %v3511_v24 = vld [vmem:[%s3270_s18 + $0xe0] sm:$0xff] }
  0x39   : > { %v701_v49 = vadd.f32 %v669_v27, %v603_v25  ;;  %v766_v51 = vmul.f32 %v3430_v15, %v3281_v13  ;;  %v1086_v53 = vadd.f32 %v1054_v8, %v989_v20  ;;  %v1153_v54 = vmul.f32 %v3315_v47, %v3452_v36  ;;  %v3498_v8 = vld [vmem:[%s3270_s18 + $0xf1] sm:$0xff] }
  0x3a   : > { %v708_v55 = vadd.f32 %v676_v29, %v610_v40  ;;  %v1087_v57 = vadd.f32 %v1055_v21, %v990_v32  ;;  %v1088_v58 = vadd.f32 %v1056_v35, %v991_v33  ;;  %v378_v63 = vmul.f32 %v3384_v41, %v3260_v2  ;;  %v3514_v25 = vld [vmem:[%s3270_s18 + $0xf2] sm:$0xff]  ;;  %v3525_v35 = vld [vmem:[%s3270_s18 + $0xe1] sm:$0xff] }
  0x3b   : > { %v475_v0 = vmul.f32 %v3391_v46, %v3262_v3  ;;  %v1089_v1 = vadd.f32 %v1057_v39, %v992_v38  ;;  %v1154_v6 = vmul.f32 %v3315_v47, %v3465_v48  ;;  %v968_v9 = vmul.f32 %v3480_v60, %v3298_v30  ;;  %4958 = vst [vmem:[#allocation3_spill] sm:$0xff] %v3525_v35 }
  0x3c   : > { %v805_v7 = vadd.f32 %v773_v42, %v708_v55  ;;  %v798_v41 = vadd.f32 %v766_v51, %v701_v49  ;;  %v572_v17 = vmul.f32 %v3403_v59, %v3265_v4  ;;  %v385_v18 = vmul.f32 %v3260_v2, %v3477_v56  ;;  %v3537_v55 = vld [vmem:[%s3270_s18 + $0x99] sm:$0xff] }
  0x3d   : > { %3099 = vmatmul.msk.f32.gmra.mxu0 %vm1211_vm1, %v1181_v52  ;;  %v3470_v52 = vld [vmem:[%s3270_s18 + $0xda] sm:$0xff]  ;;  %v507_v46 = vadd.f32 %v475_v0, %v378_v63  ;;  %v863_v19 = vmul.f32 %v3452_v36, %v3285_v16  ;;  %v1065_v21 = vmul.f32 %v3498_v8, %v3303_v34  ;;  %v670_v22 = vmul.f32 %v3418_v10, %v3272_v5  ;;  %v3540_v63 = vld [vmem:[%s3270_s18 + $0xe2] sm:$0xff] }
  0x3e   : > { %v870_v43 = vmul.f32 %v3470_v52, %v3285_v16  ;;  %v482_v59 = vmul.f32 %v3262_v3, %v3492_v11  ;;  %v579_v28 = vmul.f32 %v3265_v4, %v3495_v12  ;;  %v1183_v29 = vadd.f32 %v1151_v44, %v1086_v53  ;;  %v3534_v53 = vld [vmem:[%s3270_s18 + $0x98] sm:$0xff]  ;;  %4959 = vst [vmem:[#allocation4_spill] sm:$0xff] %v3540_v63 }
  0x3f   : > { %v604_v27 = vadd.f32 %v572_v17, %v507_v46  ;;  %v1162_v32 = vmul.f32 %v3315_v47, %v3514_v25  ;;  %v767_v33 = vmul.f32 %v3438_v23, %v3281_v13  ;;  %v1184_v38 = vadd.f32 %v1152_v45, %v1087_v57  ;;  %v3543_v45 = vld [vmem:[%s3270_s18 + $0x9a] sm:$0xff] }
  0x40   : > { %v902_v20 = vadd.f32 %v870_v43, %v805_v7  ;;  %v514_v40 = vadd.f32 %v482_v59, %v385_v18  ;;  %v677_v42 = vmul.f32 %v3511_v24, %v3272_v5  ;;  %v3529_v49 = vadd.f32 %v1153_v54, %v1088_v58 }
  0x41   : > { %v702_v39 = vadd.f32 %v670_v22, %v604_v27  ;;  %v3531_v44 = vadd.f32 %v1154_v6, %v1089_v1  ;;  %v895_v51 = vadd.f32 %v863_v19, %v798_v41  ;;  %v774_v0 = vmul.f32 %v3525_v35, %v3281_v13 }
  0x42   : > { %v611_v57 = vadd.f32 %v579_v28, %v514_v40  ;;  %v379_v54 = vmul.f32 %v3395_v50, %v3260_v2  ;;  %v476_v58 = vmul.f32 %v3430_v15, %v3262_v3  ;;  %v864_v7 = vmul.f32 %v3465_v48, %v3285_v16  ;;  %v3566_v15 = vld [vmem:[%s3270_s18 + $0xa8] sm:$0xff]  ;;  %v3585_v28 = vld [vmem:[%s3270_s18 + $0xfa] sm:$0xff] }
  0x43   : > { %v799_v6 = vadd.f32 %v767_v33, %v702_v39  ;;  %v573_v41 = vmul.f32 %v3452_v36, %v3265_v4  ;;  %v961_v46 = vmul.f32 %v3534_v53, %v3298_v30  ;;  %v3563_v50 = vmul.f32 %v3537_v55, %v3303_v34  ;;  %v3576_v36 = vld [vmem:[%s3270_s18 + $0xf9] sm:$0xff] }
  0x44   : > { %v709_v17 = vadd.f32 %v677_v42, %v611_v57  ;;  %v871_v18 = vmul.f32 %v3540_v63, %v3285_v16  ;;  %v3572_v19 = vmul.f32 %v3315_v47, %v3543_v45  ;;  %v386_v22 = vmul.f32 %v3441_v26, %v3260_v2  ;;  %v3596_v42 = vld [vmem:[%s3270_s18 + $0xa9] sm:$0xff] }
  0x45   : > { %3100 = vmatmul.msk.f32.gmra.mxu0 %vm1211_vm1, %v1182_v31  ;;  %v1000_v31 = vadd.f32 %v968_v9, %v902_v20  ;;  %v3555_v9 = vld [vmem:[%s3270_s18 + $0xf8] sm:$0xff]  ;;  %v508_v20 = vadd.f32 %v476_v58, %v379_v54  ;;  %v962_v33 = vmul.f32 %v3566_v15, %v3298_v30  ;;  %v768_v40 = vmul.f32 %v3537_v55, %v3281_v13 }
  0x46   : > { %v806_v27 = vadd.f32 %v774_v0, %v709_v17  ;;  %v969_v59 = vmul.f32 %v3555_v9, %v3298_v30  ;;  %v1066_v57 = vmul.f32 %v3576_v36, %v3303_v34  ;;  %v678_v54 = vmul.f32 %v3480_v60, %v3272_v5  ;;  %v3607_v17 = vld [vmem:[%s3270_s18 + $0xb0] sm:$0xff] }
  0x47   : > { %v1097_v43 = vadd.f32 %v1065_v21, %v1000_v31  ;;  %v671_v21 = vmul.f32 %v3534_v53, %v3272_v5  ;;  %v580_v31 = vmul.f32 %v3470_v52, %v3265_v4  ;;  %v605_v39 = vadd.f32 %v573_v41, %v508_v20 }
  0x48   : > { %v993_v58 = vadd.f32 %v961_v46, %v895_v51  ;;  %v775_v20 = vmul.f32 %v3498_v8, %v3281_v13  ;;  %v477_v51 = vmul.f32 %v3438_v23, %v3262_v3  ;;  %v1059_v46 = vmul.f32 %v3596_v42, %v3303_v34  ;;  %v3626_v23 = vld [vmem:[%s3270_s18 + $0x109] sm:$0xff] }
  0x49   : > { %v1194_v1 = vadd.f32 %v1162_v32, %v1097_v43  ;;  %v896_v32 = vadd.f32 %v864_v7, %v799_v6  ;;  %v903_v43 = vadd.f32 %v871_v18, %v806_v27  ;;  %v703_v6 = vadd.f32 %v671_v21, %v605_v39 }
  0x4a   : > { %v380_v7 = vmul.f32 %v3418_v10, %v3260_v2  ;;  %v865_v21 = vmul.f32 %v3543_v45, %v3285_v16  ;;  %v574_v27 = vmul.f32 %v3465_v48, %v3265_v4  ;;  %v872_v39 = vmul.f32 %v3514_v25, %v3285_v16 }
  0x4b   : > { %3112 = vmatmul.msk.f32.vlgmr.msra.gmra.mxu2 %vm1211_vm1, %v1194_v1  ;;  %v1163_v1 = vmul.f32 %v3315_v47, %v3585_v28  ;;  %v1001_v41 = vadd.f32 %v969_v59, %v903_v43  ;;  %v800_v10 = vadd.f32 %v768_v40, %v703_v6  ;;  %v994_v59 = vadd.f32 %v962_v33, %v896_v32  ;;  %v3635_v32 = vld [vmem:[%s3270_s18 + $0xaa] sm:$0xff] }
  0x4c   : > { %v509_v43 = vadd.f32 %v477_v51, %v380_v7  ;;  %v672_v48 = vmul.f32 %v3566_v15, %v3272_v5  ;;  %v769_v51 = vmul.f32 %v3596_v42, %v3281_v13 }
  0x4d   : > { %3101 = vmatmul.msk.f32.gmra.mxu0 %vm1211_vm1, %v1183_v29  ;;  %v483_v29 = vmul.f32 %v3455_v37, %v3262_v3  ;;  %v897_v6 = vadd.f32 %v865_v21, %v800_v10  ;;  %v679_v10 = vmul.f32 %v3555_v9, %v3272_v5  ;;  %v1090_v21 = vadd.f32 %v3563_v50, %v993_v58 }
  0x4e   : > { %v606_v7 = vadd.f32 %v574_v27, %v509_v43  ;;  %v1156_v27 = vmul.f32 %v3315_v47, %v3635_v32 }
  0x4f   : > { %v515_v0 = vadd.f32 %v483_v29, %v386_v22  ;;  %v3612_v22 = vld [vmem:[%s3270_s18 + $0x108] sm:$0xff]  ;;  %v1098_v29 = vadd.f32 %v1066_v57, %v1001_v41  ;;  %v1067_v41 = vmul.f32 %v3626_v23, %v3303_v34 }
  0x50   : > { %v970_v40 = vmul.f32 %v3612_v22, %v3298_v30  ;;  %v704_v43 = vadd.f32 %v672_v48, %v606_v7  ;;  %v1091_v7 = vadd.f32 %v1059_v46, %v994_v59  ;;  %v478_v46 = vmul.f32 %v3537_v55, %v3262_v3 }
  0x51   : > { %v612_v18 = vadd.f32 %v580_v31, %v515_v0  ;;  %v1195_v33 = vadd.f32 %v1163_v1, %v1098_v29  ;;  %v387_v0 = vmul.f32 %v3511_v24, %v3260_v2  ;;  %v3650_v1 = vld [vmem:[%s3270_s18 + $0xb1] sm:$0xff] }
  0x52   : > { %v1060_v58 = vmul.f32 %v3650_v1, %v3303_v34  ;;  %v801_v48 = vadd.f32 %v769_v51, %v704_v43  ;;  %v381_v51 = vmul.f32 %v3534_v53, %v3260_v2  ;;  %v3697_v53 = vld [vmem:[%s3270_s18 + $0x112] sm:$0xff] }
  0x53   : > { %v710_v31 = vadd.f32 %v678_v54, %v612_v18  ;;  %v484_v54 = vmul.f32 %v3525_v35, %v3262_v3  ;;  %v3644_v18 = vld [vmem:[%s3270_s18 + $0x10a] sm:$0xff]  ;;  %3113 = vmatmul.msk.f32.gmra.mxu2 %vm1211_vm1, %v1195_v33  ;;  %v866_v33 = vmul.f32 %v3635_v32, %v3285_v16 }
  0x55   : > { %3102 = vmatmul.msk.f32.gmra.mxu0 %vm1211_vm1, %v1184_v38  ;;  %v963_v38 = vmul.f32 %v3607_v17, %v3298_v30  ;;  %v807_v57 = vadd.f32 %v775_v20, %v710_v31  ;;  %v516_v29 = vadd.f32 %v484_v54, %v387_v0  ;;  %v581_v31 = vmul.f32 %v3540_v63, %v3265_v4 }
  0x56   : > { %v776_v0 = vmul.f32 %v3576_v36, %v3281_v13  ;;  %v964_v54 = vmul.f32 %v3298_v30, %v3406_v61  ;;  %v873_v63 = vmul.f32 %v3585_v28, %v3285_v16 }
  0x57   : > { %v904_v20 = vadd.f32 %v872_v39, %v807_v57  ;;  %v1164_v39 = vmul.f32 %v3315_v47, %v3644_v18  ;;  %v613_v57 = vadd.f32 %v581_v31, %v516_v29  ;;  %v995_v50 = vadd.f32 %v963_v38, %v897_v6  ;;  %v3682_v6 = vld [vmem:[%s3270_s18 + $0x111] sm:$0xff] }
  0x58   : > { %v1061_v38 = vmul.f32 %v3303_v34, %v3409_v62 }
  0x59   : > { %v1002_v35 = vadd.f32 %v970_v40, %v904_v20  ;;  %v3672_v40 = vld [vmem:[%s3270_s18 + $0x110] sm:$0xff]  ;;  %v711_v31 = vadd.f32 %v679_v10, %v613_v57  ;;  %v1092_v10 = vadd.f32 %v1060_v58, %v995_v50  ;;  %v510_v58 = vadd.f32 %v478_v46, %v381_v51 }
  0x5a   : > { %v3675_v20 = vld [vmem:[%s3270_s18 + $0xb2] sm:$0xff] }
  0x5b   : > { %v1099_v29 = vadd.f32 %v1067_v41, %v1002_v35  ;;  %v808_v43 = vadd.f32 %v776_v0, %v711_v31  ;;  %v971_v35 = vmul.f32 %v3672_v40, %v3298_v30  ;;  %v388_v41 = vmul.f32 %v3480_v60, %v3260_v2 }
  0x5c   : > { %v485_v0 = vmul.f32 %v3498_v8, %v3262_v3  ;;  %v582_v60 = vmul.f32 %v3514_v25, %v3265_v4  ;;  %v1165_v31 = vmul.f32 %v3315_v47, %v3697_v53  ;;  %v1187_v8 = vadd.f32 %v3572_v19, %v1090_v21  ;;  %v3728_v19 = vld [vmem:[%s3270_s18 + $0x120] sm:$0xff] }
  0x5d   : > { %3103 = vmatmul.msk.f32.gmra.mxu0 %vm1211_vm1, %v3529_v49  ;;  %v898_v49 = vadd.f32 %v866_v33, %v801_v48  ;;  %v1196_v59 = vadd.f32 %v1164_v39, %v1099_v29  ;;  %v1157_v33 = vmul.f32 %v3315_v47, %v3675_v20  ;;  %v1158_v48 = vmul.f32 %v3315_v47, %v3425_v14 }
  0x5e   : > { %v905_v55 = vadd.f32 %v873_v63, %v808_v43  ;;  %v1068_v39 = vmul.f32 %v3682_v6, %v3303_v34  ;;  %v517_v63 = vadd.f32 %v485_v0, %v388_v41  ;;  %v3715_v25 = vadd.f32 %v1156_v27, %v1091_v7 }
  0x5f   : > { %v996_v57 = vadd.f32 %v964_v54, %v898_v49  ;;  %3114 = vmatmul.msk.f32.gmra.mxu2 %vm1211_vm1, %v1196_v59  ;;  %v575_v54 = vmul.f32 %v3543_v45, %v3265_v4  ;;  %v680_v49 = vmul.f32 %v3612_v22, %v3272_v5  ;;  %v382_v45 = vmul.f32 %v3566_v15, %v3260_v2 }
  0x60   : > { %v1003_v29 = vadd.f32 %v971_v35, %v905_v55  ;;  %v3721_v51 = vadd.f32 %v1157_v33, %v1092_v10  ;;  %v614_v59 = vadd.f32 %v582_v60, %v517_v63  ;;  %v777_v43 = vmul.f32 %v3626_v23, %v3281_v13 }
  0x61   : > { %v1093_v50 = vadd.f32 %v1061_v38, %v996_v57  ;;  %v607_v35 = vadd.f32 %v575_v54, %v510_v58  ;;  %v479_v21 = vmul.f32 %v3596_v42, %v3262_v3  ;;  %v576_v15 = vmul.f32 %v3635_v32, %v3265_v4 }
  0x62   : > { %v1100_v46 = vadd.f32 %v1068_v39, %v1003_v29  ;;  %v712_v7 = vadd.f32 %v680_v49, %v614_v59  ;;  %v874_v41 = vmul.f32 %v3644_v18, %v3285_v16  ;;  %v389_v10 = vmul.f32 %v3555_v9, %v3260_v2  ;;  %v3753_v9 = vld [vmem:[%s3270_s18 + $0x122] sm:$0xff] }
  0x63   : > { %v3717_v38 = vadd.f32 %v1158_v48, %v1093_v50  ;;  %v770_v33 = vmul.f32 %v3650_v1, %v3281_v13  ;;  %v3742_v57 = vmul.f32 %v3675_v20, %v3285_v16  ;;  %v3745_v48 = vld [vmem:[%s3270_s18 + $0x121] sm:$0xff]  ;;  %v511_v42 = vadd.f32 %v479_v21, %v382_v45 }
  0x64   : > { %v1197_v27 = vadd.f32 %v1165_v31, %v1100_v46  ;;  %v674_v32 = vmul.f32 %v3272_v5, %v3406_v61  ;;  %v809_v55 = vadd.f32 %v777_v43, %v712_v7  ;;  %v972_v39 = vmul.f32 %v3728_v19, %v3298_v30 }
  0x65   : > { %3104 = vmatmul.msk.f32.gmra.mxu0 %vm1211_vm1, %v3531_v44  ;;  %v673_v44 = vmul.f32 %v3607_v17, %v3272_v5  ;;  %v486_v0 = vmul.f32 %v3576_v36, %v3262_v3  ;;  %v583_v60 = vmul.f32 %v3585_v28, %v3265_v4  ;;  %v3761_v58 = vmul.f32 %v3298_v30, %v3477_v56 }
  0x66   : > { %v608_v61 = vadd.f32 %v576_v15, %v511_v42  ;;  %v771_v54 = vmul.f32 %v3281_v13, %v3409_v62  ;;  %v906_v29 = vadd.f32 %v874_v41, %v809_v55  ;;  %v1069_v31 = vmul.f32 %v3745_v48, %v3303_v34 }
  0x67   : > { %3115 = vmatmul.msk.f32.gmra.mxu2 %vm1211_vm1, %v1197_v27  ;;  %v705_v50 = vadd.f32 %v673_v44, %v607_v35  ;;  %v518_v63 = vadd.f32 %v486_v0, %v389_v10  ;;  %v681_v36 = vmul.f32 %v3672_v40, %v3272_v5  ;;  %v1166_v28 = vmul.f32 %v3315_v47, %v3753_v9 }
  0x68   : > { %v706_v49 = vadd.f32 %v674_v32, %v608_v61  ;;  %v868_v45 = vmul.f32 %v3285_v16, %v3425_v14  ;;  %v383_v62 = vmul.f32 %v3607_v17, %v3260_v2  ;;  %v1004_v46 = vadd.f32 %v972_v39, %v906_v29 }
  0x69   : > { %v615_v59 = vadd.f32 %v583_v60, %v518_v63  ;;  %v778_v43 = vmul.f32 %v3682_v6, %v3281_v13  ;;  %v875_v35 = vmul.f32 %v3697_v53, %v3285_v16  ;;  %v966_v21 = vmul.f32 %v3441_v26, %v3298_v30  ;;  %v3796_v26 = vld [vmem:[%s3270_s18 + $0x129] sm:$0xff] }
  0x6a   : > { %v803_v44 = vadd.f32 %v771_v54, %v706_v49  ;;  %v1063_v14 = vmul.f32 %v3455_v37, %v3303_v34  ;;  %v480_v17 = vmul.f32 %v3650_v1, %v3262_v3  ;;  %v1101_v15 = vadd.f32 %v1069_v31, %v1004_v46  ;;  %v3825_v46 = vld [vmem:[%s3270_s18 + $0x138] sm:$0xff] }
  0x6b   : > { %v1160_v27 = vmul.f32 %v3315_v47, %v3470_v52  ;;  %v713_v7 = vadd.f32 %v681_v36, %v615_v59  ;;  %v577_v41 = vmul.f32 %v3675_v20, %v3265_v4  ;;  %v675_v37 = vmul.f32 %v3272_v5, %v3477_v56  ;;  %v3805_v20 = vld [vmem:[%s3270_s18 + $0x12a] sm:$0xff] }
  0x6c   : > { %v900_v10 = vadd.f32 %v868_v45, %v803_v44  ;;  %v512_v32 = vadd.f32 %v480_v17, %v383_v62  ;;  %v1198_v55 = vadd.f32 %v1166_v28, %v1101_v15  ;;  %v390_v39 = vmul.f32 %v3612_v22, %v3260_v2  ;;  %v4960_v17 = vld [vmem:[#allocation3_spill] sm:$0xff] }
  0x6d   : > { %3105 = vmatmul.msk.f32.gmra.mxu0 %vm1211_vm1, %v1187_v8  ;;  %v3781_v8 = vld [vmem:[%s3270_s18 + $0x128] sm:$0xff]  ;;  %v810_v1 = vadd.f32 %v778_v43, %v713_v7  ;;  %v487_v52 = vmul.f32 %v3626_v23, %v3262_v3  ;;  %v772_v61 = vmul.f32 %v3281_v13, %v3492_v11  ;;  %v584_v54 = vmul.f32 %v3644_v18, %v3265_v4 }
  0x6e   : > { %v973_v42 = vmul.f32 %v3781_v8, %v3298_v30  ;;  %v998_v0 = vadd.f32 %v966_v21, %v900_v10  ;;  %v609_v60 = vadd.f32 %v577_v41, %v512_v32  ;;  %v1070_v22 = vmul.f32 %v3796_v26, %v3303_v34  ;;  %v4961_v32 = vld [vmem:[#allocation4_spill] sm:$0xff] }
  0x6f   : > { %3116 = vmatmul.msk.f32.gmra.mxu2 %vm1211_vm1, %v1198_v55  ;;  %v907_v56 = vadd.f32 %v875_v35, %v810_v1  ;;  %v519_v29 = vadd.f32 %v487_v52, %v390_v39  ;;  %v682_v23 = vmul.f32 %v3728_v19, %v3272_v5  ;;  %v802_v31 = vadd.f32 %v770_v33, %v705_v50  ;;  %v3851_v55 = vld [vmem:[%s3270_s18 + $0x13a] sm:$0xff] }
  0x70   : > { %v1095_v63 = vadd.f32 %v1063_v14, %v998_v0  ;;  %v707_v36 = vadd.f32 %v675_v37, %v609_v60  ;;  %v869_v28 = vmul.f32 %v3285_v16, %v3495_v12  ;;  %v1167_v49 = vmul.f32 %v3315_v47, %v3805_v20 }
  0x71   : > { %v1005_v18 = vadd.f32 %v973_v42, %v907_v56  ;;  %v616_v45 = vadd.f32 %v584_v54, %v519_v29  ;;  %v779_v62 = vmul.f32 %v3745_v48, %v3281_v13  ;;  %v967_v33 = vmul.f32 %v3511_v24, %v3298_v30  ;;  %v3842_v24 = vld [vmem:[%s3270_s18 + $0x139] sm:$0xff] }
  0x72   : > { %v3827_v59 = vadd.f32 %v1160_v27, %v1095_v63  ;;  %v876_v50 = vmul.f32 %v3753_v9, %v3285_v16  ;;  %v391_v44 = vmul.f32 %v3672_v40, %v3260_v2  ;;  %v488_v21 = vmul.f32 %v3682_v6, %v3262_v3  ;;  %v3866_v54 = vld [vmem:[%s3270_s18 + $0x140] sm:$0xff] }
  0x73   : > { %v1102_v43 = vadd.f32 %v1070_v22, %v1005_v18  ;;  %v714_v35 = vadd.f32 %v682_v23, %v616_v45  ;;  %v1064_v15 = vmul.f32 %v4960_v17, %v3303_v34  ;;  %v974_v27 = vmul.f32 %v3825_v46, %v3298_v30  ;;  %v3901_v17 = vld [vmem:[%s3270_s18 + $0x150] sm:$0xff] }
  0x74   : > { %v585_v7 = vmul.f32 %v3697_v53, %v3265_v4  ;;  %v520_v42 = vadd.f32 %v488_v21, %v391_v44  ;;  %v683_v40 = vmul.f32 %v3781_v8, %v3272_v5  ;;  %v1161_v37 = vmul.f32 %v3315_v47, %v4961_v32 }
  0x75   : > { %3106 = vmatmul.msk.f32.gmra.mxu0 %vm1211_vm1, %v3715_v25  ;;  %v804_v25 = vadd.f32 %v772_v61, %v707_v36  ;;  %v1199_v41 = vadd.f32 %v1167_v49, %v1102_v43  ;;  %v811_v10 = vadd.f32 %v779_v62, %v714_v35  ;;  %v392_v1 = vmul.f32 %v3728_v19, %v3260_v2  ;;  %v3887_v62 = vld [vmem:[%s3270_s18 + $0x142] sm:$0xff] }
  0x76   : > { %v489_v39 = vmul.f32 %v3745_v48, %v3262_v3  ;;  %v1071_v52 = vmul.f32 %v3842_v24, %v3303_v34  ;;  %v617_v0 = vadd.f32 %v585_v7, %v520_v42  ;;  %v780_v60 = vmul.f32 %v3796_v26, %v3281_v13 }
  0x77   : > { %v901_v14 = vadd.f32 %v869_v28, %v804_v25  ;;  %3117 = vmatmul.msk.f32.gmra.mxu2 %vm1211_vm1, %v1199_v41  ;;  %v908_v53 = vadd.f32 %v876_v50, %v811_v10  ;;  %v899_v61 = vadd.f32 %v3742_v57, %v802_v31  ;;  %v586_v56 = vmul.f32 %v3753_v9, %v3265_v4 }
  0x78   : > { %v521_v48 = vadd.f32 %v489_v39, %v392_v1  ;;  %v1168_v29 = vmul.f32 %v3315_v47, %v3851_v55  ;;  %v715_v23 = vadd.f32 %v683_v40, %v617_v0  ;;  %v877_v63 = vmul.f32 %v3805_v20, %v3285_v16 }
  0x79   : > { %v999_v6 = vadd.f32 %v967_v33, %v901_v14  ;;  %v1006_v22 = vadd.f32 %v974_v27, %v908_v53  ;;  %v684_v31 = vmul.f32 %v3825_v46, %v3272_v5  ;;  %v975_v9 = vmul.f32 %v3866_v54, %v3298_v30 }
  0x7a   : > { %v618_v57 = vadd.f32 %v586_v56, %v521_v48  ;;  %v812_v18 = vadd.f32 %v780_v60, %v715_v23  ;;  %v997_v49 = vadd.f32 %v3761_v58, %v899_v61  ;;  %v1062_v45 = vmul.f32 %v3303_v34, %v3492_v11 }
  0x7b   : > { %v1096_v19 = vadd.f32 %v1064_v15, %v999_v6  ;;  %v1103_v28 = vadd.f32 %v1071_v52, %v1006_v22  ;;  %v781_v33 = vmul.f32 %v3842_v24, %v3281_v13  ;;  %v1159_v44 = vmul.f32 %v3315_v47, %v3495_v12 }
  0x7c   : > { %v716_v25 = vadd.f32 %v684_v31, %v618_v57  ;;  %v909_v43 = vadd.f32 %v877_v63, %v812_v18  ;;  %v878_v58 = vmul.f32 %v3851_v55, %v3285_v16  ;;  %v1169_v14 = vmul.f32 %v3315_v47, %v3887_v62  ;;  %v3912_v47 = vld [vmem:[%s3270_s18 + $0x151] sm:$0xff] }
  0x7d   : > { %3107 = vmatmul.msk.f32.gmra.mxu0 %vm1211_vm1, %v3721_v51  ;;  %v3874_v36 = vadd.f32 %v1161_v37, %v1096_v19  ;;  %v3877_v51 = vld [vmem:[%s3270_s18 + $0x141] sm:$0xff]  ;;  %v1200_v50 = vadd.f32 %v1168_v29, %v1103_v28  ;;  %v1094_v15 = vadd.f32 %v1062_v45, %v997_v49  ;;  %v3193_v27 = vmov 0.0   ;;  %v3927_v37 = vld [vmem:[%s3270_s18 + $0x152] sm:$0xff] }
  0x7e   : > { %v1072_v35 = vmul.f32 %v3877_v51, %v3303_v34  ;;  %v813_v21 = vadd.f32 %v781_v33, %v716_v25  ;;  %v1007_v11 = vadd.f32 %v975_v9, %v909_v43  ;;  %1534 = vst.msk [vmem:[#allocation2 + $0x18] sm:$0xff] %vm1529_vm2, %v3193_v27  ;;  %v976_v7 = vmul.f32 %v3901_v17, %v3298_v30  ;;  %v3965_v29 = vld [vmem:[%s3270_s18 + $0x158] sm:$0xff] }
  0x7f   : > { %3118 = vmatmul.msk.f32.gmra.mxu2 %vm1211_vm1, %v1200_v50  ;;  %1535 = vst.msk [vmem:[#allocation2 + $0x20] sm:$0xff] %vm1529_vm2, %v3193_v27  ;;  %v490_v10 = vmul.f32 %v3796_v26, %v3262_v3  ;;  %v1073_v6 = vmul.f32 %v3912_v47, %v3303_v34  ;;  %v1191_v32 = vadd.f32 %v1159_v44, %v1094_v15 }
  0x80   : > { %v910_v12 = vadd.f32 %v878_v58, %v813_v21  ;;  %v1104_v41 = vadd.f32 %v1072_v35, %v1007_v11  ;;  %1530 = vst.msk [vmem:[#allocation2] sm:$0xff] %vm1529_vm2, %v3193_v27  ;;  %v685_v39 = vmul.f32 %v3866_v54, %v3272_v5  ;;  %v782_v60 = vmul.f32 %v3877_v51, %v3281_v13  ;;  %v4011_v21 = vld [vmem:[%s3270_s18 + $0x168] sm:$0xff] }
  0x81   : > { %1531 = vst.msk [vmem:[#allocation2 + $0x8] sm:$0xff] %vm1529_vm2, %v3193_v27  ;;  %v879_v19 = vmul.f32 %v3887_v62, %v3285_v16  ;;  %v394_v48 = vmul.f32 %v3825_v46, %v3260_v2  ;;  %v491_v56 = vmul.f32 %v3842_v24, %v3262_v3  ;;  %v977_v63 = vmul.f32 %v3965_v29, %v3298_v30  ;;  %v3976_v24 = vld [vmem:[%s3270_s18 + $0x159] sm:$0xff] }
  0x82   : > { %v1201_v42 = vadd.f32 %v1169_v14, %v1104_v41  ;;  %v1008_v40 = vadd.f32 %v976_v7, %v910_v12  ;;  %1537 = vst.msk [vmem:[#allocation2 + $0x30] sm:$0xff] %vm1529_vm2, %v3193_v27  ;;  %v588_v46 = vmul.f32 %v3851_v55, %v3265_v4  ;;  %v1074_v28 = vmul.f32 %v3976_v24, %v3303_v34  ;;  %v3988_v55 = vld [vmem:[%s3270_s18 + $0x15a] sm:$0xff]  ;;  %v4022_v14 = vld [vmem:[%s3270_s18 + $0x169] sm:$0xff] }
  0x83   : > { %1538 = vst.msk [vmem:[#allocation2 + $0x38] sm:$0xff] %vm1529_vm2, %v3193_v27  ;;  %v523_v57 = vadd.f32 %v491_v56, %v394_v48  ;;  %v686_v9 = vmul.f32 %v3901_v17, %v3272_v5  ;;  %v783_v33 = vmul.f32 %v3912_v47, %v3281_v13  ;;  %v395_v50 = vmul.f32 %v3866_v54, %v3260_v2  ;;  %v4034_v41 = vld [vmem:[%s3270_s18 + $0x16a] sm:$0xff] }
  0x84   : > { %1540 = vst.msk [vmem:[#allocation2 + $0x48] sm:$0xff] %vm1529_vm2, %v3193_v27  ;;  %v1105_v53 = vadd.f32 %v1073_v6, %v1008_v40  ;;  %v492_v43 = vmul.f32 %v3877_v51, %v3262_v3  ;;  %v978_v58 = vmul.f32 %v4011_v21, %v3298_v30  ;;  %v589_v54 = vmul.f32 %v3887_v62, %v3265_v4  ;;  %v4049_v6 = vld [vmem:[%s4949_s3] ss:$0 sm:$0xff] }
  0x85   : > { %3108 = vmatmul.msk.f32.gmra.mxu0 %vm1211_vm1, %v3717_v38  ;;  %v393_v38 = vmul.f32 %v3781_v8, %v3260_v2  ;;  %v587_v8 = vmul.f32 %v3805_v20, %v3265_v4  ;;  %1541 = vst.msk [vmem:[#allocation2 + $0x50] sm:$0xff] %vm1529_vm2, %v3193_v27  ;;  %v3943_v20 = vld [vmem:[%s4947_s1 + $0x8] ss:$0 sm:$0xff]  ;;  %v620_v18 = vadd.f32 %v588_v46, %v523_v57 }
  0x86   : > { %v1170_v52 = vmul.f32 %v3943_v20, %v3927_v37  ;;  %1543 = vst.msk [vmem:[#allocation2 + $0x60] sm:$0xff] %vm1529_vm2, %v3193_v27  ;;  %v1171_v45 = vmul.f32 %v3943_v20, %v3988_v55  ;;  %v524_v11 = vadd.f32 %v492_v43, %v395_v50  ;;  %v1075_v15 = vmul.f32 %v4022_v14, %v3303_v34 }
  0x87   : > { %v522_v1 = vadd.f32 %v490_v10, %v393_v38  ;;  %3119 = vmatmul.msk.f32.gmra.mxu2 %vm1211_vm1, %v1201_v42  ;;  %1544 = vst.msk [vmem:[#allocation2 + $0x68] sm:$0xff] %vm1529_vm2, %v3193_v27  ;;  %v718_v25 = vadd.f32 %v686_v9, %v620_v18  ;;  %v687_v7 = vmul.f32 %v3965_v29, %v3272_v5 }
  0x88   : > { %1546 = vst.msk [vmem:[#allocation2 + $0x78] sm:$0xff] %vm1529_vm2, %v3193_v27  ;;  %v1202_v22 = vadd.f32 %v1170_v52, %v1105_v53  ;;  %v621_v12 = vadd.f32 %v589_v54, %v524_v11  ;;  %v1172_v38 = vmul.f32 %v3943_v20, %v4034_v41  ;;  %v784_v42 = vmul.f32 %v3976_v24, %v3281_v13  ;;  %v4067_v53 = vld [vmem:[%s4950_s4] ss:$0 sm:$0xff] }
  0x89   : > { %v619_v26 = vadd.f32 %v587_v8, %v522_v1  ;;  %1547 = vst.msk [vmem:[#allocation2 + $0x80] sm:$0xff] %vm1529_vm2, %v3193_v27  ;;  %v815_v44 = vadd.f32 %v783_v33, %v718_v25  ;;  %v396_v1 = vmul.f32 %v3901_v17, %v3260_v2  ;;  %v493_v8 = vmul.f32 %v3912_v47, %v3262_v3  ;;  %v4111_v33 = vld [vmem:[%s3270_s18 + $0x180] sm:$0xff] }
  0x8a   : > { %1549 = vst.msk [vmem:[#allocation2 + $0x90] sm:$0xff] %vm1529_vm2, %v3193_v27  ;;  %v719_v10 = vadd.f32 %v687_v7, %v621_v12  ;;  %v882_v9 = vmul.f32 %v4034_v41, %v3285_v16  ;;  %v980_v50 = vmul.f32 %v4111_v33, %v3298_v30  ;;  %v591_v43 = vmul.f32 %v3988_v55, %v3265_v4 }
  0x8b   : > { %v717_v0 = vadd.f32 %v685_v39, %v619_v26  ;;  %1550 = vst.msk [vmem:[#allocation2 + $0x98] sm:$0xff] %vm1529_vm2, %v3193_v27  ;;  %v4062_v39 = vld [vmem:[%s3270_s18 + $0x170] sm:$0xff]  ;;  %v525_v47 = vadd.f32 %v493_v8, %v396_v1 }
  0x8c   : > { %1552 = vst.msk [vmem:[#allocation2 + $0xa8] sm:$0xff] %vm1529_vm2, %v3193_v27  ;;  %v979_v17 = vmul.f32 %v4062_v39, %v3298_v30 }
  0x8d   : > { %3109 = vmatmul.msk.f32.gmra.mxu0 %vm1211_vm1, %v1191_v32  ;;  %v814_v61 = vadd.f32 %v782_v60, %v717_v0  ;;  %1553 = vst.msk [vmem:[#allocation2 + $0xb0] sm:$0xff] %vm1529_vm2, %v3193_v27  ;;  %v881_v32 = vmul.f32 %v3988_v55, %v3285_v16  ;;  %v590_v0 = vmul.f32 %v3927_v37, %v3265_v4 }
  0x8e   : > { %1555 = vst.msk [vmem:[#allocation2 + $0xc0] sm:$0xff] %vm1529_vm2, %v3193_v27 }
  0x8f   : > { %v911_v23 = vadd.f32 %v879_v19, %v814_v61  ;;  %3120 = vmatmul.msk.f32.gmra.mxu2 %vm1211_vm1, %v1202_v22  ;;  %1556 = vst.msk [vmem:[#allocation2 + $0xc8] sm:$0xff] %vm1529_vm2, %v3193_v27  ;;  %v4078_v61 = vld [vmem:[%s3270_s18 + $0x171] sm:$0xff]  ;;  %v622_v22 = vadd.f32 %v590_v0, %v525_v47  ;;  %v495_v47 = vmul.f32 %v4022_v14, %v3262_v3 }
  0x90   : > { %1558 = vst.msk [vmem:[#allocation2 + $0xd8] sm:$0xff] %vm1529_vm2, %v3193_v27  ;;  %v1076_v56 = vmul.f32 %v4078_v61, %v3303_v34 }
  0x91   : > { %v1009_v31 = vadd.f32 %v977_v63, %v911_v23  ;;  %1559 = vst.msk [vmem:[#allocation2 + $0xe0] sm:$0xff] %vm1529_vm2, %v3193_v27  ;;  %v688_v23 = vmul.f32 %v4011_v21, %v3272_v5 }
  0x92   : > { %1561 = vst.msk [vmem:[#allocation2 + $0xf0] sm:$0xff] %vm1529_vm2, %v3193_v27 }
  0x93   : > { %v1106_v49 = vadd.f32 %v1074_v28, %v1009_v31  ;;  %1562 = vst.msk [vmem:[#allocation2 + $0xf8] sm:$0xff] %vm1529_vm2, %v3193_v27  ;;  %v785_v31 = vmul.f32 %v4022_v14, %v3281_v13  ;;  %v720_v28 = vadd.f32 %v688_v23, %v622_v22 }
  0x94   : > { %1564 = vst.msk [vmem:[#allocation2 + $0x108] sm:$0xff] %vm1529_vm2, %v3193_v27 }
  0x95   : > { %3110 = vmatmul.msk.f32.gmra.mxu0 %vm1211_vm1, %v3827_v59  ;;  %v880_v59 = vmul.f32 %v3927_v37, %v3285_v16  ;;  %v1203_v35 = vadd.f32 %v1171_v45, %v1106_v49  ;;  %1565 = vst.msk [vmem:[#allocation2 + $0x110] sm:$0xff] %vm1529_vm2, %v3193_v27  ;;  %v4089_v37 = vld [vmem:[%s3270_s18 + $0x172] sm:$0xff]  ;;  %v397_v49 = vmul.f32 %v3965_v29, %v3260_v2  ;;  %v4121_v29 = vld [vmem:[%s4951_s5] sm:$0xff] }
  0x96   : > { %1567 = vst.msk [vmem:[#allocation2 + $0x120] sm:$0xff] %vm1529_vm2, %v3193_v27  ;;  %v1173_v46 = vmul.f32 %v3943_v20, %v4089_v37  ;;  %v817_v25 = vadd.f32 %v785_v31, %v720_v28  ;;  %v4144_v12 = vperm.slane %v4121_v29, 0  ;;  %v592_v28 = vmul.f32 %v4034_v41, %v3265_v4  ;;  %v3092_v41 = vld [vmem:[%s3270_s18 + $0x18a] sm:$0xff] }
  0x97   : > { %v912_v51 = vadd.f32 %v880_v59, %v815_v44  ;;  %3121 = vmatmul.msk.f32.gmra.mxu2 %vm1211_vm1, %v1203_v35  ;;  %1568 = vst.msk [vmem:[#allocation2 + $0x128] sm:$0xff] %vm1529_vm2, %v3193_v27  ;;  %v494_v59 = vmul.f32 %v3976_v24, %v3262_v3  ;;  %v4128_v24 = vld [vmem:[%s3270_s18 + $0x181] sm:$0xff] }
  0x98   : > { %1570 = vst.msk [vmem:[#allocation2 + $0x138] sm:$0xff] %vm1529_vm2, %v3193_v27  ;;  %v914_v44 = vadd.f32 %v882_v9, %v817_v25  ;;  %v1077_v54 = vmul.f32 %v4128_v24, %v3303_v34  ;;  %v1814_v9 = vld [vmem:[#allocation2 + $0x2] sm:$0xff] }
  0x99   : > { %v1010_v62 = vadd.f32 %v978_v58, %v912_v51  ;;  %1571 = vst.msk [vmem:[#allocation2 + $0x140] sm:$0xff] %vm1529_vm2, %v3193_v27  ;;  %v526_v58 = vadd.f32 %v494_v59, %v397_v49  ;;  %v689_v51 = vmul.f32 %v4062_v39, %v3272_v5 }
  0x9a   : > { %1573 = vst.msk [vmem:[#allocation2 + $0x150] sm:$0xff] %vm1529_vm2, %v3193_v27  ;;  %v1012_v55 = vadd.f32 %v980_v50, %v914_v44 }
  0x9b   : > { %v1107_v40 = vadd.f32 %v1075_v15, %v1010_v62  ;;  %1574 = vst.msk [vmem:[#allocation2 + $0x158] sm:$0xff] %vm1529_vm2, %v3193_v27  ;;  %v4141_v15 = vld [vmem:[%s3270_s18 + $0x182] sm:$0xff]  ;;  %v623_v7 = vadd.f32 %v591_v43, %v526_v58  ;;  %v1175_v58 = vmul.f32 %v3943_v20, %v3092_v41 }
  0x9c   : > { %1576 = vst.msk [vmem:[#allocation2 + $0x168] sm:$0xff] %vm1529_vm2, %v3193_v27 }
  0x9d   : > { %3111 = vmatmul.msk.f32.gmra.mxu0 %vm1211_vm1, %v3874_v36  ;;  %v816_v36 = vadd.f32 %v784_v42, %v719_v10  ;;  %v1204_v26 = vadd.f32 %v1172_v38, %v1107_v40  ;;  %1577 = vst.msk [vmem:[#allocation2 + $0x170] sm:$0xff] %vm1529_vm2, %v3193_v27  ;;  %v1174_v38 = vmul.f32 %v3943_v20, %v4141_v15  ;;  %v4152_v10 = vperm.slane %v4121_v29, 1 }
  0x9e   : > { %1579 = vst.msk [vmem:[#allocation2 + $0x180] sm:$0xff] %vm1529_vm2, %v3193_v27  ;;  %v786_v42 = vmul.f32 %v4078_v61, %v3281_v13  ;;  %v1109_v40 = vadd.f32 %v1077_v54, %v1012_v55  ;;  %v721_v1 = vadd.f32 %v689_v51, %v623_v7  ;;  %v690_v51 = vmul.f32 %v4111_v33, %v3272_v5 }
  0x9f   : > { %v913_v52 = vadd.f32 %v881_v32, %v816_v36  ;;  %3122 = vmatmul.msk.f32.gmra.mxu2 %vm1211_vm1, %v1204_v26  ;;  %1580 = vst.msk [vmem:[#allocation2 + $0x188] sm:$0xff] %vm1529_vm2, %v3193_v27  ;;  %v1620_v36 = vld [vmem:[#allocation2] sm:$0xff]  ;;  %v787_v55 = vmul.f32 %v4128_v24, %v3281_v13  ;;  %v4214_v7 = vperm.slane %v4121_v29, 3 }
  0xa0   : > { %1582 = vst.msk [vmem:[#allocation2 + $0x198] sm:$0xff] %vm1529_vm2, %v3193_v27  ;;  %v1717_v32 = vld [vmem:[#allocation2 + $0x1] sm:$0xff]  ;;  %v1206_v0 = vadd.f32 %v1174_v38, %v1109_v40 }
  0xa1   : > { %v1011_v48 = vadd.f32 %v979_v17, %v913_v52  ;;  %1583 = vst.msk [vmem:[#allocation2 + $0x1a0] sm:$0xff] %vm1529_vm2, %v3193_v27  ;;  %v2494_v26 = vld [vmem:[%s4952_s6] sm:$0xff]  ;;  %v883_v52 = vmul.f32 %v4089_v37, %v3285_v16  ;;  %v398_v17 = vmul.f32 %v4011_v21, %v3260_v2  ;;  %v1750_v21 = vmul.f32 %v4152_v10, %v1717_v32 }
  0xa2   : > { %v1329_v60 = vpop.f32.mrf.mxu0  ;;  %1536 = vst.msk [vmem:[#allocation2 + $0x28] sm:$0x3] %vm1532_vm3, %v3193_v27  ;;  %2606 = vmatpush.msra.mxu1 %v2494_v26  ;;  %3164 = vmatpush.msra.mxu3 %v2494_v26  ;;  %v399_v32 = vmul.f32 %v4062_v39, %v3260_v2 }
  0xa3   : > { %v1429_v19 = vmul.f32 %v4049_v6, %v1329_v60  ;;  %v1108_v57 = vadd.f32 %v1076_v56, %v1011_v48  ;;  %1533 = vst.msk [vmem:[#allocation2 + $0x10] sm:$0x3] %vm1532_vm3, %v3193_v27  ;;  %v818_v60 = vadd.f32 %v786_v42, %v721_v1  ;;  %v1621_v48 = vld [vmem:[#allocation2 + $0x8] sm:$0xff]  ;;  %v1653_v56 = vmul.f32 %v4144_v12, %v1620_v36 }
  0xa4   : > { %1539 = vst.msk [vmem:[#allocation2 + $0x40] sm:$0x3] %vm1532_vm3, %v3193_v27  ;;  %v527_v22 = vadd.f32 %v495_v47, %v398_v17  ;;  %v884_v42 = vmul.f32 %v4141_v15, %v3285_v16  ;;  %v496_v1 = vmul.f32 %v4078_v61, %v3262_v3  ;;  %v3029_v15 = vld [vmem:[%s3270_s18 + $0x198] sm:$0xff] }
  0xa5   : > { %v1465_v63 = vadd.f32 %v4067_v53, %v1429_v19  ;;  %v1205_v45 = vadd.f32 %v1173_v46, %v1108_v57  ;;  %1542 = vst.msk [vmem:[#allocation2 + $0x58] sm:$0x3] %vm1532_vm3, %v3193_v27  ;;  %v4172_v19 = vld [vmem:[%s3270_s18 + $0x188] sm:$0xff]  ;;  %v915_v57 = vadd.f32 %v883_v52, %v818_v60  ;;  %v1782_v44 = vadd.f32 %v1750_v21, %v1653_v56  ;;  %v3093_v21 = vld [vmem:[%s3270_s18 + $0x19a] sm:$0xff] }
  0xa6   : > { %1545 = vst.msk [vmem:[#allocation2 + $0x70] sm:$0x3] %vm1532_vm3, %v3193_v27  ;;  %v981_v14 = vmul.f32 %v4172_v19, %v3298_v30  ;;  %v4185_v46 = vld [vmem:[%s3270_s18 + $0x189] sm:$0xff]  ;;  %v624_v43 = vadd.f32 %v592_v28, %v527_v22  ;;  %v982_v47 = vmul.f32 %v3029_v15, %v3298_v30  ;;  %v528_v60 = vadd.f32 %v496_v1, %v399_v32 }
  0xa7   : > { %v1497_v18 = vmax.f32 %v1465_v63, 0.0  ;;  %3123 = vmatmul.msk.f32.gmra.mxu2 %vm1211_vm1, %v1205_v45  ;;  %1548 = vst.msk [vmem:[#allocation2 + $0x88] sm:$0x3] %vm1532_vm3, %v3193_v27  ;;  %v4182_v63 = vperm.slane %v4121_v29, 2  ;;  %v1078_v49 = vmul.f32 %v4185_v46, %v3303_v34  ;;  %v1654_v45 = vmul.f32 %v4144_v12, %v1621_v48 }
  0xa8   : > { %1551 = vst.msk [vmem:[#allocation2 + $0xa0] sm:$0x3] %vm1532_vm3, %v3193_v27  ;;  %v1013_v59 = vadd.f32 %v981_v14, %v915_v57  ;;  %v722_v24 = vadd.f32 %v690_v51, %v624_v43  ;;  %v593_v14 = vmul.f32 %v4089_v37, %v3265_v4  ;;  %v4253_v57 = vperm.slane %v4121_v29, 5 }
  0xa9   : > { %1586 = vst.msk [vmem:[#allocation2 + $0x19] sm:$0xff] %vm1529_vm2, %v1497_v18  ;;  %v788_v37 = vmul.f32 %v4185_v46, %v3281_v13 }
  0xaa   : > { %v1332_v35 = vpop.f32.mrf.mxu0  ;;  %1554 = vst.msk [vmem:[#allocation2 + $0xb8] sm:$0x3] %vm1532_vm3, %v3193_v27  ;;  %v1718_v31 = vld [vmem:[#allocation2 + $0x9] sm:$0xff]  ;;  %v1110_v54 = vadd.f32 %v1078_v49, %v1013_v59  ;;  %v819_v17 = vadd.f32 %v787_v55, %v722_v24  ;;  %v625_v4 = vadd.f32 %v593_v14, %v528_v60 }
  0xab   : > { %v1430_v11 = vmul.f32 %v4049_v6, %v1332_v35  ;;  %1557 = vst.msk [vmem:[#allocation2 + $0xd0] sm:$0x3] %vm1532_vm3, %v3193_v27  ;;  %v1751_v25 = vmul.f32 %v4152_v10, %v1718_v31  ;;  %v1815_v50 = vld [vmem:[#allocation2 + $0xa] sm:$0xff] }
  0xac   : > { %1560 = vst.msk [vmem:[#allocation2 + $0xe8] sm:$0x3] %vm1532_vm3, %v3193_v27  ;;  %v1848_v38 = vmul.f32 %v4182_v63, %v1815_v50  ;;  %v1207_v40 = vadd.f32 %v1175_v58, %v1110_v54  ;;  %v916_v48 = vadd.f32 %v884_v42, %v819_v17  ;;  %v3030_v58 = vld [vmem:[%s3270_s18 + $0x1a0] sm:$0xff] }
  0xad   : > { %v1466_v62 = vadd.f32 %v4067_v53, %v1430_v11  ;;  %1563 = vst.msk [vmem:[#allocation2 + $0x100] sm:$0x3] %vm1532_vm3, %v3193_v27  ;;  %v1847_v11 = vmul.f32 %v4182_v63, %v1814_v9  ;;  %v1176_v9 = vmul.f32 %v3943_v20, %v3093_v21  ;;  %v983_v55 = vmul.f32 %v3030_v58, %v3298_v30  ;;  %v3062_v42 = vld [vmem:[%s3270_s18 + $0x1a1] sm:$0xff] }
  0xae   : > { %1566 = vst.msk [vmem:[#allocation2 + $0x118] sm:$0x3] %vm1532_vm3, %v3193_v27  ;;  %v3094_v17 = vld [vmem:[%s3270_s18 + $0x1a2] sm:$0xff] }
  0xaf   : > { %v1498_v8 = vmax.f32 %v1466_v62, 0.0  ;;  %3124 = vmatmul.msk.f32.gmra.mxu2 %vm1211_vm1, %v1206_v0  ;;  %1569 = vst.msk [vmem:[#allocation2 + $0x130] sm:$0x3] %vm1532_vm3, %v3193_v27  ;;  %v1783_v62 = vadd.f32 %v1751_v25, %v1654_v45  ;;  %v1879_v52 = vadd.f32 %v1847_v11, %v1782_v44  ;;  %v3061_v0 = vld [vmem:[%s3270_s18 + $0x199] sm:$0xff]  ;;  %v4265_v44 = vperm.slane %v4121_v29, 6 }
  0xb0   : > { %1572 = vst.msk [vmem:[#allocation2 + $0x148] sm:$0x3] %vm1532_vm3, %v3193_v27  ;;  %v1911_v33 = vld [vmem:[#allocation2 + $0x18] sm:$0xff]  ;;  %v1079_v56 = vmul.f32 %v3061_v0, %v3303_v34  ;;  %v1177_v0 = vmul.f32 %v3943_v20, %v3094_v17 }
  0xb1   : > { %1587 = vst.msk [vmem:[#allocation2 + $0x21] sm:$0xff] %vm1529_vm2, %v1498_v8  ;;  %v1944_v3 = vmul.f32 %v4214_v7, %v1911_v33  ;;  %v1880_v39 = vadd.f32 %v1848_v38, %v1783_v62  ;;  %v2008_v31 = vld [vmem:[#allocation2 + $0x19] sm:$0xff]  ;;  %v4272_v62 = vperm.slane %v4121_v29, 7  ;;  %v1655_v38 = vmul.f32 %v1911_v33, %v4144_v12  ;;  %v4289_v33 = vld [vmem:[%s4951_s5 + $0x8] ss:$0 sm:$0xff] }
  0xb2   : > { %v1335_v23 = vpop.f32.mrf.mxu0  ;;  %1575 = vst.msk [vmem:[#allocation2 + $0x160] sm:$0x3] %vm1532_vm3, %v3193_v27  ;;  %v1752_v1 = vmul.f32 %v2008_v31, %v4152_v10 }
  0xb3   : > { %v1431_v18 = vmul.f32 %v4049_v6, %v1335_v23  ;;  %1578 = vst.msk [vmem:[#allocation2 + $0x178] sm:$0x3] %vm1532_vm3, %v3193_v27  ;;  %v4250_v23 = vperm.slane %v4121_v29, 4  ;;  %v1976_v45 = vadd.f32 %v1944_v3, %v1879_v52 }
  0xb4   : > { %1581 = vst.msk [vmem:[#allocation2 + $0x190] sm:$0x3] %vm1532_vm3, %v3193_v27  ;;  %v1784_v14 = vadd.f32 %v1752_v1, %v1655_v38 }
  0xb5   : > { %v1467_v35 = vadd.f32 %v4067_v53, %v1431_v18  ;;  %1584 = vst.msk [vmem:[#allocation2 + $0x1a8] sm:$0x3] %vm1532_vm3, %v3193_v27  ;;  %v691_v27 = vmul.f32 %v4172_v19, %v3272_v5  ;;  %v1014_v18 = vadd.f32 %v982_v47, %v916_v48  ;;  %v2041_v5 = vmul.f32 %v4250_v23, %v2008_v31 }
  0xb7   : > { %v1499_v8 = vmax.f32 %v1467_v35, 0.0  ;;  %3125 = vmatmul.msk.f32.gmra.mxu2 %vm1211_vm1, %v1207_v40  ;;  %v1111_v50 = vadd.f32 %v1079_v56, %v1014_v18  ;;  %v723_v43 = vadd.f32 %v691_v27, %v625_v4  ;;  %v885_v35 = vmul.f32 %v3092_v41, %v3285_v16 }
  0xb8   : > { %v4221_v36 = vld [vmem:[#allocation2 + $0x20] sm:$0xff]  ;;  %v2073_v41 = vadd.f32 %v2041_v5, %v1976_v45 }
  0xb9   : > { %v1945_v61 = vmul.f32 %v4214_v7, %v4221_v36  ;;  %1588 = vst.msk [vmem:[#allocation2 + $0x31] sm:$0xff] %vm1529_vm2, %v1499_v8  ;;  %v2105_v28 = vld [vmem:[#allocation2 + $0x1a] sm:$0xff]  ;;  %v2106_v11 = vld [vmem:[#allocation2 + $0x22] sm:$0xff]  ;;  %v1208_v54 = vadd.f32 %v1176_v9, %v1111_v50  ;;  %v820_v51 = vadd.f32 %v788_v37, %v723_v43  ;;  %v1080_v8 = vmul.f32 %v3062_v42, %v3303_v34 }
  0xba   : > { %v1338_v26 = vpop.f32.mrf.mxu0  ;;  %v2009_v25 = vld [vmem:[#allocation2 + $0x21] sm:$0xff]  ;;  %v2138_v19 = vmul.f32 %v4253_v57, %v2105_v28  ;;  %v2139_v52 = vmul.f32 %v4253_v57, %v2106_v11  ;;  %v1656_v34 = vmul.f32 %v4221_v36, %v4144_v12 }
  0xbb   : > { %v1432_v2 = vmul.f32 %v4049_v6, %v1338_v26  ;;  %v1977_v59 = vadd.f32 %v1945_v61, %v1880_v39  ;;  %v2042_v46 = vmul.f32 %v4250_v23, %v2009_v25  ;;  %v917_v30 = vadd.f32 %v885_v35, %v820_v51 }
  0xbc   : > { %v2170_v26 = vadd.f32 %v2138_v19, %v2073_v41  ;;  %v1753_v60 = vmul.f32 %v2009_v25, %v4152_v10  ;;  %v1849_v61 = vmul.f32 %v2105_v28, %v4182_v63 }
  0xbd   : > { %v1468_v22 = vadd.f32 %v4067_v53, %v1432_v2  ;;  %v2074_v32 = vadd.f32 %v2042_v46, %v1977_v59  ;;  %v1015_v47 = vadd.f32 %v983_v55, %v917_v30  ;;  %v1850_v59 = vmul.f32 %v2106_v11, %v4182_v63 }
  0xbe   : > { %v1785_v37 = vadd.f32 %v1753_v60, %v1656_v34  ;;  %v1881_v25 = vadd.f32 %v1849_v61, %v1784_v14 }
  0xbf   : > { %v1500_v49 = vmax.f32 %v1468_v22, 0.0  ;;  %3126 = vmatmul.msk.f32.gmra.mxu2 %vm1211_vm1, %v1208_v54  ;;  %v2171_v56 = vadd.f32 %v2139_v52, %v2074_v32  ;;  %v1112_v22 = vadd.f32 %v1080_v8, %v1015_v47 }
  0xc0   : > { %v4276_v40 = vld [vmem:[#allocation2 + $0x30] sm:$0xff]  ;;  %v1882_v58 = vadd.f32 %v1850_v59, %v1785_v37 }
  0xc1   : > { %1589 = vst.msk [vmem:[#allocation2 + $0x39] sm:$0xff] %vm1529_vm2, %v1500_v49  ;;  %v4278_v24 = vld [vmem:[#allocation2 + $0x31] sm:$0xff]  ;;  %v2236_v29 = vmul.f32 %v4265_v44, %v4276_v40  ;;  %v1946_v31 = vmul.f32 %v4276_v40, %v4214_v7  ;;  %v1209_v4 = vadd.f32 %v1177_v0, %v1112_v22  ;;  %v1657_v17 = vmul.f32 %v4276_v40, %v4144_v12 }
  0xc2   : > { %v1341_v13 = vpop.f32.mrf.mxu0  ;;  %v2333_v39 = vmul.f32 %v4272_v62, %v4278_v24  ;;  %v2043_v54 = vmul.f32 %v4278_v24, %v4250_v23  ;;  %v1754_v47 = vmul.f32 %v4278_v24, %v4152_v10 }
  0xc3   : > { %v1433_v16 = vmul.f32 %v4049_v6, %v1341_v13  ;;  %v2268_v3 = vadd.f32 %v2236_v29, %v2170_v26  ;;  %v1978_v5 = vadd.f32 %v1946_v31, %v1881_v25 }
  0xc5   : > { %v1469_v15 = vadd.f32 %v4067_v53, %v1433_v16  ;;  %v2365_v20 = vadd.f32 %v2333_v39, %v2268_v3  ;;  %v2075_v41 = vadd.f32 %v2043_v54, %v1978_v5 }
  0xc7   : > { %v1501_v2 = vmax.f32 %v1469_v15, 0.0  ;;  %3127 = vmatmul.msk.f32.gmra.mxu2 %vm1211_vm1, %v1209_v4 }
  0xc8   : > { %v2397_v48 = vld [vmem:[#allocation2 + $0x32] sm:$0xff]  ;;  %v2398_v19 = vld [vmem:[#allocation2 + $0x3a] sm:$0xff] }
  0xc9   : > { %v2204_v21 = vld [vmem:[#allocation2 + $0x38] sm:$0xff]  ;;  %1590 = vst.msk [vmem:[#allocation2 + $0x49] sm:$0xff] %vm1529_vm2, %v1501_v2  ;;  %v2430_v27 = vmul.f32 %v4289_v33, %v2397_v48  ;;  %v2140_v51 = vmul.f32 %v2397_v48, %v4253_v57  ;;  %v2431_v16 = vmul.f32 %v4289_v33, %v2398_v19  ;;  %v2141_v2 = vmul.f32 %v2398_v19, %v4253_v57 }
  0xca   : > { %v2237_v36 = vmul.f32 %v4265_v44, %v2204_v21  ;;  %v1344_v18 = vpop.f32.mrf.mxu0  ;;  %v2301_v9 = vld [vmem:[#allocation2 + $0x39] sm:$0xff]  ;;  %v1947_v50 = vmul.f32 %v2204_v21, %v4214_v7  ;;  %v1658_v3 = vmul.f32 %v2204_v21, %v4144_v12  ;;  %v1852_v25 = vmul.f32 %v2398_v19, %v4182_v63 }
  0xcb   : > { %v1434_v28 = vmul.f32 %v4049_v6, %v1344_v18  ;;  %v2462_v49 = vadd.f32 %v2430_v27, %v2365_v20  ;;  %v2334_v35 = vmul.f32 %v4272_v62, %v2301_v9  ;;  %v2044_v32 = vmul.f32 %v2301_v9, %v4250_v23 }
  0xcc   : > { %v2269_v45 = vadd.f32 %v2237_v36, %v2171_v56  ;;  %v1979_v11 = vadd.f32 %v1947_v50, %v1882_v58  ;;  %v2172_v15 = vadd.f32 %v2140_v51, %v2075_v41  ;;  %v1755_v39 = vmul.f32 %v2301_v9, %v4152_v10 }
  0xcd   : > { %v1470_v43 = vadd.f32 %v4067_v53, %v1434_v28  ;;  %3128 = vmatmul.msk.f32.vlgmr.msra.gmra.mxu1 %vm1529_vm2, %v2462_v49  ;;  %v1851_v56 = vmul.f32 %v2397_v48, %v4182_v63  ;;  %v1786_v27 = vadd.f32 %v1754_v47, %v1657_v17 }
  0xce   : > { %v2366_v46 = vadd.f32 %v2334_v35, %v2269_v45  ;;  %v1377_v1 = vpop.f32.mrf.mxu2  ;;  %v2076_v52 = vadd.f32 %v2044_v32, %v1979_v11  ;;  %v1787_v48 = vadd.f32 %v1755_v39, %v1658_v3 }
  0xcf   : > { %v1502_v13 = vmax.f32 %v1470_v43, 0.0  ;;  %v1445_v26 = vmul.f32 %v4049_v6, %v1377_v1  ;;  %v1883_v45 = vadd.f32 %v1851_v56, %v1786_v27 }
  0xd0   : > { %v4315_v55 = vld [vmem:[#allocation2 + $0x48] sm:$0xff]  ;;  %v2463_v8 = vadd.f32 %v2431_v16, %v2366_v46  ;;  %v2173_v22 = vadd.f32 %v2141_v2, %v2076_v52 }
  0xd1   : > { %1591 = vst.msk [vmem:[#allocation2 + $0x51] sm:$0xff] %vm1529_vm2, %v1502_v13  ;;  %v2238_v38 = vmul.f32 %v4265_v44, %v4315_v55  ;;  %v4324_v29 = vld [vmem:[#allocation2 + $0x49] sm:$0xff]  ;;  %v1481_v60 = vadd.f32 %v4067_v53, %v1445_v26  ;;  %v1948_v18 = vmul.f32 %v4315_v55, %v4214_v7  ;;  %v1884_v13 = vadd.f32 %v1852_v25, %v1787_v48 }
  0xd2   : > { %v1347_v42 = vpop.f32.mrf.mxu0  ;;  %v2335_v40 = vmul.f32 %v4272_v62, %v4324_v29  ;;  %v2045_v11 = vmul.f32 %v4324_v29, %v4250_v23 }
  0xd3   : > { %v1435_v30 = vmul.f32 %v4049_v6, %v1347_v42  ;;  %v2270_v34 = vadd.f32 %v2238_v38, %v2172_v15  ;;  %v1513_v24 = vmax.f32 %v1481_v60, 0.0  ;;  %v1980_v35 = vadd.f32 %v1948_v18, %v1883_v45 }
  0xd4   : > { %v1756_v60 = vmul.f32 %v4324_v29, %v4152_v10 }
  0xd5   : > { %v1471_v0 = vadd.f32 %v4067_v53, %v1435_v30  ;;  %3129 = vmatmul.msk.f32.gmra.mxu1 %vm1529_vm2, %v2463_v8  ;;  %v2367_v36 = vadd.f32 %v2335_v40, %v2270_v34  ;;  %1602 = vst.msk [vmem:[#allocation2 + $0xd9] sm:$0xff] %vm1529_vm2, %v1513_v24  ;;  %v2077_v32 = vadd.f32 %v2045_v11, %v1980_v35 }
  0xd6   : > { %v1380_v5 = vpop.f32.mrf.mxu2  ;;  %v1659_v34 = vmul.f32 %v4315_v55, %v4144_v12 }
  0xd7   : > { %v1503_v61 = vmax.f32 %v1471_v0, 0.0  ;;  %v1446_v46 = vmul.f32 %v4049_v6, %v1380_v5 }
  0xd8   : > { %v2399_v14 = vld [vmem:[#allocation2 + $0x4a] sm:$0xff]  ;;  %v2400_v58 = vld [vmem:[#allocation2 + $0x52] sm:$0xff] }
  0xd9   : > { %v2206_v20 = vld [vmem:[#allocation2 + $0x50] sm:$0xff]  ;;  %1592 = vst.msk [vmem:[#allocation2 + $0x61] sm:$0xff] %vm1529_vm2, %v1503_v61  ;;  %v2432_v31 = vmul.f32 %v4289_v33, %v2399_v14  ;;  %v2142_v19 = vmul.f32 %v2399_v14, %v4253_v57  ;;  %v1482_v38 = vadd.f32 %v4067_v53, %v1446_v46  ;;  %v2433_v42 = vmul.f32 %v4289_v33, %v2400_v58 }
  0xda   : > { %v2239_v21 = vmul.f32 %v4265_v44, %v2206_v20  ;;  %v1350_v9 = vpop.f32.mrf.mxu0  ;;  %v2303_v4 = vld [vmem:[#allocation2 + $0x51] sm:$0xff]  ;;  %v1949_v59 = vmul.f32 %v2206_v20, %v4214_v7  ;;  %v2143_v61 = vmul.f32 %v2400_v58, %v4253_v57  ;;  %v1660_v56 = vmul.f32 %v2206_v20, %v4144_v12 }
  0xdb   : > { %v1436_v37 = vmul.f32 %v4049_v6, %v1350_v9  ;;  %v2464_v28 = vadd.f32 %v2432_v31, %v2367_v36  ;;  %v2336_v43 = vmul.f32 %v4272_v62, %v2303_v4  ;;  %v2046_v8 = vmul.f32 %v2303_v4, %v4250_v23 }
  0xdc   : > { %v2271_v49 = vadd.f32 %v2239_v21, %v2173_v22  ;;  %v1981_v41 = vadd.f32 %v1949_v59, %v1884_v13  ;;  %v1514_v15 = vmax.f32 %v1482_v38, 0.0  ;;  %v2174_v17 = vadd.f32 %v2142_v19, %v2077_v32 }
  0xdd   : > { %v1472_v50 = vadd.f32 %v4067_v53, %v1436_v37  ;;  %3130 = vmatmul.msk.f32.gmra.mxu1 %vm1529_vm2, %v2464_v28  ;;  %v1757_v24 = vmul.f32 %v2303_v4, %v4152_v10  ;;  %v1853_v29 = vmul.f32 %v2399_v14, %v4182_v63  ;;  %v1788_v21 = vadd.f32 %v1756_v60, %v1659_v34 }
  0xde   : > { %v2368_v51 = vadd.f32 %v2336_v43, %v2271_v49  ;;  %v2078_v0 = vadd.f32 %v2046_v8, %v1981_v41  ;;  %1603 = vst.msk [vmem:[#allocation2 + $0xe1] sm:$0xff] %vm1529_vm2, %v1514_v15  ;;  %v1854_v43 = vmul.f32 %v2400_v58, %v4182_v63 }
  0xdf   : > { %v1504_v54 = vmax.f32 %v1472_v50, 0.0  ;;  %v1789_v14 = vadd.f32 %v1757_v24, %v1660_v56  ;;  %v1885_v50 = vadd.f32 %v1853_v29, %v1788_v21 }
  0xe0   : > { %v4355_v16 = vld [vmem:[#allocation2 + $0x60] sm:$0xff]  ;;  %v2465_v52 = vadd.f32 %v2433_v42, %v2368_v51  ;;  %v2175_v36 = vadd.f32 %v2143_v61, %v2078_v0 }
  0xe1   : > { %1593 = vst.msk [vmem:[#allocation2 + $0x69] sm:$0xff] %vm1529_vm2, %v1504_v54  ;;  %v2240_v1 = vmul.f32 %v4265_v44, %v4355_v16  ;;  %v4364_v47 = vld [vmem:[#allocation2 + $0x61] sm:$0xff]  ;;  %v1950_v4 = vmul.f32 %v4355_v16, %v4214_v7  ;;  %v1886_v11 = vadd.f32 %v1854_v43, %v1789_v14  ;;  %v1661_v61 = vmul.f32 %v4355_v16, %v4144_v12 }
  0xe2   : > { %v1353_v30 = vpop.f32.mrf.mxu0  ;;  %v1383_v39 = vpop.f32.mrf.mxu2  ;;  %v2337_v55 = vmul.f32 %v4272_v62, %v4364_v47  ;;  %v2047_v42 = vmul.f32 %v4364_v47, %v4250_v23 }
  0xe3   : > { %v1437_v26 = vmul.f32 %v4049_v6, %v1353_v30  ;;  %v2272_v3 = vadd.f32 %v2240_v1, %v2174_v17  ;;  %v1447_v40 = vmul.f32 %v4049_v6, %v1383_v39  ;;  %v1982_v46 = vadd.f32 %v1950_v4, %v1885_v50 }
  0xe5   : > { %v1473_v2 = vadd.f32 %v4067_v53, %v1437_v26  ;;  %3131 = vmatmul.msk.f32.gmra.mxu1 %vm1529_vm2, %v2465_v52  ;;  %v1483_v18 = vadd.f32 %v4067_v53, %v1447_v40  ;;  %v2369_v9 = vadd.f32 %v2337_v55, %v2272_v3  ;;  %v2079_v15 = vadd.f32 %v2047_v42, %v1982_v46 }
  0xe6   : > { %v1758_v40 = vmul.f32 %v4364_v47, %v4152_v10 }
  0xe7   : > { %v1505_v22 = vmax.f32 %v1473_v2, 0.0  ;;  %v1515_v49 = vmax.f32 %v1483_v18, 0.0 }
  0xe8   : > { %v2401_v27 = vld [vmem:[#allocation2 + $0x62] sm:$0xff]  ;;  %v2402_v51 = vld [vmem:[#allocation2 + $0x6a] sm:$0xff] }
  0xe9   : > { %v2208_v31 = vld [vmem:[#allocation2 + $0x68] sm:$0xff]  ;;  %1594 = vst.msk [vmem:[#allocation2 + $0x79] sm:$0xff] %vm1529_vm2, %v1505_v22  ;;  %v2434_v48 = vmul.f32 %v4289_v33, %v2401_v27  ;;  %v2144_v58 = vmul.f32 %v2401_v27, %v4253_v57  ;;  %v2435_v8 = vmul.f32 %v4289_v33, %v2402_v51  ;;  %v2145_v22 = vmul.f32 %v2402_v51, %v4253_v57 }
  0xea   : > { %v2241_v20 = vmul.f32 %v4265_v44, %v2208_v31  ;;  %v1356_v37 = vpop.f32.mrf.mxu0  ;;  %v2305_v28 = vld [vmem:[#allocation2 + $0x69] sm:$0xff]  ;;  %1604 = vst.msk [vmem:[#allocation2 + $0xf1] sm:$0xff] %vm1529_vm2, %v1515_v49  ;;  %v1951_v35 = vmul.f32 %v2208_v31, %v4214_v7  ;;  %v1386_v54 = vpop.f32.mrf.mxu2  ;;  %v1662_v55 = vmul.f32 %v2208_v31, %v4144_v12  ;;  %v1855_v16 = vmul.f32 %v2401_v27, %v4182_v63 }
  0xeb   : > { %v1438_v45 = vmul.f32 %v4049_v6, %v1356_v37  ;;  %v2466_v25 = vadd.f32 %v2434_v48, %v2369_v9  ;;  %v2338_v13 = vmul.f32 %v4272_v62, %v2305_v28  ;;  %v1448_v19 = vmul.f32 %v4049_v6, %v1386_v54 }
  0xec   : > { %v2273_v59 = vadd.f32 %v2241_v20, %v2175_v36  ;;  %v1983_v1 = vadd.f32 %v1951_v35, %v1886_v11  ;;  %v2048_v17 = vmul.f32 %v2305_v28, %v4250_v23  ;;  %v2176_v2 = vadd.f32 %v2144_v58, %v2079_v15 }
  0xed   : > { %v1474_v5 = vadd.f32 %v4067_v53, %v1438_v45  ;;  %3132 = vmatmul.msk.f32.gmra.mxu1 %vm1529_vm2, %v2466_v25  ;;  %v1484_v30 = vadd.f32 %v4067_v53, %v1448_v19  ;;  %v1759_v29 = vmul.f32 %v2305_v28, %v4152_v10  ;;  %v1790_v20 = vadd.f32 %v1758_v40, %v1661_v61 }
  0xee   : > { %v2370_v38 = vadd.f32 %v2338_v13, %v2273_v59  ;;  %v2080_v39 = vadd.f32 %v2048_v17, %v1983_v1  ;;  %v1856_v13 = vmul.f32 %v2402_v51, %v4182_v63 }
  0xef   : > { %v1506_v41 = vmax.f32 %v1474_v5, 0.0  ;;  %v1516_v0 = vmax.f32 %v1484_v30, 0.0  ;;  %v1791_v25 = vadd.f32 %v1759_v29, %v1662_v55  ;;  %v1887_v35 = vadd.f32 %v1855_v16, %v1790_v20 }
  0xf0   : > { %v4397_v32 = vld [vmem:[#allocation2 + $0x78] sm:$0xff]  ;;  %v2467_v60 = vadd.f32 %v2435_v8, %v2370_v38  ;;  %v2177_v47 = vadd.f32 %v2145_v22, %v2080_v39 }
  0xf1   : > { %1595 = vst.msk [vmem:[#allocation2 + $0x81] sm:$0xff] %vm1529_vm2, %v1506_v41  ;;  %v2242_v26 = vmul.f32 %v4265_v44, %v4397_v32  ;;  %v4406_v3 = vld [vmem:[#allocation2 + $0x79] sm:$0xff]  ;;  %v1952_v49 = vmul.f32 %v4397_v32, %v4214_v7  ;;  %v1888_v38 = vadd.f32 %v1856_v13, %v1791_v25  ;;  %v1663_v55 = vmul.f32 %v4397_v32, %v4144_v12 }
  0xf2   : > { %v1359_v52 = vpop.f32.mrf.mxu0  ;;  %1605 = vst.msk [vmem:[#allocation2 + $0xf9] sm:$0xff] %vm1529_vm2, %v1516_v0  ;;  %v2339_v21 = vmul.f32 %v4272_v62, %v4406_v3  ;;  %v1389_v18 = vpop.f32.mrf.mxu2  ;;  %v2049_v1 = vmul.f32 %v4406_v3, %v4250_v23  ;;  %v1760_v29 = vmul.f32 %v4406_v3, %v4152_v10 }
  0xf3   : > { %v1439_v34 = vmul.f32 %v4049_v6, %v1359_v52  ;;  %v2274_v24 = vadd.f32 %v2242_v26, %v2176_v2  ;;  %v1449_v4 = vmul.f32 %v4049_v6, %v1389_v18  ;;  %v1984_v19 = vadd.f32 %v1952_v49, %v1887_v35 }
  0xf4   : > { %v1792_v49 = vadd.f32 %v1760_v29, %v1663_v55 }
  0xf5   : > { %v1475_v56 = vadd.f32 %v4067_v53, %v1439_v34  ;;  %3133 = vmatmul.msk.f32.gmra.mxu1 %vm1529_vm2, %v2467_v60  ;;  %v2371_v37 = vadd.f32 %v2339_v21, %v2274_v24  ;;  %v1485_v27 = vadd.f32 %v4067_v53, %v1449_v4  ;;  %v2081_v17 = vadd.f32 %v2049_v1, %v1984_v19 }
  0xf7   : > { %v1507_v36 = vmax.f32 %v1475_v56, 0.0  ;;  %v1517_v5 = vmax.f32 %v1485_v27, 0.0 }
  0xf8   : > { %v2403_v9 = vld [vmem:[#allocation2 + $0x7a] sm:$0xff]  ;;  %v2404_v41 = vld [vmem:[#allocation2 + $0x82] sm:$0xff] }
  0xf9   : > { %v2210_v48 = vld [vmem:[#allocation2 + $0x80] sm:$0xff]  ;;  %1596 = vst.msk [vmem:[#allocation2 + $0x91] sm:$0xff] %vm1529_vm2, %v1507_v36  ;;  %v2436_v31 = vmul.f32 %v4289_v33, %v2403_v9  ;;  %v2146_v51 = vmul.f32 %v2403_v9, %v4253_v57  ;;  %v2437_v52 = vmul.f32 %v4289_v33, %v2404_v41  ;;  %v2147_v16 = vmul.f32 %v2404_v41, %v4253_v57 }
  0xfa   : > { %v2243_v28 = vmul.f32 %v4265_v44, %v2210_v48  ;;  %v1362_v14 = vpop.f32.mrf.mxu0  ;;  %v2307_v45 = vld [vmem:[#allocation2 + $0x81] sm:$0xff]  ;;  %v1953_v46 = vmul.f32 %v2210_v48, %v4214_v7  ;;  %1606 = vst.msk [vmem:[#allocation2 + $0x109] sm:$0xff] %vm1529_vm2, %v1517_v5  ;;  %v1392_v30 = vpop.f32.mrf.mxu2  ;;  %v1857_v18 = vmul.f32 %v2403_v9, %v4182_v63  ;;  %v1664_v32 = vmul.f32 %v2210_v48, %v4144_v12 }
  0xfb   : > { %v1440_v59 = vmul.f32 %v4049_v6, %v1362_v14  ;;  %v2468_v50 = vadd.f32 %v2436_v31, %v2371_v37  ;;  %v2340_v11 = vmul.f32 %v4272_v62, %v2307_v45  ;;  %v1450_v26 = vmul.f32 %v4049_v6, %v1392_v30 }
  0xfc   : > { %v2275_v43 = vadd.f32 %v2243_v28, %v2177_v47  ;;  %v1985_v15 = vadd.f32 %v1953_v46, %v1888_v38  ;;  %v2050_v60 = vmul.f32 %v2307_v45, %v4250_v23  ;;  %v2178_v40 = vadd.f32 %v2146_v51, %v2081_v17 }
  0xfd   : > { %v1476_v54 = vadd.f32 %v4067_v53, %v1440_v59  ;;  %3134 = vmatmul.msk.f32.gmra.mxu1 %vm1529_vm2, %v2468_v50  ;;  %v1486_v2 = vadd.f32 %v4067_v53, %v1450_v26  ;;  %v1761_v37 = vmul.f32 %v2307_v45, %v4152_v10 }
  0xfe   : > { %v2372_v58 = vadd.f32 %v2340_v11, %v2275_v43  ;;  %v2082_v24 = vadd.f32 %v2050_v60, %v1985_v15  ;;  %v1889_v43 = vadd.f32 %v1857_v18, %v1792_v49  ;;  %v1858_v11 = vmul.f32 %v2404_v41, %v4182_v63 }
  0xff   : > { %v1508_v42 = vmax.f32 %v1476_v54, 0.0  ;;  %v1518_v22 = vmax.f32 %v1486_v2, 0.0  ;;  %v1793_v46 = vadd.f32 %v1761_v37, %v1664_v32  ;;  %v1927_v37 = vld [vmem:[#allocation2 + $0xd8] sm:$0xff] }
 0x100   : > { %v4438_v8 = vld [vmem:[#allocation2 + $0x90] sm:$0xff]  ;;  %v2469_v61 = vadd.f32 %v2437_v52, %v2372_v58  ;;  %v2179_v31 = vadd.f32 %v2147_v16, %v2082_v24 }
 0x101   : > { %1597 = vst.msk [vmem:[#allocation2 + $0x99] sm:$0xff] %vm1529_vm2, %v1508_v42  ;;  %v2244_v0 = vmul.f32 %v4265_v44, %v4438_v8  ;;  %v2308_v56 = vld [vmem:[#allocation2 + $0x91] sm:$0xff]  ;;  %v1954_v59 = vmul.f32 %v4438_v8, %v4214_v7  ;;  %v1890_v52 = vadd.f32 %v1858_v11, %v1793_v46  ;;  %v1665_v24 = vmul.f32 %v4438_v8, %v4144_v12  ;;  %v4512_v11 = vld [vmem:[%s4950_s4] ss:$0 sm:$0xff] }
 0x102   : > { %v1365_v34 = vpop.f32.mrf.mxu0  ;;  %1607 = vst.msk [vmem:[#allocation2 + $0x111] sm:$0xff] %vm1529_vm2, %v1518_v22  ;;  %v2341_v20 = vmul.f32 %v4272_v62, %v2308_v56  ;;  %v1395_v4 = vpop.f32.mrf.mxu2  ;;  %v2051_v51 = vmul.f32 %v2308_v56, %v4250_v23  ;;  %v1762_v22 = vmul.f32 %v2308_v56, %v4152_v10 }
 0x103   : > { %v1441_v39 = vmul.f32 %v4049_v6, %v1365_v34  ;;  %v2276_v21 = vadd.f32 %v2244_v0, %v2178_v40  ;;  %v1451_v14 = vmul.f32 %v4049_v6, %v1395_v4  ;;  %v1986_v42 = vadd.f32 %v1954_v59, %v1889_v43  ;;  %v4502_v59 = vld [vmem:[%s4949_s3] ss:$0 sm:$0xff] }
 0x105   : > { %v1477_v36 = vadd.f32 %v4067_v53, %v1441_v39  ;;  %3135 = vmatmul.msk.f32.gmra.mxu1 %vm1529_vm2, %v2469_v61  ;;  %v2373_v27 = vadd.f32 %v2341_v20, %v2276_v21  ;;  %v1487_v45 = vadd.f32 %v4067_v53, %v1451_v14  ;;  %v2083_v60 = vadd.f32 %v2051_v51, %v1986_v42  ;;  %v4516_v42 = vld [vmem:[#allocation2 + $0xda] sm:$0xff] }
 0x106   : > { %v1794_v14 = vadd.f32 %v1762_v22, %v1665_v24 }
 0x107   : > { %v1509_v47 = vmax.f32 %v1477_v36, 0.0  ;;  %v1519_v54 = vmax.f32 %v1487_v45, 0.0 }
 0x108   : > { %v2405_v3 = vld [vmem:[#allocation2 + $0x92] sm:$0xff]  ;;  %v2406_v1 = vld [vmem:[#allocation2 + $0x9a] sm:$0xff] }
 0x109   : > { %v2212_v28 = vld [vmem:[#allocation2 + $0x98] sm:$0xff]  ;;  %1598 = vst.msk [vmem:[#allocation2 + $0xa9] sm:$0xff] %vm1529_vm2, %v1509_v47  ;;  %v2438_v25 = vmul.f32 %v4289_v33, %v2405_v3  ;;  %v2148_v26 = vmul.f32 %v2405_v3, %v4253_v57  ;;  %v2439_v34 = vmul.f32 %v4289_v33, %v2406_v1  ;;  %v2149_v49 = vmul.f32 %v2406_v1, %v4253_v57 }
 0x10a   : > { %v2245_v9 = vmul.f32 %v4265_v44, %v2212_v28  ;;  %v1368_v50 = vpop.f32.mrf.mxu0  ;;  %v2309_v48 = vld [vmem:[#allocation2 + $0x99] sm:$0xff]  ;;  %v1955_v58 = vmul.f32 %v2212_v28, %v4214_v7  ;;  %1608 = vst.msk [vmem:[#allocation2 + $0x121] sm:$0xff] %vm1529_vm2, %v1519_v54  ;;  %v1398_v41 = vpop.f32.mrf.mxu2  ;;  %v1666_v47 = vmul.f32 %v2212_v28, %v4144_v12 }
 0x10b   : > { %v1442_v35 = vmul.f32 %v4049_v6, %v1368_v50  ;;  %v2470_v5 = vadd.f32 %v2438_v25, %v2373_v27  ;;  %v2342_v38 = vmul.f32 %v4272_v62, %v2309_v48  ;;  %v1452_v0 = vmul.f32 %v4049_v6, %v1398_v41  ;;  %v2024_v27 = vld [vmem:[#allocation2 + $0xd9] sm:$0xff] }
 0x10c   : > { %v2277_v13 = vadd.f32 %v2245_v9, %v2179_v31  ;;  %v1987_v39 = vadd.f32 %v1955_v58, %v1890_v52  ;;  %v2180_v36 = vadd.f32 %v2148_v26, %v2083_v60  ;;  %v2052_v21 = vmul.f32 %v2309_v48, %v4250_v23 }
 0x10d   : > { %v1478_v19 = vadd.f32 %v4067_v53, %v1442_v35  ;;  %3136 = vmatmul.msk.f32.gmra.mxu1 %vm1529_vm2, %v2470_v5  ;;  %v1488_v40 = vadd.f32 %v4067_v53, %v1452_v0  ;;  %v1763_v20 = vmul.f32 %v2309_v48, %v4152_v10  ;;  %v1671_v48 = vmul.f32 %v1927_v37, %v4144_v12 }
 0x10e   : > { %v2374_v15 = vadd.f32 %v2342_v38, %v2277_v13  ;;  %v2084_v8 = vadd.f32 %v2052_v21, %v1987_v39  ;;  %v1860_v38 = vmul.f32 %v2406_v1, %v4182_v63  ;;  %v1768_v58 = vmul.f32 %v2024_v27, %v4152_v10 }
 0x10f   : > { %v1510_v30 = vmax.f32 %v1478_v19, 0.0  ;;  %v1520_v18 = vmax.f32 %v1488_v40, 0.0  ;;  %v1795_v50 = vadd.f32 %v1763_v20, %v1666_v47  ;;  %v4522_v0 = vmul.f32 %v4214_v7, %v1927_v37 }
 0x110   : > { %v4476_v17 = vld [vmem:[#allocation2 + $0xa8] sm:$0xff]  ;;  %v2471_v29 = vadd.f32 %v2439_v34, %v2374_v15  ;;  %v2181_v35 = vadd.f32 %v2149_v49, %v2084_v8  ;;  %v4525_v34 = vmul.f32 %v4250_v23, %v2024_v27  ;;  %v4532_v39 = vmul.f32 %v4253_v57, %v4516_v42 }
 0x111   : > { %1599 = vst.msk [vmem:[#allocation2 + $0xb1] sm:$0xff] %vm1529_vm2, %v1510_v30  ;;  %v2246_v2 = vmul.f32 %v4265_v44, %v4476_v17  ;;  %v2310_v16 = vld [vmem:[#allocation2 + $0xa9] sm:$0xff]  ;;  %v1667_v22 = vmul.f32 %v4476_v17, %v4144_v12  ;;  %v4541_v47 = vmul.f32 %v4265_v44, %v1927_v37  ;;  %v4545_v8 = vmul.f32 %v4272_v62, %v2024_v27 }
 0x112   : > { %v1371_v61 = vpop.f32.mrf.mxu0  ;;  %1609 = vst.msk [vmem:[#allocation2 + $0x129] sm:$0xff] %vm1529_vm2, %v1520_v18  ;;  %v2343_v31 = vmul.f32 %v4272_v62, %v2310_v16  ;;  %v1401_v28 = vpop.f32.mrf.mxu2  ;;  %v2053_v40 = vmul.f32 %v2310_v16, %v4250_v23  ;;  %v1865_v37 = vmul.f32 %v4516_v42, %v4182_v63 }
 0x113   : > { %v1443_v55 = vmul.f32 %v4049_v6, %v1371_v61  ;;  %v2278_v32 = vadd.f32 %v2246_v2, %v2180_v36  ;;  %v1859_v6 = vmul.f32 %v2405_v3, %v4182_v63  ;;  %v1453_v3 = vmul.f32 %v4502_v59, %v1401_v28 }
 0x114   : > { %v1892_v2 = vadd.f32 %v1860_v38, %v1795_v50 }
 0x115   : > { %v1479_v4 = vadd.f32 %v4067_v53, %v1443_v55  ;;  %3137 = vmatmul.msk.f32.gmra.mxu1 %vm1529_vm2, %v2471_v29  ;;  %v1956_v53 = vmul.f32 %v4476_v17, %v4214_v7  ;;  %v2375_v43 = vadd.f32 %v2343_v31, %v2278_v32  ;;  %v1891_v54 = vadd.f32 %v1859_v6, %v1794_v14 }
 0x116   : > { %v1489_v19 = vadd.f32 %v4512_v11, %v1453_v3  ;;  %v1764_v55 = vmul.f32 %v2310_v16, %v4152_v10  ;;  %v1800_v6 = vadd.f32 %v1768_v58, %v1671_v48 }
 0x117   : > { %v1511_v56 = vmax.f32 %v1479_v4, 0.0  ;;  %v1988_v52 = vadd.f32 %v1956_v53, %v1891_v54  ;;  %v4555_v53 = vld [vmem:[#allocation2 + $0xe0] sm:$0xff] }
 0x118   : > { %v2407_v25 = vld [vmem:[#allocation2 + $0xaa] sm:$0xff]  ;;  %v1521_v41 = vmax.f32 %v1489_v19, 0.0  ;;  %v2408_v61 = vld [vmem:[#allocation2 + $0xb2] sm:$0xff]  ;;  %v1796_v28 = vadd.f32 %v1764_v55, %v1667_v22  ;;  %v4562_v54 = vld [vmem:[#allocation2 + $0xe1] sm:$0xff]  ;;  %v1961_v38 = vmul.f32 %v4214_v7, %v4555_v53 }
 0x119   : > { %v2214_v9 = vld [vmem:[#allocation2 + $0xb0] sm:$0xff]  ;;  %1600 = vst.msk [vmem:[#allocation2 + $0xc1] sm:$0xff] %vm1529_vm2, %v1511_v56  ;;  %v2440_v45 = vmul.f32 %v4289_v33, %v2407_v25  ;;  %v2150_v24 = vmul.f32 %v2407_v25, %v4253_v57  ;;  %v2085_v20 = vadd.f32 %v2053_v40, %v1988_v52  ;;  %v2441_v17 = vmul.f32 %v4289_v33, %v2408_v61 }
 0x11a   : > { %v2247_v5 = vmul.f32 %v4265_v44, %v2214_v9  ;;  %v1374_v13 = vpop.f32.mrf.mxu0  ;;  %v2311_v46 = vld [vmem:[#allocation2 + $0xb1] sm:$0xff]  ;;  %v1957_v26 = vmul.f32 %v2214_v9, %v4214_v7  ;;  %1610 = vst.msk [vmem:[#allocation2 + $0x139] sm:$0xff] %vm1529_vm2, %v1521_v41  ;;  %v1404_v18 = vpop.f32.mrf.mxu2  ;;  %v1861_v27 = vmul.f32 %v2407_v25, %v4182_v63  ;;  %v1668_v48 = vmul.f32 %v2214_v9, %v4144_v12 }
 0x11b   : > { %v1444_v51 = vmul.f32 %v4502_v59, %v1374_v13  ;;  %v2472_v30 = vadd.f32 %v2440_v45, %v2375_v43  ;;  %v2344_v60 = vmul.f32 %v4272_v62, %v2311_v46  ;;  %v1454_v32 = vmul.f32 %v4502_v59, %v1404_v18 }
 0x11c   : > { %v2279_v15 = vadd.f32 %v2247_v5, %v2181_v35  ;;  %v1989_v21 = vadd.f32 %v1957_v26, %v1892_v2  ;;  %v2054_v31 = vmul.f32 %v2311_v46, %v4250_v23  ;;  %v2182_v49 = vadd.f32 %v2150_v24, %v2085_v20 }
 0x11d   : > { %v1480_v1 = vadd.f32 %v4512_v11, %v1444_v51  ;;  %3138 = vmatmul.msk.f32.gmra.mxu1 %vm1529_vm2, %v2472_v30  ;;  %v1490_v14 = vadd.f32 %v4512_v11, %v1454_v32  ;;  %v1765_v43 = vmul.f32 %v2311_v46, %v4152_v10  ;;  %v2151_v19 = vmul.f32 %v2408_v61, %v4253_v57  ;;  %v4572_v46 = vld [vmem:[#allocation2 + $0xe2] sm:$0xff] }
 0x11e   : > { %v2376_v36 = vadd.f32 %v2344_v60, %v2279_v15  ;;  %v2086_v50 = vadd.f32 %v2054_v31, %v1989_v21  ;;  %v4570_v9 = vmul.f32 %v4250_v23, %v4562_v54  ;;  %v1893_v58 = vadd.f32 %v1861_v27, %v1796_v28  ;;  %v2316_v28 = vld [vmem:[#allocation2 + $0xf1] sm:$0xff] }
 0x11f   : > { %v1512_v29 = vmax.f32 %v1480_v1, 0.0  ;;  %v1522_v45 = vmax.f32 %v1490_v14, 0.0  ;;  %v4577_v51 = vmul.f32 %v4253_v57, %v4572_v46  ;;  %v1897_v30 = vadd.f32 %v1865_v37, %v1800_v6  ;;  %v2219_v14 = vld [vmem:[#allocation2 + $0xf0] sm:$0xff] }
 0x120   : > { %v2215_v4 = vld [vmem:[#allocation2 + $0xc0] sm:$0xff]  ;;  %v2473_v3 = vadd.f32 %v2441_v17, %v2376_v36  ;;  %v1672_v15 = vmul.f32 %v4555_v53, %v4144_v12  ;;  %v2183_v52 = vadd.f32 %v2151_v19, %v2086_v50  ;;  %v1797_v1 = vadd.f32 %v1765_v43, %v1668_v48 }
 0x121   : > { %1601 = vst.msk [vmem:[#allocation2 + $0xc9] sm:$0xff] %vm1529_vm2, %v1512_v29  ;;  %v2248_v16 = vmul.f32 %v4265_v44, %v2215_v4  ;;  %v2312_v56 = vld [vmem:[#allocation2 + $0xc1] sm:$0xff]  ;;  %v1669_v35 = vmul.f32 %v2215_v4, %v4144_v12  ;;  %v1958_v13 = vmul.f32 %v2215_v4, %v4214_v7  ;;  %v1862_v60 = vmul.f32 %v2408_v61, %v4182_v63 }
 0x122   : > { %v1766_v5 = vmul.f32 %v2312_v56, %v4152_v10  ;;  %1611 = vst.msk [vmem:[#allocation2 + $0x141] sm:$0xff] %vm1529_vm2, %v1522_v45  ;;  %v2345_v26 = vmul.f32 %v4272_v62, %v2312_v56  ;;  %v1407_v41 = vpop.f32.mrf.mxu2  ;;  %v1769_v36 = vmul.f32 %v4562_v54, %v4152_v10  ;;  %v2055_v61 = vmul.f32 %v2312_v56, %v4250_v23 }
 0x123   : > { %v2280_v25 = vadd.f32 %v2248_v16, %v2182_v49  ;;  %v1990_v55 = vadd.f32 %v1958_v13, %v1893_v58  ;;  %v1455_v29 = vmul.f32 %v4502_v59, %v1407_v41  ;;  %v1894_v48 = vadd.f32 %v1862_v60, %v1797_v1 }
 0x124   : > { %v1798_v22 = vadd.f32 %v1766_v5, %v1669_v35  ;;  %v2252_v13 = vmul.f32 %v4265_v44, %v2219_v14  ;;  %v1962_v19 = vmul.f32 %v2219_v14, %v4214_v7  ;;  %v2059_v58 = vmul.f32 %v2316_v28, %v4250_v23 }
 0x125   : > { %3139 = vmatmul.msk.f32.gmra.mxu1 %vm1529_vm2, %v2473_v3  ;;  %v2377_v21 = vadd.f32 %v2345_v26, %v2280_v25  ;;  %v1491_v17 = vadd.f32 %v4512_v11, %v1455_v29  ;;  %v2087_v3 = vadd.f32 %v2055_v61, %v1990_v55 }
 0x127   : > { %v1523_v50 = vmax.f32 %v1491_v17, 0.0 }
 0x128   : > { %v2409_v2 = vld [vmem:[#allocation2 + $0xc2] sm:$0xff]  ;;  %v2410_v32 = vld [vmem:[#allocation2 + $0xca] sm:$0xff] }
 0x129   : > { %v2216_v40 = vld [vmem:[#allocation2 + $0xc8] sm:$0xff]  ;;  %v2442_v18 = vmul.f32 %v4289_v33, %v2409_v2  ;;  %v1863_v4 = vmul.f32 %v2409_v2, %v4182_v63  ;;  %v2152_v6 = vmul.f32 %v2409_v2, %v4253_v57  ;;  %v1864_v5 = vmul.f32 %v2410_v32, %v4182_v63  ;;  %1612 = vst.msk [vmem:[#allocation2 + $0x151] sm:$0xff] %vm1529_vm2, %v1523_v50 }
 0x12a   : > { %v2313_v24 = vld [vmem:[#allocation2 + $0xc9] sm:$0xff]  ;;  %v2249_v20 = vmul.f32 %v4265_v44, %v2216_v40  ;;  %v1670_v16 = vmul.f32 %v2216_v40, %v4144_v12  ;;  %v1959_v43 = vmul.f32 %v2216_v40, %v4214_v7  ;;  %v1410_v60 = vpop.f32.mrf.mxu2  ;;  %v1801_v40 = vadd.f32 %v1769_v36, %v1672_v15 }
 0x12b   : > { %v2474_v31 = vadd.f32 %v2442_v18, %v2377_v21  ;;  %v1895_v49 = vadd.f32 %v1863_v4, %v1798_v22  ;;  %v1767_v27 = vmul.f32 %v2313_v24, %v4152_v10  ;;  %v2346_v56 = vmul.f32 %v4272_v62, %v2313_v24  ;;  %v2413_v21 = vld [vmem:[#allocation2 + $0xf2] sm:$0xff] }
 0x12c   : > { %v2281_v37 = vadd.f32 %v2249_v20, %v2183_v52  ;;  %v2184_v25 = vadd.f32 %v2152_v6, %v2087_v3  ;;  %v1991_v1 = vadd.f32 %v1959_v43, %v1894_v48  ;;  %v1456_v2 = vmul.f32 %v4502_v59, %v1410_v60  ;;  %v4610_v20 = vld [vmem:[#allocation2 + $0xf8] sm:$0xff]  ;;  %v4627_v48 = vld [vmem:[#allocation2 + $0x108] sm:$0xff] }
 0x12d   : > { %3140 = vmatmul.msk.f32.gmra.mxu1 %vm1529_vm2, %v2474_v31  ;;  %v1992_v45 = vadd.f32 %v4522_v0, %v1895_v49  ;;  %v1799_v35 = vadd.f32 %v1767_v27, %v1670_v16  ;;  %v2349_v0 = vmul.f32 %v4272_v62, %v2316_v28  ;;  %v1866_v22 = vmul.f32 %v4572_v46, %v4182_v63 }
 0x12e   : > { %v2378_v26 = vadd.f32 %v2346_v56, %v2281_v37  ;;  %v2443_v55 = vmul.f32 %v4289_v33, %v2410_v32  ;;  %v2446_v4 = vmul.f32 %v4289_v33, %v2413_v21  ;;  %v2282_v61 = vadd.f32 %v4541_v47, %v2184_v25 }
 0x12f   : > { %v2089_v52 = vadd.f32 %v4525_v34, %v1992_v45  ;;  %v1896_v41 = vadd.f32 %v1864_v5, %v1799_v35  ;;  %v2056_v34 = vmul.f32 %v2313_v24, %v4250_v23  ;;  %v1492_v6 = vadd.f32 %v4512_v11, %v1456_v2  ;;  %v2318_v2 = vld [vmem:[#allocation2 + $0x109] sm:$0xff] }
 0x130   : > { %v1994_v15 = vadd.f32 %v1962_v19, %v1897_v30  ;;  %v2475_v36 = vadd.f32 %v2443_v55, %v2378_v26  ;;  %v2156_v37 = vmul.f32 %v2413_v21, %v4253_v57  ;;  %v1963_v24 = vmul.f32 %v4610_v20, %v4214_v7  ;;  %v2317_v30 = vld [vmem:[#allocation2 + $0xf9] sm:$0xff] }
 0x131   : > { %v2186_v29 = vadd.f32 %v4532_v39, %v2089_v52  ;;  %v1993_v18 = vadd.f32 %v1961_v38, %v1896_v41  ;;  %v2088_v31 = vadd.f32 %v2056_v34, %v1991_v1  ;;  %v2253_v39 = vmul.f32 %v4265_v44, %v4610_v20 }
 0x132   : > { %v1524_v38 = vmax.f32 %v1492_v6, 0.0  ;;  %v2153_v27 = vmul.f32 %v2410_v32, %v4253_v57  ;;  %v1898_v3 = vadd.f32 %v1866_v22, %v1801_v40  ;;  %v2091_v50 = vadd.f32 %v2059_v58, %v1994_v15 }
 0x133   : > { %v2284_v17 = vadd.f32 %v2252_v13, %v2186_v29  ;;  %v2090_v16 = vadd.f32 %v4570_v9, %v1993_v18  ;;  %v2350_v9 = vmul.f32 %v4272_v62, %v2317_v30  ;;  %v1673_v43 = vmul.f32 %v2219_v14, %v4144_v12  ;;  %v1413_v13 = vpop.f32.mrf.mxu2 }
 0x134   : > { %1613 = vst.msk [vmem:[#allocation2 + $0x159] sm:$0xff] %vm1529_vm2, %v1524_v38  ;;  %v1770_v56 = vmul.f32 %v2316_v28, %v4152_v10  ;;  %v2379_v35 = vadd.f32 %v4545_v8, %v2282_v61  ;;  %v2444_v32 = vmul.f32 %v4289_v33, %v4516_v42  ;;  %v1457_v25 = vmul.f32 %v4502_v59, %v1413_v13  ;;  %v2414_v8 = vld [vmem:[#allocation2 + $0xfa] sm:$0xff] }
 0x135   : > { %3141 = vmatmul.msk.f32.gmra.mxu1 %vm1529_vm2, %v2475_v36  ;;  %v2381_v47 = vadd.f32 %v2349_v0, %v2284_v17  ;;  %v2187_v49 = vadd.f32 %v4577_v51, %v2090_v16  ;;  %v2185_v51 = vadd.f32 %v2153_v27, %v2088_v31  ;;  %v2251_v19 = vmul.f32 %v4265_v44, %v4555_v53  ;;  %v4662_v31 = vld [vmem:[%s4951_s5 + $0x8] ss:$0 sm:$0xff]  ;;  %v4681_v13 = vld [vmem:[%s4953_s7] ss:$0 sm:$0xff] }
 0x136   : > { %v2254_v14 = vmul.f32 %v4265_v44, %v4627_v48  ;;  %v1995_v28 = vadd.f32 %v1963_v24, %v1898_v3  ;;  %v2060_v58 = vmul.f32 %v2317_v30, %v4250_v23  ;;  %v2188_v26 = vadd.f32 %v2156_v37, %v2091_v50 }
 0x137   : > { %v2478_v45 = vadd.f32 %v2446_v4, %v2381_v47  ;;  %v2285_v5 = vadd.f32 %v2253_v39, %v2187_v49  ;;  %v1493_v52 = vadd.f32 %v4512_v11, %v1457_v25  ;;  %v1802_v41 = vadd.f32 %v1770_v56, %v1673_v43  ;;  %v2319_v47 = vld [vmem:[#allocation2 + $0x111] sm:$0xff] }
 0x138   : > { %v1867_v42 = vmul.f32 %v2413_v21, %v4182_v63  ;;  %v2476_v1 = vadd.f32 %v2444_v32, %v2379_v35  ;;  %v2283_v0 = vadd.f32 %v2251_v19, %v2185_v51  ;;  %v2447_v53 = vmul.f32 %v4289_v33, %v2414_v8  ;;  %v4650_v21 = vld [vmem:[#allocation2 + $0x110] sm:$0xff]  ;;  %v2223_v19 = vld [vmem:[#allocation2 + $0x120] sm:$0xff] }
 0x139   : > { %3144 = vmatmul.msk.f32.vlgmr.msra.gmra.mxu3 %vm1529_vm2, %v2478_v45  ;;  %v2382_v60 = vadd.f32 %v2350_v9, %v2285_v5  ;;  %v1525_v40 = vmax.f32 %v1493_v52, 0.0  ;;  %v2348_v22 = vmul.f32 %v4272_v62, %v4562_v54  ;;  %v2092_v55 = vadd.f32 %v2060_v58, %v1995_v28  ;;  %v2415_v33 = vld [vmem:[#allocation2 + $0x10a] sm:$0xff]  ;;  %v2416_v35 = vld [vmem:[#allocation2 + $0x112] sm:$0xff] }
 0x13a   : > { %v2157_v29 = vmul.f32 %v2414_v8, %v4253_v57  ;;  %v2286_v18 = vadd.f32 %v2254_v14, %v2188_v26  ;;  %v2351_v34 = vmul.f32 %v4272_v62, %v2318_v2  ;;  %v1899_v4 = vadd.f32 %v1867_v42, %v1802_v41 }
 0x13b   : > { %1614 = vst.msk [vmem:[#allocation2 + $0x169] sm:$0xff] %vm1529_vm2, %v1525_v40  ;;  %v1964_v61 = vmul.f32 %v4627_v48, %v4214_v7  ;;  %v2479_v6 = vadd.f32 %v2447_v53, %v2382_v60  ;;  %v2380_v15 = vadd.f32 %v2348_v22, %v2283_v0  ;;  %v1416_v36 = vpop.f32.mrf.mxu2  ;;  %v1674_v54 = vmul.f32 %v4610_v20, %v4144_v12 }
 0x13c   : > { %v1771_v17 = vmul.f32 %v2317_v30, %v4152_v10  ;;  %v1458_v16 = vmul.f32 %v4502_v59, %v1416_v36  ;;  %v2445_v39 = vmul.f32 %v4662_v31, %v4572_v46  ;;  %v2189_v38 = vadd.f32 %v2157_v29, %v2092_v55 }
 0x13d   : > { %3142 = vmatmul.msk.f32.gmra.mxu1 %vm1529_vm2, %v2476_v1  ;;  %v2255_v37 = vmul.f32 %v4265_v44, %v4650_v21  ;;  %v2383_v24 = vadd.f32 %v2351_v34, %v2286_v18  ;;  %v2448_v20 = vmul.f32 %v4662_v31, %v2415_v33  ;;  %v2061_v30 = vmul.f32 %v2318_v2, %v4250_v23  ;;  %v2320_v1 = vld [vmem:[#allocation2 + $0x121] sm:$0xff] }
 0x13e   : > { %v1494_v49 = vadd.f32 %v4512_v11, %v1458_v16  ;;  %v2477_v27 = vadd.f32 %v2445_v39, %v2380_v15  ;;  %v1996_v3 = vadd.f32 %v1964_v61, %v1899_v4  ;;  %v1803_v9 = vadd.f32 %v1771_v17, %v1674_v54  ;;  %v2417_v61 = vld [vmem:[#allocation2 + $0x122] sm:$0xff] }
 0x13f   : > { %v1868_v50 = vmul.f32 %v2414_v8, %v4182_v63  ;;  %v2287_v46 = vadd.f32 %v2255_v37, %v2189_v38  ;;  %v2352_v56 = vmul.f32 %v4272_v62, %v2319_v47  ;;  %v2480_v45 = vadd.f32 %v2448_v20, %v2383_v24  ;;  %v2224_v37 = vld [vmem:[#allocation2 + $0x128] sm:$0xff] }
 0x140   : > { %v1526_v43 = vmax.f32 %v1494_v49, 0.0  ;;  %v1675_v5 = vmul.f32 %v4627_v48, %v4144_v12  ;;  %v1772_v51 = vmul.f32 %v2318_v2, %v4152_v10  ;;  %v2093_v32 = vadd.f32 %v2061_v30, %v1996_v3  ;;  %v4691_v48 = vld [vmem:[%s4954_s8] ss:$0 sm:$0xff] }
 0x141   : > { %3145 = vmatmul.msk.f32.gmra.mxu3 %vm1529_vm2, %v2479_v6  ;;  %v2158_v25 = vmul.f32 %v2415_v33, %v4253_v57  ;;  %v1900_v28 = vadd.f32 %v1868_v50, %v1803_v9  ;;  %v1965_v58 = vmul.f32 %v4650_v21, %v4214_v7  ;;  %v2384_v26 = vadd.f32 %v2352_v56, %v2287_v46  ;;  %v2321_v46 = vld [vmem:[#allocation2 + $0x129] sm:$0xff] }
 0x142   : > { %1615 = vst.msk [vmem:[#allocation2 + $0x171] sm:$0xff] %vm1529_vm2, %v1526_v43  ;;  %v2449_v52 = vmul.f32 %v4662_v31, %v2416_v35  ;;  %v2256_v42 = vmul.f32 %v4265_v44, %v2223_v19  ;;  %v1804_v0 = vadd.f32 %v1772_v51, %v1675_v5  ;;  %v1869_v2 = vmul.f32 %v2415_v33, %v4182_v63 }
 0x143   : > { %v1419_v14 = vpop.f32.mrf.mxu2  ;;  %v2190_v53 = vadd.f32 %v2158_v25, %v2093_v32  ;;  %v1997_v22 = vadd.f32 %v1965_v58, %v1900_v28  ;;  %v2062_v55 = vmul.f32 %v2319_v47, %v4250_v23  ;;  %v2353_v4 = vmul.f32 %v4272_v62, %v2320_v1  ;;  %v2225_v32 = vld [vmem:[#allocation2 + $0x138] sm:$0xff] }
 0x144   : > { %v1459_v8 = vmul.f32 %v4502_v59, %v1419_v14  ;;  %v2481_v34 = vadd.f32 %v2449_v52, %v2384_v26  ;;  %v1901_v6 = vadd.f32 %v1869_v2, %v1804_v0  ;;  %v1966_v15 = vmul.f32 %v2223_v19, %v4214_v7  ;;  %v2418_v52 = vld [vmem:[#allocation2 + $0x12a] sm:$0xff]  ;;  %v2322_v2 = vld [vmem:[#allocation2 + $0x139] sm:$0xff] }
 0x145   : > { %3143 = vmatmul.msk.f32.gmra.mxu1 %vm1529_vm2, %v2477_v27  ;;  %v1676_v33 = vmul.f32 %v4650_v21, %v4144_v12  ;;  %v1773_v36 = vmul.f32 %v2319_v47, %v4152_v10  ;;  %v2288_v17 = vadd.f32 %v2256_v42, %v2190_v53  ;;  %v2094_v16 = vadd.f32 %v2062_v55, %v1997_v22 }
 0x146   : > { %v1495_v60 = vadd.f32 %v4512_v11, %v1459_v8  ;;  %v2159_v39 = vmul.f32 %v2416_v35, %v4253_v57  ;;  %v2450_v20 = vmul.f32 %v4662_v31, %v2417_v61  ;;  %v2063_v49 = vmul.f32 %v2320_v1, %v4250_v23 }
 0x147   : > { %v1998_v30 = vadd.f32 %v1966_v15, %v1901_v6  ;;  %v1805_v27 = vadd.f32 %v1773_v36, %v1676_v33  ;;  %v1870_v3 = vmul.f32 %v2416_v35, %v4182_v63  ;;  %v2385_v50 = vadd.f32 %v2353_v4, %v2288_v17  ;;  %v2419_v6 = vld [vmem:[#allocation2 + $0x13a] sm:$0xff] }
 0x148   : > { %v1527_v29 = vmax.f32 %v1495_v60, 0.0  ;;  %v2191_v43 = vadd.f32 %v2159_v39, %v2094_v16  ;;  %v2160_v5 = vmul.f32 %v2417_v61, %v4253_v57  ;;  %v1967_v51 = vmul.f32 %v2224_v37, %v4214_v7  ;;  %v2226_v33 = vld [vmem:[#allocation2 + $0x140] sm:$0xff] }
 0x149   : > { %3146 = vmatmul.msk.f32.gmra.mxu3 %vm1529_vm2, %v2480_v45  ;;  %v1902_v35 = vadd.f32 %v1870_v3, %v1805_v27  ;;  %v1677_v25 = vmul.f32 %v2223_v19, %v4144_v12  ;;  %v1774_v14 = vmul.f32 %v2320_v1, %v4152_v10  ;;  %v2482_v58 = vadd.f32 %v2450_v20, %v2385_v50 }
 0x14a   : > { %v2608_v41 = vpop.f32.mrf.mxu1  ;;  %1616 = vst.msk [vmem:[#allocation2 + $0x181] sm:$0xff] %vm1529_vm2, %v1527_v29  ;;  %v2354_v26 = vmul.f32 %v4272_v62, %v2321_v46  ;;  %v2064_v42 = vmul.f32 %v2321_v46, %v4250_v23  ;;  %v1871_v1 = vmul.f32 %v2417_v61, %v4182_v63  ;;  %v2451_v55 = vmul.f32 %v4662_v31, %v2418_v52 }
 0x14b   : > { %v2708_v40 = vmul.f32 %v4681_v13, %v2608_v41  ;;  %v1422_v38 = vpop.f32.mrf.mxu2  ;;  %v2258_v41 = vmul.f32 %v4265_v44, %v2225_v32  ;;  %v1999_v19 = vadd.f32 %v1967_v51, %v1902_v35  ;;  %v1678_v16 = vmul.f32 %v2224_v37, %v4144_v12  ;;  %v2227_v35 = vld [vmem:[#allocation2 + $0x150] sm:$0xff] }
 0x14c   : > { %v1460_v24 = vmul.f32 %v4502_v59, %v1422_v38  ;;  %v2257_v59 = vmul.f32 %v4265_v44, %v2224_v37  ;;  %v1775_v39 = vmul.f32 %v2321_v46, %v4152_v10  ;;  %v2452_v38 = vmul.f32 %v4662_v31, %v2419_v6 }
 0x14d   : > { %v2744_v18 = vadd.f32 %v4691_v48, %v2708_v40  ;;  %v1806_v40 = vadd.f32 %v1774_v14, %v1677_v25  ;;  %v2096_v15 = vadd.f32 %v2064_v42, %v1999_v19  ;;  %v2065_v27 = vmul.f32 %v2322_v2, %v4250_v23  ;;  %v2324_v42 = vld [vmem:[#allocation2 + $0x151] sm:$0xff] }
 0x14e   : > { %v1496_v47 = vadd.f32 %v4512_v11, %v1460_v24  ;;  %v2095_v11 = vadd.f32 %v2063_v49, %v1998_v30  ;;  %v2289_v8 = vadd.f32 %v2257_v59, %v2191_v43  ;;  %v2259_v24 = vmul.f32 %v4265_v44, %v2226_v33 }
 0x14f   : > { %v2776_v54 = vmax.f32 %v2744_v18, 0.0  ;;  %v2355_v18 = vmul.f32 %v4272_v62, %v2322_v2  ;;  %v1903_v36 = vadd.f32 %v1871_v1, %v1806_v40  ;;  %v1807_v37 = vadd.f32 %v1775_v39, %v1678_v16  ;;  %v2325_v39 = vld [vmem:[#allocation2 + $0x159] sm:$0xff] }
 0x150   : > { %v1528_v56 = vmax.f32 %v1496_v47, 0.0  ;;  %v2192_v0 = vadd.f32 %v2160_v5, %v2095_v11  ;;  %v2386_v22 = vadd.f32 %v2354_v26, %v2289_v8  ;;  %v2323_v47 = vld [vmem:[#allocation2 + $0x141] sm:$0xff]  ;;  %v2162_v59 = vmul.f32 %v2419_v6, %v4253_v57 }
 0x151   : > { %2808 = vst.msk [vmem:[%s4705_s27] sm:$0xff] %vm1529_vm2, %v2776_v54  ;;  %3147 = vmatmul.msk.f32.gmra.mxu3 %vm1529_vm2, %v2481_v34  ;;  %v2161_v34 = vmul.f32 %v2418_v52, %v4253_v57  ;;  %v1968_v54 = vmul.f32 %v2225_v32, %v4214_v7  ;;  %v2356_v43 = vmul.f32 %v4272_v62, %v2323_v47 }
 0x152   : > { %v2611_v21 = vpop.f32.mrf.mxu1  ;;  %1617 = vst.msk [vmem:[#allocation2 + $0x189] sm:$0xff] %vm1529_vm2, %v1528_v56  ;;  %v2290_v4 = vadd.f32 %v2258_v41, %v2192_v0  ;;  %v2483_v17 = vadd.f32 %v2451_v55, %v2386_v22  ;;  %v1969_v51 = vmul.f32 %v2226_v33, %v4214_v7  ;;  %v1679_v14 = vmul.f32 %v2225_v32, %v4144_v12 }
 0x153   : > { %v2709_v9 = vmul.f32 %v4681_v13, %v2611_v21  ;;  %v2193_v21 = vadd.f32 %v2161_v34, %v2096_v15  ;;  %v2000_v30 = vadd.f32 %v1968_v54, %v1903_v36  ;;  %v2260_v41 = vmul.f32 %v4265_v44, %v2227_v35  ;;  %v2228_v36 = vld [vmem:[#allocation2 + $0x158] sm:$0xff] }
 0x154   : > { %v2387_v49 = vadd.f32 %v2355_v18, %v2290_v4  ;;  %v2357_v1 = vmul.f32 %v4272_v62, %v2324_v42  ;;  %v1680_v18 = vmul.f32 %v2226_v33, %v4144_v12  ;;  %v1777_v34 = vmul.f32 %v2323_v47, %v4152_v10 }
 0x155   : > { %v2745_v45 = vadd.f32 %v4691_v48, %v2709_v9  ;;  %v1872_v9 = vmul.f32 %v2418_v52, %v4182_v63  ;;  %v2291_v56 = vadd.f32 %v2259_v24, %v2193_v21  ;;  %v2097_v5 = vadd.f32 %v2065_v27, %v2000_v30 }
 0x156   : > { %v2484_v46 = vadd.f32 %v2452_v38, %v2387_v49  ;;  %v2261_v16 = vmul.f32 %v4265_v44, %v2228_v36  ;;  %v2067_v33 = vmul.f32 %v2324_v42, %v4250_v23  ;;  %v1809_v38 = vadd.f32 %v1777_v34, %v1680_v18  ;;  %v2423_v34 = vld [vmem:[#allocation2 + $0x16a] sm:$0xff] }
 0x157   : > { %v2777_v28 = vmax.f32 %v2745_v45, 0.0  ;;  %v2420_v45 = vld [vmem:[#allocation2 + $0x142] sm:$0xff]  ;;  %v1904_v25 = vadd.f32 %v1872_v9, %v1807_v37  ;;  %v2388_v26 = vadd.f32 %v2356_v43, %v2291_v56  ;;  %v2194_v52 = vadd.f32 %v2162_v59, %v2097_v5  ;;  %v2422_v37 = vld [vmem:[#allocation2 + $0x15a] sm:$0xff] }
 0x158   : > { %v1874_v24 = vmul.f32 %v2420_v45, %v4182_v63  ;;  %v2358_v27 = vmul.f32 %v4272_v62, %v2325_v39  ;;  %v1681_v43 = vmul.f32 %v2227_v35, %v4144_v12  ;;  %v1778_v59 = vmul.f32 %v2324_v42, %v4152_v10  ;;  %v2326_v42 = vld [vmem:[#allocation2 + $0x169] sm:$0xff] }
 0x159   : > { %2809 = vst.msk [vmem:[%s4705_s27 + $0x8] sm:$0xff] %vm1529_vm2, %v2777_v28  ;;  %3148 = vmatmul.msk.f32.gmra.mxu3 %vm1529_vm2, %v2482_v58  ;;  %v1776_v28 = vmul.f32 %v2322_v2, %v4152_v10  ;;  %v2453_v58 = vmul.f32 %v4662_v31, %v2420_v45  ;;  %v2001_v19 = vadd.f32 %v1969_v51, %v1904_v25  ;;  %v2229_v51 = vld [vmem:[#allocation2 + $0x168] sm:$0xff] }
 0x15a   : > { %v2614_v60 = vpop.f32.mrf.mxu1  ;;  %v1873_v2 = vmul.f32 %v2419_v6, %v4182_v63  ;;  %v2292_v55 = vadd.f32 %v2260_v41, %v2194_v52  ;;  %v1906_v9 = vadd.f32 %v1874_v24, %v1809_v38  ;;  %v2262_v41 = vmul.f32 %v4265_v44, %v2229_v51 }
 0x15b   : > { %v2710_v53 = vmul.f32 %v4681_v13, %v2614_v60  ;;  %v2066_v60 = vmul.f32 %v2323_v47, %v4250_v23  ;;  %v1808_v32 = vadd.f32 %v1776_v28, %v1679_v14  ;;  %v2485_v22 = vadd.f32 %v2453_v58, %v2388_v26 }
 0x15c   : > { %v2389_v49 = vadd.f32 %v2357_v1, %v2292_v55  ;;  %v2068_v28 = vmul.f32 %v2325_v39, %v4250_v23  ;;  %v1810_v58 = vadd.f32 %v1778_v59, %v1681_v43  ;;  %v1682_v1 = vmul.f32 %v2228_v36, %v4144_v12 }
 0x15d   : > { %v2746_v29 = vadd.f32 %v4691_v48, %v2710_v53  ;;  %v2163_v53 = vmul.f32 %v2420_v45, %v4253_v57  ;;  %v2098_v15 = vadd.f32 %v2066_v60, %v2001_v19  ;;  %v1905_v54 = vadd.f32 %v1873_v2, %v1808_v32  ;;  %v2230_v2 = vld [vmem:[#allocation2 + $0x170] sm:$0xff] }
 0x15e   : > { %v1972_v19 = vmul.f32 %v2229_v51, %v4214_v7  ;;  %v2359_v18 = vmul.f32 %v4272_v62, %v2326_v42  ;;  %v2456_v38 = vmul.f32 %v4662_v31, %v2423_v34  ;;  %v1683_v43 = vmul.f32 %v2229_v51, %v4144_v12 }
 0x15f   : > { %v2778_v61 = vmax.f32 %v2746_v29, 0.0  ;;  %v2421_v29 = vld [vmem:[#allocation2 + $0x152] sm:$0xff]  ;;  %v2195_v21 = vadd.f32 %v2163_v53, %v2098_v15  ;;  %v1779_v53 = vmul.f32 %v2325_v39, %v4152_v10  ;;  %v2069_v15 = vmul.f32 %v2326_v42, %v4250_v23 }
 0x160   : > { %v2454_v6 = vmul.f32 %v4662_v31, %v2421_v29  ;;  %v1780_v59 = vmul.f32 %v2326_v42, %v4152_v10 }
 0x161   : > { %2810 = vst.msk [vmem:[%s4705_s27 + $0x10] sm:$0xff] %vm1529_vm2, %v2778_v61  ;;  %3149 = vmatmul.msk.f32.gmra.mxu3 %vm1529_vm2, %v2483_v17  ;;  %v1970_v61 = vmul.f32 %v2227_v35, %v4214_v7  ;;  %v2293_v45 = vadd.f32 %v2261_v16, %v2195_v21  ;;  %v1875_v35 = vmul.f32 %v2421_v29, %v4182_v63 }
 0x162   : > { %v2617_v20 = vpop.f32.mrf.mxu1  ;;  %v2486_v56 = vadd.f32 %v2454_v6, %v2389_v49  ;;  %v2327_v6 = vld [vmem:[#allocation2 + $0x171] sm:$0xff]  ;;  %v1876_v16 = vmul.f32 %v2422_v37, %v4182_v63  ;;  %v1973_v49 = vmul.f32 %v2230_v2, %v4214_v7  ;;  %v1812_v51 = vadd.f32 %v1780_v59, %v1683_v43 }
 0x163   : > { %v2711_v3 = vmul.f32 %v4681_v13, %v2617_v20  ;;  %v2002_v47 = vadd.f32 %v1970_v61, %v1905_v54  ;;  %v2390_v26 = vadd.f32 %v2358_v27, %v2293_v45  ;;  %v2166_v27 = vmul.f32 %v2423_v34, %v4253_v57 }
 0x165   : > { %v2747_v50 = vadd.f32 %v4691_v48, %v2711_v3  ;;  %v2164_v3 = vmul.f32 %v2421_v29, %v4253_v57  ;;  %v2099_v5 = vadd.f32 %v2067_v33, %v2002_v47  ;;  %v2424_v47 = vld [vmem:[#allocation2 + $0x172] sm:$0xff] }
 0x167   : > { %v2779_v11 = vmax.f32 %v2747_v50, 0.0  ;;  %v1971_v50 = vmul.f32 %v2228_v36, %v4214_v7  ;;  %v2196_v52 = vadd.f32 %v2164_v3, %v2099_v5 }
 0x169   : > { %2811 = vst.msk [vmem:[%s4705_s27 + $0x18] sm:$0xff] %vm1529_vm2, %v2779_v11  ;;  %3150 = vmatmul.msk.f32.gmra.mxu3 %vm1529_vm2, %v2484_v46  ;;  %v2455_v11 = vmul.f32 %v4662_v31, %v2422_v37  ;;  %v2003_v14 = vadd.f32 %v1971_v50, %v1906_v9  ;;  %v2294_v29 = vadd.f32 %v2262_v41, %v2196_v52  ;;  %v2231_v50 = vld [vmem:[#allocation2 + $0x180] sm:$0xff] }
 0x16a   : > { %v2620_v8 = vpop.f32.mrf.mxu1  ;;  %v2167_v52 = vmul.f32 %v2424_v47, %v4253_v57 }
 0x16b   : > { %v2712_v0 = vmul.f32 %v4681_v13, %v2620_v8  ;;  %v2100_v32 = vadd.f32 %v2068_v28, %v2003_v14  ;;  %v2487_v55 = vadd.f32 %v2455_v11, %v2390_v26  ;;  %v2391_v33 = vadd.f32 %v2359_v18, %v2294_v29  ;;  %v2328_v14 = vld [vmem:[#allocation2 + $0x181] sm:$0xff] }
 0x16c   : > { %v2361_v26 = vmul.f32 %v4272_v62, %v2328_v14 }
 0x16d   : > { %v2748_v40 = vadd.f32 %v4691_v48, %v2712_v0  ;;  %v2165_v0 = vmul.f32 %v2422_v37, %v4253_v57  ;;  %v2488_v37 = vadd.f32 %v2456_v38, %v2391_v33  ;;  %v2426_v38 = vld [vmem:[#allocation2 + $0x18a] sm:$0xff] }
 0x16f   : > { %v2780_v4 = vmax.f32 %v2748_v40, 0.0  ;;  %v1907_v40 = vadd.f32 %v1875_v35, %v1810_v58  ;;  %v2197_v61 = vadd.f32 %v2165_v0, %v2100_v32  ;;  %v1877_v35 = vmul.f32 %v2423_v34, %v4182_v63  ;;  %v2232_v0 = vld [vmem:[#allocation2 + $0x188] sm:$0xff] }
 0x171   : > { %2812 = vst.msk [vmem:[%s4705_s27 + $0x20] sm:$0xff] %vm1529_vm2, %v2780_v4  ;;  %3151 = vmatmul.msk.f32.gmra.mxu3 %vm1529_vm2, %v2485_v22  ;;  %v2263_v4 = vmul.f32 %v4265_v44, %v2230_v2  ;;  %v2004_v36 = vadd.f32 %v1972_v19, %v1907_v40  ;;  %v1684_v19 = vmul.f32 %v2230_v2, %v4144_v12  ;;  %v2425_v40 = vld [vmem:[#allocation2 + $0x182] sm:$0xff] }
 0x172   : > { %v2623_v17 = vpop.f32.mrf.mxu1  ;;  %v2458_v34 = vmul.f32 %v4662_v31, %v2425_v40  ;;  %v1878_v12 = vmul.f32 %v2424_v47, %v4182_v63  ;;  %v2168_v63 = vmul.f32 %v2425_v40, %v4253_v57 }
 0x173   : > { %v2713_v20 = vmul.f32 %v4681_v13, %v2623_v17  ;;  %v1811_v17 = vadd.f32 %v1779_v53, %v1682_v1  ;;  %v2295_v21 = vadd.f32 %v2263_v4, %v2197_v61  ;;  %v1909_v1 = vadd.f32 %v1877_v35, %v1812_v51 }
 0x174   : > { %v1974_v53 = vmul.f32 %v2231_v50, %v4214_v7 }
 0x175   : > { %v2749_v30 = vadd.f32 %v4691_v48, %v2713_v20  ;;  %v2360_v20 = vmul.f32 %v4272_v62, %v2327_v6  ;;  %v1908_v3 = vadd.f32 %v1876_v16, %v1811_v17 }
 0x177   : > { %v2781_v46 = vmax.f32 %v2749_v30, 0.0  ;;  %v2101_v30 = vadd.f32 %v2069_v15, %v2004_v36  ;;  %v2392_v5 = vadd.f32 %v2360_v20, %v2295_v21  ;;  %v2005_v28 = vadd.f32 %v1973_v49, %v1908_v3  ;;  %v2329_v15 = vld [vmem:[#allocation2 + $0x189] sm:$0xff]  ;;  %v2233_v49 = vld [vmem:[#allocation2 + $0x198] sm:$0xff] }
 0x178   : > { %v2362_v16 = vmul.f32 %v4272_v62, %v2329_v15 }
 0x179   : > { %2813 = vst.msk [vmem:[%s4705_s27 + $0x28] sm:$0xff] %vm1529_vm2, %v2781_v46  ;;  %3152 = vmatmul.msk.f32.gmra.mxu3 %vm1529_vm2, %v2486_v56  ;;  %v2457_v46 = vmul.f32 %v4662_v31, %v2424_v47  ;;  %v2070_v56 = vmul.f32 %v2327_v6, %v4250_v23  ;;  %v2198_v11 = vadd.f32 %v2166_v27, %v2101_v30 }
 0x17a   : > { %v2626_v25 = vpop.f32.mrf.mxu1  ;;  %v2459_v30 = vmul.f32 %v4662_v31, %v2426_v38  ;;  %v2072_v27 = vmul.f32 %v2329_v15, %v4250_v23 }
 0x17b   : > { %v2714_v8 = vmul.f32 %v4681_v13, %v2626_v25  ;;  %v2264_v25 = vmul.f32 %v4265_v44, %v2231_v50  ;;  %v2489_v41 = vadd.f32 %v2457_v46, %v2392_v5  ;;  %v2330_v50 = vld [vmem:[#allocation2 + $0x199] sm:$0xff]  ;;  %v2169_v46 = vmul.f32 %v2426_v38, %v4253_v57 }
 0x17c   : > { %v2363_v5 = vmul.f32 %v4272_v62, %v2330_v50 }
 0x17d   : > { %v2750_v60 = vadd.f32 %v4691_v48, %v2714_v8  ;;  %v2296_v42 = vadd.f32 %v2264_v25, %v2198_v11  ;;  %v2234_v25 = vld [vmem:[#allocation2 + $0x1a0] sm:$0xff] }
 0x17f   : > { %v2782_v22 = vmax.f32 %v2750_v60, 0.0  ;;  %v2102_v60 = vadd.f32 %v2070_v56, %v2005_v28  ;;  %v2393_v18 = vadd.f32 %v2361_v26, %v2296_v42  ;;  %v2267_v28 = vmul.f32 %v4265_v44, %v2234_v25 }
 0x181   : > { %2814 = vst.msk [vmem:[%s4705_s27 + $0x30] sm:$0xff] %vm1529_vm2, %v2782_v22  ;;  %3153 = vmatmul.msk.f32.gmra.mxu3 %vm1529_vm2, %v2487_v55  ;;  %v1781_v22 = vmul.f32 %v2327_v6, %v4152_v10  ;;  %v2265_v55 = vmul.f32 %v4265_v44, %v2232_v0  ;;  %v2199_v4 = vadd.f32 %v2167_v52, %v2102_v60 }
 0x182   : > { %v2629_v54 = vpop.f32.mrf.mxu1  ;;  %v2071_v10 = vmul.f32 %v2328_v14, %v4250_v23  ;;  %v2490_v36 = vadd.f32 %v2458_v34, %v2393_v18  ;;  %v2427_v14 = vld [vmem:[#allocation2 + $0x19a] sm:$0xff] }
 0x183   : > { %v2715_v39 = vmul.f32 %v4681_v13, %v2629_v54  ;;  %v2006_v54 = vadd.f32 %v1974_v53, %v1909_v1  ;;  %v1813_v61 = vadd.f32 %v1781_v22, %v1684_v19  ;;  %v2297_v17 = vadd.f32 %v2265_v55, %v2199_v4 }
 0x184   : > { %v2460_v57 = vmul.f32 %v4662_v31, %v2427_v14 }
 0x185   : > { %v2751_v24 = vadd.f32 %v4691_v48, %v2715_v39  ;;  %v1975_v39 = vmul.f32 %v2232_v0, %v4214_v7  ;;  %v1910_v20 = vadd.f32 %v1878_v12, %v1813_v61  ;;  %v2394_v47 = vadd.f32 %v2362_v16, %v2297_v17  ;;  %v2428_v0 = vld [vmem:[#allocation2 + $0x1a2] sm:$0xff] }
 0x186   : > { %v2461_v40 = vmul.f32 %v4662_v31, %v2428_v0 }
 0x187   : > { %v2783_v9 = vmax.f32 %v2751_v24, 0.0  ;;  %v2103_v24 = vadd.f32 %v2071_v10, %v2006_v54  ;;  %v2491_v59 = vadd.f32 %v2459_v30, %v2394_v47 }
 0x189   : > { %2815 = vst.msk [vmem:[%s4705_s27 + $0x38] sm:$0xff] %vm1529_vm2, %v2783_v9  ;;  %3154 = vmatmul.msk.f32.gmra.mxu3 %vm1529_vm2, %v2488_v37  ;;  %v2200_v3 = vadd.f32 %v2168_v63, %v2103_v24  ;;  %v2266_v9 = vmul.f32 %v4265_v44, %v2233_v49  ;;  %v2007_v37 = vadd.f32 %v1975_v39, %v1910_v20 }
 0x18a   : > { %v2632_v45 = vpop.f32.mrf.mxu1 }
 0x18b   : > { %v2716_v58 = vmul.f32 %v4681_v13, %v2632_v45  ;;  %v2298_v45 = vadd.f32 %v2266_v9, %v2200_v3  ;;  %v2104_v11 = vadd.f32 %v2072_v27, %v2007_v37 }
 0x18d   : > { %v2752_v8 = vadd.f32 %v4691_v48, %v2716_v58  ;;  %v2395_v51 = vadd.f32 %v2363_v5, %v2298_v45  ;;  %v2201_v35 = vadd.f32 %v2169_v46, %v2104_v11 }
 0x18f   : > { %v2784_v32 = vmax.f32 %v2752_v8, 0.0  ;;  %v2331_v8 = vld [vmem:[#allocation2 + $0x1a1] sm:$0xff]  ;;  %v2299_v42 = vadd.f32 %v2267_v28, %v2201_v35 }
 0x190   : > { %v2364_v60 = vmul.f32 %v4272_v62, %v2331_v8 }
 0x191   : > { %2816 = vst.msk [vmem:[%s4705_s27 + $0x40] sm:$0xff] %vm1529_vm2, %v2784_v32  ;;  %3155 = vmatmul.msk.f32.gmra.mxu3 %vm1529_vm2, %v2489_v41  ;;  %v2492_v41 = vadd.f32 %v2460_v57, %v2395_v51 }
 0x192   : > { %v2635_v29 = vpop.f32.mrf.mxu1  ;;  %v2396_v32 = vadd.f32 %v2364_v60, %v2299_v42 }
 0x193   : > { %v2717_v2 = vmul.f32 %v4681_v13, %v2635_v29 }
 0x194   : > { %v2493_v22 = vadd.f32 %v2461_v40, %v2396_v32 }
 0x195   : > { %v2753_v6 = vadd.f32 %v4691_v48, %v2717_v2 }
 0x197   : > { %v2785_v33 = vmax.f32 %v2753_v6, 0.0 }
 0x199   : > { %2817 = vst.msk [vmem:[%s4705_s27 + $0x48] sm:$0xff] %vm1529_vm2, %v2785_v33  ;;  %3156 = vmatmul.msk.f32.gmra.mxu3 %vm1529_vm2, %v2490_v36 }
 0x19a   : > { %v2638_v21 = vpop.f32.mrf.mxu1 }
 0x19b   : > { %v2718_v7 = vmul.f32 %v4681_v13, %v2638_v21 }
 0x19d   : > { %v2754_v43 = vadd.f32 %v4691_v48, %v2718_v7 }
 0x19f   : > { %v2786_v56 = vmax.f32 %v2754_v43, 0.0 }
 0x1a1   : > { %2818 = vst.msk [vmem:[%s4705_s27 + $0x50] sm:$0xff] %vm1529_vm2, %v2786_v56  ;;  %3157 = vmatmul.msk.f32.gmra.mxu3 %vm1529_vm2, %v2491_v59 }
 0x1a2   : > { %v2641_v23 = vpop.f32.mrf.mxu1 }
 0x1a3   : > { %v2719_v58 = vmul.f32 %v4681_v13, %v2641_v23 }
 0x1a5   : > { %v2755_v26 = vadd.f32 %v4691_v48, %v2719_v58 }
 0x1a7   : > { %v2787_v52 = vmax.f32 %v2755_v26, 0.0 }
 0x1a9   : > { %2819 = vst.msk [vmem:[%s4705_s27 + $0x58] sm:$0xff] %vm1529_vm2, %v2787_v52  ;;  %3158 = vmatmul.msk.f32.gmra.mxu3 %vm1529_vm2, %v2492_v41 }
 0x1aa   : > { %v2644_v44 = vpop.f32.mrf.mxu1 }
 0x1ab   : > { %v2720_v19 = vmul.f32 %v4681_v13, %v2644_v44 }
 0x1ad   : > { %v2756_v1 = vadd.f32 %v4691_v48, %v2720_v19 }
 0x1af   : > { %v2788_v53 = vmax.f32 %v2756_v1, 0.0 }
 0x1b1   : > { %2820 = vst.msk [vmem:[%s4705_s27 + $0x60] sm:$0xff] %vm1529_vm2, %v2788_v53  ;;  %3159 = vmatmul.msk.f32.gmra.mxu3 %vm1529_vm2, %v2493_v22 }
 0x1b2   : > { %v2647_v62 = vpop.f32.mrf.mxu1 }
 0x1b3   : > { %v2721_v55 = vmul.f32 %v4681_v13, %v2647_v62 }
 0x1b5   : > { %v2757_v29 = vadd.f32 %v4691_v48, %v2721_v55 }
 0x1b7   : > { %v2789_v18 = vmax.f32 %v2757_v29, 0.0 }
 0x1b9   : > { %2821 = vst.msk [vmem:[%s4705_s27 + $0x68] sm:$0xff] %vm1529_vm2, %v2789_v18 }
 0x1ba   : > { %v2650_v34 = vpop.f32.mrf.mxu1 }
 0x1bb   : > { %v2722_v31 = vmul.f32 %v4681_v13, %v2650_v34 }
 0x1bc   : > { %v2656_v4 = vpop.f32.mrf.mxu3 }
 0x1bd   : > { %v2758_v12 = vadd.f32 %v4691_v48, %v2722_v31  ;;  %v2724_v2 = vmul.f32 %v4681_v13, %v2656_v4 }
 0x1bf   : > { %v2790_v15 = vmax.f32 %v2758_v12, 0.0  ;;  %v2760_v54 = vadd.f32 %v4691_v48, %v2724_v2 }
 0x1c1   : > { %2822 = vst.msk [vmem:[%s4705_s27 + $0x70] sm:$0xff] %vm1529_vm2, %v2790_v15  ;;  %v2792_v10 = vmax.f32 %v2760_v54, 0.0 }
 0x1c2   : > { %v2653_v61 = vpop.f32.mrf.mxu1 }
 0x1c3   : > { %2824 = vst.msk [vmem:[%s4705_s27 + $0x80] sm:$0xff] %vm1529_vm2, %v2792_v10  ;;  %v2723_v6 = vmul.f32 %v4681_v13, %v2653_v61 }
 0x1c4   : > { %v2659_v36 = vpop.f32.mrf.mxu3 }
 0x1c5   : > { %v2759_v17 = vadd.f32 %v4691_v48, %v2723_v6  ;;  %v2725_v16 = vmul.f32 %v4681_v13, %v2659_v36 }
 0x1c7   : > { %v2791_v39 = vmax.f32 %v2759_v17, 0.0  ;;  %v2761_v33 = vadd.f32 %v4691_v48, %v2725_v16 }
 0x1c9   : > { %2823 = vst.msk [vmem:[%s4705_s27 + $0x78] sm:$0xff] %vm1529_vm2, %v2791_v39  ;;  %v2793_v38 = vmax.f32 %v2761_v33, 0.0 }
 0x1cb   : > { %2825 = vst.msk [vmem:[%s4705_s27 + $0x88] sm:$0xff] %vm1529_vm2, %v2793_v38 }
 0x1cc   : > { %v2662_v24 = vpop.f32.mrf.mxu3 }
 0x1cd   : > { %v2726_v63 = vmul.f32 %v4681_v13, %v2662_v24 }
 0x1cf   : > { %v2762_v20 = vadd.f32 %v4691_v48, %v2726_v63 }
 0x1d1   : > { %v2794_v49 = vmax.f32 %v2762_v20, 0.0 }
 0x1d3   : > { %2826 = vst.msk [vmem:[%s4705_s27 + $0x90] sm:$0xff] %vm1529_vm2, %v2794_v49 }
 0x1d4   : > { %v2665_v21 = vpop.f32.mrf.mxu3 }
 0x1d5   : > { %v2727_v47 = vmul.f32 %v4681_v13, %v2665_v21 }
 0x1d7   : > { %v2763_v30 = vadd.f32 %v4691_v48, %v2727_v47 }
 0x1d9   : > { %v2795_v27 = vmax.f32 %v2763_v30, 0.0 }
 0x1db   : > { %2827 = vst.msk [vmem:[%s4705_s27 + $0x98] sm:$0xff] %vm1529_vm2, %v2795_v27 }
 0x1dc   : > { %v2668_v7 = vpop.f32.mrf.mxu3 }
 0x1dd   : > { %v2728_v3 = vmul.f32 %v4681_v13, %v2668_v7 }
 0x1df   : > { %v2764_v9 = vadd.f32 %v4691_v48, %v2728_v3 }
 0x1e1   : > { %v2796_v37 = vmax.f32 %v2764_v9, 0.0 }
 0x1e3   : > { %2828 = vst.msk [vmem:[%s4705_s27 + $0xa0] sm:$0xff] %vm1529_vm2, %v2796_v37 }
 0x1e4   : > { %v2671_v50 = vpop.f32.mrf.mxu3 }
 0x1e5   : > { %v2729_v43 = vmul.f32 %v4681_v13, %v2671_v50 }
 0x1e7   : > { %v2765_v59 = vadd.f32 %v4691_v48, %v2729_v43 }
 0x1e9   : > { %v2797_v46 = vmax.f32 %v2765_v59, 0.0 }
 0x1eb   : > { %2829 = vst.msk [vmem:[%s4705_s27 + $0xa8] sm:$0xff] %vm1529_vm2, %v2797_v46 }
 0x1ec   : > { %v2674_v56 = vpop.f32.mrf.mxu3 }
 0x1ed   : > { %v2730_v45 = vmul.f32 %v4681_v13, %v2674_v56 }
 0x1ef   : > { %v2766_v5 = vadd.f32 %v4691_v48, %v2730_v45 }
 0x1f1   : > { %v2798_v11 = vmax.f32 %v2766_v5, 0.0 }
 0x1f3   : > { %2830 = vst.msk [vmem:[%s4705_s27 + $0xb0] sm:$0xff] %vm1529_vm2, %v2798_v11 }
 0x1f4   : > { %v2677_v25 = vpop.f32.mrf.mxu3 }
 0x1f5   : > { %v2731_v14 = vmul.f32 %v4681_v13, %v2677_v25 }
 0x1f7   : > { %v2767_v23 = vadd.f32 %v4691_v48, %v2731_v14 }
 0x1f9   : > { %v2799_v28 = vmax.f32 %v2767_v23, 0.0 }
 0x1fb   : > { %2831 = vst.msk [vmem:[%s4705_s27 + $0xb8] sm:$0xff] %vm1529_vm2, %v2799_v28 }
 0x1fc   : > { %v2680_v58 = vpop.f32.mrf.mxu3 }
 0x1fd   : > { %v2732_v51 = vmul.f32 %v4681_v13, %v2680_v58 }
 0x1ff   : > { %v2768_v57 = vadd.f32 %v4691_v48, %v2732_v51 }
 0x201   : > { %v2800_v35 = vmax.f32 %v2768_v57, 0.0 }
 0x203   : > { %2832 = vst.msk [vmem:[%s4705_s27 + $0xc0] sm:$0xff] %vm1529_vm2, %v2800_v35 }
 0x204   : > { %v2683_v8 = vpop.f32.mrf.mxu3 }
 0x205   : > { %v2733_v26 = vmul.f32 %v4681_v13, %v2683_v8 }
 0x207   : > { %v2769_v52 = vadd.f32 %v4691_v48, %v2733_v26 }
 0x209   : > { %v2801_v41 = vmax.f32 %v2769_v52, 0.0 }
 0x20b   : > { %2833 = vst.msk [vmem:[%s4705_s27 + $0xc8] sm:$0xff] %vm1529_vm2, %v2801_v41 }
 0x20c   : > { %v2686_v42 = vpop.f32.mrf.mxu3 }
 0x20d   : > { %v2734_v60 = vmul.f32 %v4681_v13, %v2686_v42 }
 0x20f   : > { %v2770_v0 = vadd.f32 %v4691_v48, %v2734_v60 }
 0x211   : > { %v2802_v44 = vmax.f32 %v2770_v0, 0.0 }
 0x213   : > { %2834 = vst.msk [vmem:[%s4705_s27 + $0xd0] sm:$0xff] %vm1529_vm2, %v2802_v44 }
 0x214   : > { %v2689_v19 = vpop.f32.mrf.mxu3 }
 0x215   : > { %v2735_v32 = vmul.f32 %v4681_v13, %v2689_v19 }
 0x217   : > { %v2771_v40 = vadd.f32 %v4691_v48, %v2735_v32 }
 0x219   : > { %v2803_v1 = vmax.f32 %v2771_v40, 0.0 }
 0x21b   : > { %2835 = vst.msk [vmem:[%s4705_s27 + $0xd8] sm:$0xff] %vm1529_vm2, %v2803_v1 }
 0x21c   : > { %v2692_v53 = vpop.f32.mrf.mxu3 }
 0x21d   : > { %v2736_v22 = vmul.f32 %v4681_v13, %v2692_v53 }
 0x21f   : > { %v2772_v62 = vadd.f32 %v4691_v48, %v2736_v22 }
 0x221   : > { %v2804_v55 = vmax.f32 %v2772_v62, 0.0 }
 0x223   : > { %2836 = vst.msk [vmem:[%s4705_s27 + $0xe0] sm:$0xff] %vm1529_vm2, %v2804_v55 }
 0x224   : > { %v2695_v29 = vpop.f32.mrf.mxu3 }
 0x225   : > { %v2737_v18 = vmul.f32 %v4681_v13, %v2695_v29 }
 0x227   : > { %v2773_v34 = vadd.f32 %v4691_v48, %v2737_v18 }
 0x229   : > { %v2805_v31 = vmax.f32 %v2773_v34, 0.0 }
 0x22b   : > { %2837 = vst.msk [vmem:[%s4705_s27 + $0xe8] sm:$0xff] %vm1529_vm2, %v2805_v31 }
 0x22c   : > { %v2698_v4 = vpop.f32.mrf.mxu3 }
 0x22d   : > { %v2738_v12 = vmul.f32 %v4681_v13, %v2698_v4 }
 0x22f   : > { %v2774_v2 = vadd.f32 %v4691_v48, %v2738_v12 }
 0x231   : > { %v2806_v15 = vmax.f32 %v2774_v2, 0.0 }
 0x233   : > { %2838 = vst.msk [vmem:[%s4705_s27 + $0xf0] sm:$0xff] %vm1529_vm2, %v2806_v15 }
 0x234   : > { %v2701_v54 = vpop.f32.mrf.mxu3 }
 0x235   : > { %v2739_v10 = vmul.f32 %v4681_v13, %v2701_v54 }
 0x237   : > { %v2775_v61 = vadd.f32 %v4691_v48, %v2739_v10 }
 0x239   : > { %v2807_v6 = vmax.f32 %v2775_v61, 0.0 }
 0x23b   : > { %2839 = vst.msk [vmem:[%s4705_s27 + $0xf8] sm:$0xff] %vm1529_vm2, %v2807_v6 }
 0x23c PF: > { %s19_s30 = sadd.s32 1, %s3191_s30  }
 0x23d   : > { %p16_p4 = scmp.ge.s32.totalorder %s19_s30, 4  }
 0x23f   :  { %18 = sbr.rel (!%p16_p4) target bundleno = 1 (0x1), region = 90 }

</bundles_post_ra>
